<compile_context>
chip_gen: v7x
topology: tpu7x:2x2x1
jax: 0.10.0
libtpu: 0.0.40
codegen_flags: <defaults>
</compile_context>

<pallas_src>
import functools
import math

import jax
import jax.numpy as jnp
from jax import lax
from jax.experimental import pallas as pl
from jax.experimental.pallas import tpu as pltpu


def _round_up(x, n):
    return -(-x // n) * n


def _lrm_kernel(x_ref, wkv_ref, exp_ref, wu_ref, o_ref, col_ref, *,
                kh, kw, sh, sw, th, wo, cin, nbb, inv_t):
    # x_ref  : (Hp_pad, Wp, Cin)   bf16 full padded image (resident across ti)
    # wkv_ref: (kh*kw*Cin, NBB+NB) f32  fused [V_op | key_op] im2col weights
    # exp_ref: (NB, NBB)           f32  0/1 block expansion (repeat_interleave)
    # wu_ref : (Cout, NBB)         f32  U_op 1x1 weights (pre-transposed)
    # o_ref  : (Cout, th*wo)       f32  lane-dense, NCHW-ready output tile
    # col_ref: (th*wo, kh*kw*Cin)  f32  VMEM im2col scratch
    m = th * wo
    ti = pl.program_id(1)
    row0 = ti * (th * sh)

    def rows(start):
        return pl.ds(start, th) if sh == 1 else pl.ds(start, th, sh)

    def cols(start):
        return pl.ds(start, wo) if sw == 1 else pl.ds(start, wo, sw)

    # In-kernel im2col: one window copy per tap into the VMEM scratch (single
    # bf16->f32 upcast), so the tap reduction becomes ONE matmul with
    # K = kh*kw*Cin instead of kh*kw tiny K=Cin dots plus a VMEM-resident
    # accumulator that round-trips on every tap.
    for u in range(kh):
        for v in range(kw):
            t = u * kw + v
            tap = x_ref[rows(row0 + u), cols(v), :]               # (th, wo, cin)
            # (th, wo, cin) -> (m, cin): collapses leading dims, minor dim
            # untouched -> layout-preserving relayout-free when wo % 8 == 0.
            col_ref[:, t * cin:(t + 1) * cin] = (
                tap.reshape(m, cin).astype(jnp.float32))

    # Fused [V | key] matmul (f32 x f32 = f32: portable + exact).
    acc = jnp.dot(col_ref[...], wkv_ref[...],
                  preferred_element_type=jnp.float32)             # (m, NBB+NB)

    val = acc[:, :nbb]                                            # (m, NBB)
    sims = acc[:, nbb:] * inv_t                                   # (m, NB)

    # Channel softmax over the n_blocks axis (exact reciprocal; cheap).
    mx = jnp.max(sims, axis=-1, keepdims=True)
    ex = jnp.exp(sims - mx)
    attn = ex / jnp.sum(ex, axis=-1, keepdims=True)

    # Per-block-contiguous repeat via 0/1 expansion matmul, gate in f32.
    attn_rep = jnp.dot(attn, exp_ref[...],
                       preferred_element_type=jnp.float32)        # (m, NBB)
    gated = val * attn_rep

    # U_op emitted pre-transposed: (Cout, NBB) x (m, NBB)^T -> (Cout, m).
    # No in-kernel output transpose; MXU N dim is the big spatial axis and
    # the store is lane-dense and already NCHW-ordered.
    out_cm = lax.dot_general(wu_ref[...], gated,
                             dimension_numbers=(((1,), (1,)), ((), ())),
                             preferred_element_type=jnp.float32)
    o_ref[...] = out_cm.astype(o_ref.dtype)


def _pick_tile_rows(Ho, Wo, Cin, kh, kw, n_cols, tile_rows=None):
    """Output rows per grid step.

    Targets ~2048 matmul rows, keeps m = TH*Wo a multiple of 128 whenever the
    row axis is actually tiled (lane-dense, unmasked stores), and caps the
    per-step f32 intermediates using lane-PADDED widths (K and N pad to 128)
    so the estimate reflects real VMEM footprint, not logical bytes.
    """
    if tile_rows is not None:
        return max(1, min(Ho, int(tile_rows)))
    g = 128 // math.gcd(Wo, 128)          # TH granule so (TH*Wo) % 128 == 0
    th = max(1, 2048 // max(Wo, 1))
    th = max(g, (th // g) * g)
    k_pad = _round_up(kh * kw * Cin, 128)
    n_pad = _round_up(n_cols, 128)

    def step_bytes(th_):
        m = th_ * Wo
        # im2col scratch + fused-dot result + gated/attn_rep temporaries.
        return 4 * m * (k_pad + 3 * n_pad)

    while th > g and step_bytes(th) > 8 * 1024 * 1024:
        th -= g
    return min(th, Ho)


@functools.partial(jax.jit, static_argnames=(
    "n_blocks", "block_size", "padding", "stride", "t", "tile_rows"))
def lrm_conv_v2_forward(x, wk, wv, wu, *, n_blocks, block_size,
                        padding=(1, 1), stride=(1, 1), t=1.0, tile_rows=None):
    """x: NCHW f32. wk:(NB,Cin,kh,kw) wv:(NB*BS,Cin,kh,kw) wu:(Cout,NB*BS,1,1)."""
    B, Cin, H, W = x.shape
    NB, _, kh, kw = wk.shape
    assert NB == n_blocks
    NBB = n_blocks * block_size
    Cout = wu.shape[0]
    ph, pw = padding
    sh, sw = stride
    Hp, Wp = H + 2 * ph, W + 2 * pw
    Ho = (Hp - kh) // sh + 1
    Wo = (Wp - kw) // sw + 1

    TH = _pick_tile_rows(Ho, Wo, Cin, kh, kw, NBB + NB, tile_rows)
    n_t = -(-Ho // TH)
    m_tile = TH * Wo

    # Rows the kernel may touch (last tile can be ragged -> extra zero rows).
    rows_needed = (n_t * TH - 1) * sh + kh
    extra = max(0, rows_needed - Hp)
    Hp_pad = Hp + extra

    # NHWC, spatially padded activation, streamed as bf16 (halves activation
    # HBM->VMEM bytes).  The whole padded image is ONE input block, re-used
    # across the row-tile grid axis: no HBM slab-stack materialization.
    x_nhwc = jnp.transpose(x, (0, 2, 3, 1))
    xp = jnp.pad(x_nhwc, ((0, 0), (ph, ph + extra), (pw, pw), (0, 0)))
    xp = xp.astype(jnp.bfloat16)

    # Fused [V_op | key_op] im2col weight: row (u*kw + v)*Cin + c multiplies
    # x[.., row+u, col+v, c] -- matches the in-kernel im2col column order.
    wv_t = jnp.transpose(wv, (2, 3, 1, 0)).reshape(kh * kw * Cin, NBB)
    wk_t = jnp.transpose(wk, (2, 3, 1, 0)).reshape(kh * kw * Cin, NB)
    wkv = jnp.concatenate([wv_t, wk_t], axis=-1).astype(jnp.float32)
    # E[b, b*BS:(b+1)*BS] = 1  =>  attn @ E == repeat_interleave(attn, BS)
    expand = jnp.repeat(jnp.eye(NB, dtype=jnp.float32), block_size, axis=1)
    wu_m = wu.reshape(Cout, NBB).astype(jnp.float32)              # (Cout, NBB)

    kernel = functools.partial(
        _lrm_kernel, kh=kh, kw=kw, sh=sh, sw=sw, th=TH, wo=Wo,
        cin=Cin, nbb=NBB, inv_t=float(1.0 / t))

    out = pl.pallas_call(
        kernel,
        out_shape=jax.ShapeDtypeStruct((B, Cout, n_t * m_tile), jnp.float32),
        grid_spec=pltpu.PrefetchScalarGridSpec(
            num_scalar_prefetch=0,
            grid=(B, n_t),
            in_specs=[
                # Full padded image per batch element; index_map ignores the
                # row-tile axis so the block stays resident (no re-fetch)
                # while ti sweeps the rows of one image.
                pl.BlockSpec((None, Hp_pad, Wp, Cin),
                             lambda b, ti: (b, 0, 0, 0)),
                pl.BlockSpec((kh * kw * Cin, NBB + NB), lambda b, ti: (0, 0)),
                pl.BlockSpec((NB, NBB), lambda b, ti: (0, 0)),
                pl.BlockSpec((Cout, NBB), lambda b, ti: (0, 0)),
            ],
            # (Cout, m_tile) tiles of a (B, Cout, n_t*m_tile) array: already
            # NCHW-ordered and lane-dense -> no wrapper transpose pass.
            out_specs=pl.BlockSpec((None, Cout, m_tile),
                                   lambda b, ti: (b, 0, ti)),
            scratch_shapes=[pltpu.VMEM((m_tile, kh * kw * Cin), jnp.float32)],
        ),
        compiler_params=pltpu.CompilerParams(
            dimension_semantics=("parallel", "parallel"),
            # 48 MiB: comfortable on v5e/v6e (128 MiB VMEM), headroom for
            # Mosaic internal scratch on v7x (64 MiB per TC).
            vmem_limit_bytes=48 * 1024 * 1024,
        ),
    )(xp, wkv, expand, wu_m)

    # Rows beyond Ho in the last tile are padding; slice them off (free when
    # Ho % TH == 0).  No transpose: the kernel already emitted NCHW order.
    return out[:, :, : Ho * Wo].reshape(B, Cout, Ho, Wo)


def _reference_forward(x, wk, wv, wu, *, block_size, padding, stride, t):
    """Pure-JAX f32 reference mirroring the PyTorch forward (NCHW / OIHW)."""
    dn = ("NCHW", "OIHW", "NCHW")
    pad2 = [(padding[0], padding[0]), (padding[1], padding[1])]
    sims = lax.conv_general_dilated(x, wk, stride, pad2, dimension_numbers=dn)
    attn = jax.nn.softmax(sims / t, axis=1)
    v = lax.conv_general_dilated(x, wv, stride, pad2, dimension_numbers=dn)
    gated = v * jnp.repeat(attn, block_size, axis=1)
    return lax.conv_general_dilated(gated, wu, (1, 1), [(0, 0), (0, 0)],
                                    dimension_numbers=dn)


if __name__ == "__main__":
    B, Cin, H, W = 2, 4, 16, 16
    n_blocks, block_size = 4, 8
    Cout = 8
    kh = kw = 3
    padding, stride = (1, 1), (1, 1)
    t = 1.0

    key = jax.random.PRNGKey(0)
    kx, kk, kv, ku = jax.random.split(key, 4)
    x = jax.random.normal(kx, (B, Cin, H, W), dtype=jnp.float32)
    wk = jax.random.normal(kk, (n_blocks, Cin, kh, kw), dtype=jnp.float32) * 0.1
    wv = jax.random.normal(kv, (n_blocks * block_size, Cin, kh, kw),
                           dtype=jnp.float32) * 0.1
    wu = jax.random.normal(ku, (Cout, n_blocks * block_size, 1, 1),
                           dtype=jnp.float32) * 0.1

    out = lrm_conv_v2_forward(
        x, wk, wv, wu,
        n_blocks=n_blocks, block_size=block_size,
        padding=padding, stride=stride, t=t,
    )
    out = jax.block_until_ready(out)

    ref = _reference_forward(x, wk, wv, wu, block_size=block_size,
                             padding=padding, stride=stride, t=t)
    ref = jax.block_until_ready(ref)

    assert out.shape == (B, Cout, H, W), out.shape
    err = float(jnp.max(jnp.abs(out - ref)))
    # Only remaining precision loss is the bf16 activation stream (weights,
    # gating, softmax and all accumulation are f32) -> tight-ish tolerance.
    assert jnp.allclose(out, ref, atol=2e-2, rtol=2e-2), err

    print("KERNEL_OK")
</pallas_src>

<mosaic_0001>
module attributes {stable_mosaic.version = 11 : i64} {
  func.func @_lrm_kernel(%arg0: i32, %arg1: i32, %arg2: memref<1x18x18x4xbf16, #tpu.memory_space<vmem>>, %arg3: memref<36x36xf32, #tpu.memory_space<vmem>>, %arg4: memref<4x32xf32, #tpu.memory_space<vmem>>, %arg5: memref<8x32xf32, #tpu.memory_space<vmem>>, %arg6: memref<1x8x256xf32, #tpu.memory_space<vmem>>, %arg7: memref<256x36xf32, #tpu.memory_space<vmem>>) attributes {dimension_semantics = [#tpu.dimension_semantics<parallel>, #tpu.dimension_semantics<parallel>], iteration_bounds = array<i64: 2, 1>, scalar_prefetch = 0 : i64, scratch_operands = 1 : i64, tpu.core_type = #tpu.core_type<tc>, window_params = [{transform_indices = @transform_0, window_bounds = array<i64: 1, 18, 18, 4>}, {pipeline_mode = #tpu.pipeline_mode<synchronous>, transform_indices = @transform_1, window_bounds = array<i64: 36, 36>}, {pipeline_mode = #tpu.pipeline_mode<synchronous>, transform_indices = @transform_2, window_bounds = array<i64: 4, 32>}, {pipeline_mode = #tpu.pipeline_mode<synchronous>, transform_indices = @transform_3, window_bounds = array<i64: 8, 32>}, {transform_indices = @transform_4, window_bounds = array<i64: 1, 8, 256>}]} {
    %c16_i32 = arith.constant 16 : i32
    %0 = arith.muli %arg1, %c16_i32 : i32
    %c0_i32 = arith.constant 0 : i32
    %1 = arith.addi %0, %c0_i32 : i32
    %c0 = arith.constant 0 : index
    %2 = arith.index_cast %1 : i32 to index
    %c0_0 = arith.constant 0 : index
    %c0_1 = arith.constant 0 : index
    %3 = vector.load %arg2[%c0, %2, %c0_0, %c0_1] : memref<1x18x18x4xbf16, #tpu.memory_space<vmem>>, vector<1x16x16x4xbf16>
    %4 = vector.shape_cast %3 : vector<1x16x16x4xbf16> to vector<16x16x4xbf16>
    %5 = vector.shape_cast %4 : vector<16x16x4xbf16> to vector<256x4xbf16>
    %6 = arith.extf %5 : vector<256x4xbf16> to vector<256x4xf32>
    %c0_2 = arith.constant 0 : index
    %c0_3 = arith.constant 0 : index
    %7 = vector.load %arg7[%c0_2, %c0_3] : memref<256x36xf32, #tpu.memory_space<vmem>>, vector<256x4xf32>
    tpu.vector_store %arg7[%c0_2, %c0_3], %6 {strides = array<i32>} : memref<256x36xf32, #tpu.memory_space<vmem>>, vector<256x4xf32>,
    %c0_i32_4 = arith.constant 0 : i32
    %8 = arith.addi %0, %c0_i32_4 : i32
    %c0_5 = arith.constant 0 : index
    %9 = arith.index_cast %8 : i32 to index
    %c1 = arith.constant 1 : index
    %c0_6 = arith.constant 0 : index
    %10 = vector.load %arg2[%c0_5, %9, %c1, %c0_6] : memref<1x18x18x4xbf16, #tpu.memory_space<vmem>>, vector<1x16x16x4xbf16>
    %11 = vector.shape_cast %10 : vector<1x16x16x4xbf16> to vector<16x16x4xbf16>
    %12 = vector.shape_cast %11 : vector<16x16x4xbf16> to vector<256x4xbf16>
    %13 = arith.extf %12 : vector<256x4xbf16> to vector<256x4xf32>
    %c0_7 = arith.constant 0 : index
    %c4 = arith.constant 4 : index
    %14 = vector.load %arg7[%c0_7, %c4] : memref<256x36xf32, #tpu.memory_space<vmem>>, vector<256x4xf32>
    tpu.vector_store %arg7[%c0_7, %c4], %13 {strides = array<i32>} : memref<256x36xf32, #tpu.memory_space<vmem>>, vector<256x4xf32>,
    %c0_i32_8 = arith.constant 0 : i32
    %15 = arith.addi %0, %c0_i32_8 : i32
    %c0_9 = arith.constant 0 : index
    %16 = arith.index_cast %15 : i32 to index
    %c2 = arith.constant 2 : index
    %c0_10 = arith.constant 0 : index
    %17 = vector.load %arg2[%c0_9, %16, %c2, %c0_10] : memref<1x18x18x4xbf16, #tpu.memory_space<vmem>>, vector<1x16x16x4xbf16>
    %18 = vector.shape_cast %17 : vector<1x16x16x4xbf16> to vector<16x16x4xbf16>
    %19 = vector.shape_cast %18 : vector<16x16x4xbf16> to vector<256x4xbf16>
    %20 = arith.extf %19 : vector<256x4xbf16> to vector<256x4xf32>
    %c0_11 = arith.constant 0 : index
    %c8 = arith.constant 8 : index
    %21 = vector.load %arg7[%c0_11, %c8] : memref<256x36xf32, #tpu.memory_space<vmem>>, vector<256x4xf32>
    tpu.vector_store %arg7[%c0_11, %c8], %20 {strides = array<i32>} : memref<256x36xf32, #tpu.memory_space<vmem>>, vector<256x4xf32>,
    %c1_i32 = arith.constant 1 : i32
    %22 = arith.addi %0, %c1_i32 : i32
    %c0_12 = arith.constant 0 : index
    %23 = arith.index_cast %22 : i32 to index
    %c0_13 = arith.constant 0 : index
    %c0_14 = arith.constant 0 : index
    %24 = vector.load %arg2[%c0_12, %23, %c0_13, %c0_14] : memref<1x18x18x4xbf16, #tpu.memory_space<vmem>>, vector<1x16x16x4xbf16>
    %25 = vector.shape_cast %24 : vector<1x16x16x4xbf16> to vector<16x16x4xbf16>
    %26 = vector.shape_cast %25 : vector<16x16x4xbf16> to vector<256x4xbf16>
    %27 = arith.extf %26 : vector<256x4xbf16> to vector<256x4xf32>
    %c0_15 = arith.constant 0 : index
    %c12 = arith.constant 12 : index
    %28 = vector.load %arg7[%c0_15, %c12] : memref<256x36xf32, #tpu.memory_space<vmem>>, vector<256x4xf32>
    tpu.vector_store %arg7[%c0_15, %c12], %27 {strides = array<i32>} : memref<256x36xf32, #tpu.memory_space<vmem>>, vector<256x4xf32>,
    %c1_i32_16 = arith.constant 1 : i32
    %29 = arith.addi %0, %c1_i32_16 : i32
    %c0_17 = arith.constant 0 : index
    %30 = arith.index_cast %29 : i32 to index
    %c1_18 = arith.constant 1 : index
    %c0_19 = arith.constant 0 : index
    %31 = vector.load %arg2[%c0_17, %30, %c1_18, %c0_19] : memref<1x18x18x4xbf16, #tpu.memory_space<vmem>>, vector<1x16x16x4xbf16>
    %32 = vector.shape_cast %31 : vector<1x16x16x4xbf16> to vector<16x16x4xbf16>
    %33 = vector.shape_cast %32 : vector<16x16x4xbf16> to vector<256x4xbf16>
    %34 = arith.extf %33 : vector<256x4xbf16> to vector<256x4xf32>
    %c0_20 = arith.constant 0 : index
    %c16 = arith.constant 16 : index
    %35 = vector.load %arg7[%c0_20, %c16] : memref<256x36xf32, #tpu.memory_space<vmem>>, vector<256x4xf32>
    tpu.vector_store %arg7[%c0_20, %c16], %34 {strides = array<i32>} : memref<256x36xf32, #tpu.memory_space<vmem>>, vector<256x4xf32>,
    %c1_i32_21 = arith.constant 1 : i32
    %36 = arith.addi %0, %c1_i32_21 : i32
    %c0_22 = arith.constant 0 : index
    %37 = arith.index_cast %36 : i32 to index
    %c2_23 = arith.constant 2 : index
    %c0_24 = arith.constant 0 : index
    %38 = vector.load %arg2[%c0_22, %37, %c2_23, %c0_24] : memref<1x18x18x4xbf16, #tpu.memory_space<vmem>>, vector<1x16x16x4xbf16>
    %39 = vector.shape_cast %38 : vector<1x16x16x4xbf16> to vector<16x16x4xbf16>
    %40 = vector.shape_cast %39 : vector<16x16x4xbf16> to vector<256x4xbf16>
    %41 = arith.extf %40 : vector<256x4xbf16> to vector<256x4xf32>
    %c0_25 = arith.constant 0 : index
    %c20 = arith.constant 20 : index
    %42 = vector.load %arg7[%c0_25, %c20] : memref<256x36xf32, #tpu.memory_space<vmem>>, vector<256x4xf32>
    tpu.vector_store %arg7[%c0_25, %c20], %41 {strides = array<i32>} : memref<256x36xf32, #tpu.memory_space<vmem>>, vector<256x4xf32>,
    %c2_i32 = arith.constant 2 : i32
    %43 = arith.addi %0, %c2_i32 : i32
    %c0_26 = arith.constant 0 : index
    %44 = arith.index_cast %43 : i32 to index
    %c0_27 = arith.constant 0 : index
    %c0_28 = arith.constant 0 : index
    %45 = vector.load %arg2[%c0_26, %44, %c0_27, %c0_28] : memref<1x18x18x4xbf16, #tpu.memory_space<vmem>>, vector<1x16x16x4xbf16>
    %46 = vector.shape_cast %45 : vector<1x16x16x4xbf16> to vector<16x16x4xbf16>
    %47 = vector.shape_cast %46 : vector<16x16x4xbf16> to vector<256x4xbf16>
    %48 = arith.extf %47 : vector<256x4xbf16> to vector<256x4xf32>
    %c0_29 = arith.constant 0 : index
    %c24 = arith.constant 24 : index
    %49 = vector.load %arg7[%c0_29, %c24] : memref<256x36xf32, #tpu.memory_space<vmem>>, vector<256x4xf32>
    tpu.vector_store %arg7[%c0_29, %c24], %48 {strides = array<i32>} : memref<256x36xf32, #tpu.memory_space<vmem>>, vector<256x4xf32>,
    %c2_i32_30 = arith.constant 2 : i32
    %50 = arith.addi %0, %c2_i32_30 : i32
    %c0_31 = arith.constant 0 : index
    %51 = arith.index_cast %50 : i32 to index
    %c1_32 = arith.constant 1 : index
    %c0_33 = arith.constant 0 : index
    %52 = vector.load %arg2[%c0_31, %51, %c1_32, %c0_33] : memref<1x18x18x4xbf16, #tpu.memory_space<vmem>>, vector<1x16x16x4xbf16>
    %53 = vector.shape_cast %52 : vector<1x16x16x4xbf16> to vector<16x16x4xbf16>
    %54 = vector.shape_cast %53 : vector<16x16x4xbf16> to vector<256x4xbf16>
    %55 = arith.extf %54 : vector<256x4xbf16> to vector<256x4xf32>
    %c0_34 = arith.constant 0 : index
    %c28 = arith.constant 28 : index
    %56 = vector.load %arg7[%c0_34, %c28] : memref<256x36xf32, #tpu.memory_space<vmem>>, vector<256x4xf32>
    tpu.vector_store %arg7[%c0_34, %c28], %55 {strides = array<i32>} : memref<256x36xf32, #tpu.memory_space<vmem>>, vector<256x4xf32>,
    %c2_i32_35 = arith.constant 2 : i32
    %57 = arith.addi %0, %c2_i32_35 : i32
    %c0_36 = arith.constant 0 : index
    %58 = arith.index_cast %57 : i32 to index
    %c2_37 = arith.constant 2 : index
    %c0_38 = arith.constant 0 : index
    %59 = vector.load %arg2[%c0_36, %58, %c2_37, %c0_38] : memref<1x18x18x4xbf16, #tpu.memory_space<vmem>>, vector<1x16x16x4xbf16>
    %60 = vector.shape_cast %59 : vector<1x16x16x4xbf16> to vector<16x16x4xbf16>
    %61 = vector.shape_cast %60 : vector<16x16x4xbf16> to vector<256x4xbf16>
    %62 = arith.extf %61 : vector<256x4xbf16> to vector<256x4xf32>
    %c0_39 = arith.constant 0 : index
    %c32 = arith.constant 32 : index
    %63 = vector.load %arg7[%c0_39, %c32] : memref<256x36xf32, #tpu.memory_space<vmem>>, vector<256x4xf32>
    tpu.vector_store %arg7[%c0_39, %c32], %62 {strides = array<i32>} : memref<256x36xf32, #tpu.memory_space<vmem>>, vector<256x4xf32>,
    %c0_40 = arith.constant 0 : index
    %c0_41 = arith.constant 0 : index
    %64 = vector.load %arg7[%c0_40, %c0_41] : memref<256x36xf32, #tpu.memory_space<vmem>>, vector<256x36xf32>
    %c0_42 = arith.constant 0 : index
    %c0_43 = arith.constant 0 : index
    %65 = vector.load %arg3[%c0_42, %c0_43] : memref<36x36xf32, #tpu.memory_space<vmem>>, vector<36x36xf32>
    %cst = arith.constant dense<0.000000e+00> : vector<256x36xf32>
    %66 = tpu.matmul %64, %65, %cst {dimension_numbers = #tpu.dot_dimension_numbers<[1], [0], [0], [1], [0, 0, 1, 1], [], []>} : vector<256x36xf32>, vector<36x36xf32>, vector<256x36xf32> -> vector<256x36xf32>
    %67 = vector.extract_strided_slice %66 {offsets = [0, 0], sizes = [256, 32], strides = [1, 1]} : vector<256x36xf32> to vector<256x32xf32>
    %68 = vector.extract_strided_slice %66 {offsets = [0, 32], sizes = [256, 4], strides = [1, 1]} : vector<256x36xf32> to vector<256x4xf32>
    %cst_44 = arith.constant 1.000000e+00 : f32
    %69 = vector.broadcast %cst_44 : f32 to vector<256x4xf32>
    %70 = arith.mulf %68, %69 : vector<256x4xf32>
    %cst_45 = arith.constant dense<0xFF800000> : vector<256xf32>
    %71 = vector.multi_reduction <maximumf>, %70, %cst_45 [1] : vector<256x4xf32> to vector<256xf32>
    %72 = vector.shape_cast %71 : vector<256xf32> to vector<256x1xf32>
    %73 = vector.broadcast %72 : vector<256x1xf32> to vector<256x4xf32>
    %74 = arith.subf %70, %73 : vector<256x4xf32>
    %75 = math.exp %74 : vector<256x4xf32>
    %cst_46 = arith.constant dense<0.000000e+00> : vector<256xf32>
    %76 = vector.multi_reduction <add>, %75, %cst_46 [1] : vector<256x4xf32> to vector<256xf32>
    %77 = vector.shape_cast %76 : vector<256xf32> to vector<256x1xf32>
    %78 = vector.broadcast %77 : vector<256x1xf32> to vector<256x4xf32>
    %79 = arith.divf %75, %78 : vector<256x4xf32>
    %c0_47 = arith.constant 0 : index
    %c0_48 = arith.constant 0 : index
    %80 = vector.load %arg4[%c0_47, %c0_48] : memref<4x32xf32, #tpu.memory_space<vmem>>, vector<4x32xf32>
    %cst_49 = arith.constant dense<0.000000e+00> : vector<256x32xf32>
    %81 = tpu.matmul %79, %80, %cst_49 {dimension_numbers = #tpu.dot_dimension_numbers<[1], [0], [0], [1], [0, 0, 1, 1], [], []>} : vector<256x4xf32>, vector<4x32xf32>, vector<256x32xf32> -> vector<256x32xf32>
    %82 = arith.mulf %67, %81 : vector<256x32xf32>
    %c0_50 = arith.constant 0 : index
    %c0_51 = arith.constant 0 : index
    %83 = vector.load %arg5[%c0_50, %c0_51] : memref<8x32xf32, #tpu.memory_space<vmem>>, vector<8x32xf32>
    %cst_52 = arith.constant dense<0.000000e+00> : vector<8x256xf32>
    %84 = tpu.matmul %83, %82, %cst_52 {dimension_numbers = #tpu.dot_dimension_numbers<[1], [1], [0], [0], [0, 0, 1, 0], [], []>} : vector<8x32xf32>, vector<256x32xf32>, vector<8x256xf32> -> vector<8x256xf32>
    %c0_53 = arith.constant 0 : index
    %c0_54 = arith.constant 0 : index
    %c0_55 = arith.constant 0 : index
    %85 = vector.load %arg6[%c0_53, %c0_54, %c0_55] : memref<1x8x256xf32, #tpu.memory_space<vmem>>, vector<1x8x256xf32>
    %86 = vector.shape_cast %85 : vector<1x8x256xf32> to vector<8x256xf32>
    %87 = vector.shape_cast %84 : vector<8x256xf32> to vector<1x8x256xf32>
    tpu.vector_store %arg6[%c0_53, %c0_54, %c0_55], %87 {strides = array<i32>} : memref<1x8x256xf32, #tpu.memory_space<vmem>>, vector<1x8x256xf32>,
    return
  }
  func.func @transform_0(%arg0: i32, %arg1: i32) -> (i32, i32, i32, i32) {
    %c0_i32 = arith.constant 0 : i32
    %c0_i32_0 = arith.constant 0 : i32
    %c0_i32_1 = arith.constant 0 : i32
    %c0_i32_2 = arith.constant 0 : i32
    return %arg0, %c0_i32, %c0_i32_0, %c0_i32_1 : i32, i32, i32, i32
  }
  func.func @transform_1(%arg0: i32, %arg1: i32) -> (i32, i32) {
    %c0_i32 = arith.constant 0 : i32
    %c0_i32_0 = arith.constant 0 : i32
    %c0_i32_1 = arith.constant 0 : i32
    return %c0_i32, %c0_i32_0 : i32, i32
  }
  func.func @transform_2(%arg0: i32, %arg1: i32) -> (i32, i32) {
    %c0_i32 = arith.constant 0 : i32
    %c0_i32_0 = arith.constant 0 : i32
    %c0_i32_1 = arith.constant 0 : i32
    return %c0_i32, %c0_i32_0 : i32, i32
  }
  func.func @transform_3(%arg0: i32, %arg1: i32) -> (i32, i32) {
    %c0_i32 = arith.constant 0 : i32
    %c0_i32_0 = arith.constant 0 : i32
    %c0_i32_1 = arith.constant 0 : i32
    return %c0_i32, %c0_i32_0 : i32, i32
  }
  func.func @transform_4(%arg0: i32, %arg1: i32) -> (i32, i32, i32) {
    %c0_i32 = arith.constant 0 : i32
    %c0_i32_0 = arith.constant 0 : i32
    return %arg0, %c0_i32, %arg1 : i32, i32, i32
  }
}

</mosaic_0001>

<bundles_post_ra>
// kernel: lrm_conv_v2_forward.1
= control target key start
LH: loop header
LB: loop body
LE: loop exit
PB: predicated region body
PF: predicated region fallthrough
CT: control target
= control target key end

     0   :  { %s7246_s15 = smov 0   ;;  %s7248_s16 = smov 0   ;;  %s9446_s0 = inlined_call_operand.vmem [shape: bf16[2,18,18,4], index: 0, kind: input, shape index: {}]   ;;  %s9447_s1 = inlined_call_operand.vmem [shape: f32[36,36], index: 1, kind: input, shape index: {}]   ;;  %s9448_s2 = inlined_call_operand.vmem [shape: f32[4,32], index: 2, kind: input, shape index: {}]   ;;  %s9449_s3 = inlined_call_operand.vmem [shape: f32[8,32], index: 3, kind: input, shape index: {}]   ;;  %s9450_s4 = inlined_call_operand.vmem [shape: f32[2,8,256], index: 4, kind: output, shape index: {}]  }
   0x1   :  { %s7250_s17 = smov 0  }
   0x2 LB: > { %s26_s18 = sadd.s32 1, %s7206_s16  ;;  %p5589_p0 = scmp.ge.s32.totalorder %s7210_s17, 1  ;;  %s7210_s17 = sphi %s7250_s17, %s14_s17   ;;  %s7206_s16 = sphi %s7248_s16, %s9506_s16   ;;  %s7202_s15 = sphi %s7246_s15, %s9505_s15  }
   0x3   : > { %p28_p1 = scmp.ge.s32.totalorder %s26_s18, 2  ;;  %p176_p2 = scmp.lt.s32.totalorder %s7210_s17, 3 }
   0x5   : > { %s9508_s18 = smov (%p28_p1, %s26_s18), 0  ;;  %p177_p3 = pnand %p5589_p0, %p176_p2 }
   0x7   : > { %180 = sbr.rel (%p177_p3) target bundleno = 1816 (0x718), region = 36 }
   0xe   : > { %p206_p4 = scmp.lt.s32.totalorder %s7202_s15, 1  ;;  %vm1078_vm0 = vcmask 1042432   ;;  %vm1079_vm1 = vcmask 1046532   ;;  %vm370_vm3 = vsmask.f32 3328  ;;  %s7212_s23 = smov 12  }
   0xf   : > { %vm7272_vm2 = vmor %vm1078_vm0, %vm1079_vm1  ;;  %vm371_vm4 = vsmask.f32 7440  ;;  %s7213_s24 = smov 24   ;;  %s7214_s25 = smov 8   ;;  %vm289_vm6 = vcmask 31744   ;;  %vm949_vm7 = vcmask 64544  }
  0x10   : > { %s9510_s15 = smov (!%p206_p4, %s7202_s15), 1  ;;  %vm7315_vm5 = vmor %vm370_vm3, %vm371_vm4  ;;  %s7215_s26 = smov 20   ;;  %vm1385_vm8 = vcmask 97344   ;;  %vm1614_vm9 = vcmask 130144   ;;  %vm2271_vm10 = vcmask 162944   ;;  %vm2704_vm11 = vcmask 195744  }
  0x11   : > { %s6386_s19 = smul.u32 216, %s9510_s15  ;;  %s7216_s27 = smov 16   ;;  %vm2933_vm12 = vcmask 228544   ;;  %vm3590_vm13 = vcmask 261344   ;;  %vm4023_vm14 = vcmask 294144   ;;  %vm4190_vm15 = vcmask 1043456  }
  0x12   : > { %s7217_s28 = smov 4   ;;  %s7218_s29 = smov 28   ;;  %vm4093_vm0 = vcmask 293888   ;;  %vm5321_vm1 = vcmask 261120  }
  0x13   : > { %s7270_s22 = scalar_lea.vmem %s9446_s0, %s6386_s19  ;;  %s7219_s30 = smov 32  }
  0x14   : > { %v5609_v1 = vld [vmem:[%s7270_s22 + $0xc] sm:$0xff]   ;;  %v6102_v2 = vld [vmem:[%s7270_s22 + $0x18] sm:$0xff]   ;;  %v982_v3 = vld [vmem:[%s7270_s22] sm:$0xe]  ;;  %s7220_s19 = smov 96  }
  0x15   : > { %v1454_v4 = vunpack.c.l.bf16 %v5609_v1  ;;  %v1455_v5 = vunpack.c.h.bf16 %v5609_v1  ;;  %v6033_v6 = vunpack.c.l.bf16 %v6102_v2  ;;  %v6034_v7 = vunpack.c.h.bf16 %v6102_v2  ;;  %v983_v8 = vld [vmem:[%s7270_s22 + $0x4] sm:$0xf]  ;;  %v984_v9 = vld [vmem:[%s7270_s22 + $0x8] sm:$0x1]  ;;  %v5689_v10 = vld [vmem:[%s7270_s22 + $0xc] sm:$0xe] }
  0x16   : > { %v5593_v11 = vrot.slane %v982_v3, 9  ;;  %v1083_v12 = vrot.slane %v983_v8, 5  ;;  %v1086_v13 = vrot.slane %v984_v9, 5  ;;  %v5690_v14 = vld [vmem:[%s7270_s22 + $0x10] sm:$0xf]  ;;  %v5737_v15 = vrot.slane %v5689_v10, 9 }
  0x17   : > { %v6420_v16 = vpack.i.bf16 %v1455_v5, %v1454_v4  ;;  %v6430_v17 = vpack.i.bf16 %v6034_v7, %v6033_v6  ;;  %v5691_v18 = vld [vmem:[%s7270_s22 + $0x14] sm:$0x1]  ;;  %v2402_v19 = vrot.slane %v5690_v14, 5  ;;  %v985_v20 = vld [vmem:[%s7270_s22 + $0xc] sm:$0xe]  ;;  %v7286_v21 = vld [vmem:[%s7270_s22 + $0x24] sm:$0xff]  }
  0x18   : > { %v1084_v22 = vsel %vm7272_vm2, %v5593_v11, %v1083_v12  ;;  %v1085_v23 = vrot.slane %v1083_v12, 4  ;;  %v2405_v24 = vrot.slane %v5691_v18, 5  ;;  %v986_v25 = vld [vmem:[%s7270_s22 + $0x10] sm:$0xf]  ;;  %v987_v26 = vld [vmem:[%s7270_s22 + $0x14] sm:$0x1]  ;;  %v2775_v27 = vunpack.c.l.bf16 %v7286_v21 }
  0x19   : > { %6421 = vrot.lane.b32.xlu1 %v6420_v16, %s7212_s23  ;;  %6431 = vrot.lane.b32.xlu0 %v6430_v17, %s7212_s23  ;;  %v1225_v28 = vunpack.c.l.bf16 %v1084_v22  ;;  %v2403_v29 = vsel %vm7272_vm2, %v5737_v15, %v2402_v19  ;;  %v2404_v30 = vrot.slane %v2402_v19, 4  ;;  %v5594_v31 = vrot.slane %v985_v20, 9  ;;  %v5641_v32 = vld [vmem:[%s7270_s22 + $0xc] sm:$0xf]  ;;  %v5642_v33 = vld [vmem:[%s7270_s22 + $0x10] sm:$0xf] }
  0x1a   : > { %v1087_v34 = vsel %vm7272_vm2, %v1085_v23, %v1086_v13  ;;  %v2544_v35 = vunpack.c.l.bf16 %v2403_v29  ;;  %v1090_v36 = vrot.slane %v986_v25, 5  ;;  %v1093_v37 = vrot.slane %v987_v26, 5  ;;  %v5643_v45 = vld [vmem:[%s7270_s22 + $0x14] sm:$0x1]  ;;  %v322_v47 = vld [vmem:[%s7270_s22] sm:$0xf] }
  0x1b   : > { %v1226_v38 = vunpack.c.l.bf16 %v1087_v34  ;;  %v2406_v39 = vsel %vm7272_vm2, %v2404_v30, %v2405_v24  ;;  %v1696_v40 = vshrl.u32 %v5641_v32, 16  ;;  %v1699_v41 = vshll.u32 %v5641_v32, 16  ;;  %v323_v52 = vld [vmem:[%s7270_s22 + $0x4] sm:$0xf]  ;;  %v324_v60 = vld [vmem:[%s7270_s22 + $0x8] sm:$0x1] }
  0x1c   : > { %v2545_v42 = vunpack.c.l.bf16 %v2406_v39  ;;  %v1091_v43 = vsel %vm7272_vm2, %v5594_v31, %v1090_v36  ;;  %v1092_v44 = vrot.slane %v1090_v36, 4  ;;  %v1705_v46 = vshll.u32 %v5642_v33, 16  ;;  %v5785_v4 = vld [vmem:[%s7270_s22 + $0x18] sm:$0xf]  ;;  %v5786_v13 = vld [vmem:[%s7270_s22 + $0x1c] sm:$0xf] }
  0x1d   : > { %6426 = vrot.lane.b32.xlu1 %v6430_v17, %s7213_s24  ;;  %v6435_v48 = vpack.i.bf16 %v1226_v38, %v1225_v28  ;;  %v1227_v49 = vunpack.c.l.bf16 %v1091_v43  ;;  %v1698_v50 = vrot.slane %v1696_v40, 4  ;;  %v1701_v51 = vrot.slane %v1699_v41, 5  ;;  %v5787_v23 = vld [vmem:[%s7270_s22 + $0x20] sm:$0x1]  ;;  %v325_v29 = vld [vmem:[%s7270_s22 + $0xc] sm:$0xf] }
  0x1e   : > { %v6440_v53 = vpack.i.bf16 %v2545_v42, %v2544_v35  ;;  %v1094_v54 = vsel %vm7272_vm2, %v1092_v44, %v1093_v37  ;;  %v1707_v55 = vrot.slane %v1705_v46, 5  ;;  %v1709_v56 = vshrl.u32 %v5642_v33, 16  ;;  %v326_v41 = vld [vmem:[%s7270_s22 + $0x10] sm:$0xf] }
  0x1f   : > { %6436 = vrot.lane.b32.xlu0 %v6435_v48, %s7214_s25  ;;  %v1228_v57 = vunpack.c.l.bf16 %v1094_v54  ;;  %v1702_v58 = vor.u32 %v1701_v51, %v1698_v50  ;;  %v1715_v59 = vshll.u32 %v5643_v45, 16  ;;  %v374_v61 = vshrl.u32 %v322_v47, 16  ;;  %v5833_v48 = vld [vmem:[%s7270_s22 + $0x18] sm:$0xe] }
  0x20   : > { %v1711_v63 = vrot.slane %v1709_v56, 4  ;;  %v377_v1 = vshll.u32 %v322_v47, 16  ;;  %v383_v2 = vshll.u32 %v323_v52, 16  ;;  %v387_v3 = vshrl.u32 %v323_v52, 16  ;;  %v327_v47 = vld [vmem:[%s7270_s22 + $0x14] sm:$0x1] }
  0x21   : > { %6441 = vrot.lane.b32.xlu1 %v6440_v53, %s7215_s26  ;;  %v6445_v5 = vpack.i.bf16 %v1228_v57, %v1227_v49  ;;  %v1703_v6 = vrot.slane %v1702_v58, 4  ;;  %v1717_v7 = vrot.slane %v1715_v59, 5  ;;  %v376_v8 = vrot.slane %v374_v61, 4  ;;  %v5834_v53 = vld [vmem:[%s7270_s22 + $0x1c] sm:$0xf] }
  0x22   : > { %v1712_v9 = vor.u32 %v1711_v63, %v1707_v55  ;;  %v379_v10 = vrot.slane %v377_v1, 5  ;;  %v385_v11 = vrot.slane %v383_v2, 5  ;;  %v389_v12 = vrot.slane %v387_v3, 4  ;;  %v5835_v58 = vld [vmem:[%s7270_s22 + $0x20] sm:$0x1] }
  0x23   : > { %6446 = vrot.lane.b32.xlu0 %v6445_v5, %s7214_s25  ;;  %v1708_v14 = vsel %vm7315_vm5, %v1703_v6, %v1707_v55  ;;  %v393_v15 = vshll.u32 %v324_v60, 16  ;;  %v3015_v16 = vshrl.u32 %v5785_v4, 16  ;;  %v3018_v17 = vshll.u32 %v5785_v4, 16  ;;  %v5644_v5 = vld [vmem:[%s7270_s22 + $0x18] sm:$0xf] }
  0x24   : > { %v1713_v18 = vrot.slane %v1712_v9, 4  ;;  %v2111_v19 = vunpack.c.l.bf16 %v1708_v14  ;;  %v380_v20 = vor.u32 %v379_v10, %v376_v8  ;;  %v390_v22 = vor.u32 %v389_v12, %v385_v11  ;;  %v5645_v10 = vld [vmem:[%s7270_s22 + $0x1c] sm:$0xf] }
  0x25   : > { %v395_v24 = vrot.slane %v393_v15, 5  ;;  %v3017_v25 = vrot.slane %v3015_v16, 4  ;;  %v3020_v26 = vrot.slane %v3018_v17, 5  ;;  %v3024_v28 = vshll.u32 %v5786_v13, 16 }
  0x26   : > { %v1718_v30 = vsel %vm7315_vm5, %v1713_v18, %v1717_v7  ;;  %v381_v31 = vrot.slane %v380_v20, 4  ;;  %v391_v32 = vrot.slane %v390_v22, 4  ;;  %v3028_v33 = vshrl.u32 %v5786_v13, 16 }
  0x27   : > { %v2112_v34 = vunpack.c.l.bf16 %v1718_v30  ;;  %v3021_v35 = vor.u32 %v3020_v26, %v3017_v25  ;;  %v3026_v36 = vrot.slane %v3024_v28, 5  ;;  %v3034_v37 = vshll.u32 %v5787_v23, 16  ;;  %v5646_v23 = vld [vmem:[%s7270_s22 + $0x20] sm:$0x1]  ;;  %v5692_v25 = vld [vmem:[%s7270_s22 + $0x18] sm:$0xe] }
  0x28   : > { %v386_v38 = vsel %vm7315_vm5, %v381_v31, %v385_v11  ;;  %v396_v39 = vsel %vm7315_vm5, %v391_v32, %v395_v24  ;;  %v3030_v40 = vrot.slane %v3028_v33, 4  ;;  %v398_v42 = vshrl.u32 %v325_v29, 16  ;;  %v5693_v31 = vld [vmem:[%s7270_s22 + $0x1c] sm:$0xf]  ;;  %v5694_v32 = vld [vmem:[%s7270_s22 + $0x20] sm:$0x1] }
  0x29   : > { %v6455_v43 = vpack.i.bf16 %v2112_v34, %v2111_v19  ;;  %v789_v44 = vunpack.c.l.bf16 %v386_v38  ;;  %v790_v45 = vunpack.c.l.bf16 %v396_v39  ;;  %v3022_v46 = vrot.slane %v3021_v35, 4 }
  0x2a   : > { %v3031_v49 = vor.u32 %v3030_v40, %v3026_v36  ;;  %v3036_v50 = vrot.slane %v3034_v37, 5  ;;  %v400_v51 = vrot.slane %v398_v42, 4  ;;  %v401_v52 = vshll.u32 %v325_v29, 16  ;;  %v328_v37 = vld [vmem:[%s7270_s22 + $0x18] sm:$0xf] }
  0x2b   : > { %6456 = vrot.lane.b32.xlu1 %v6455_v43, %s7216_s27  ;;  %v6450_v54 = vpack.i.bf16 %v790_v45, %v789_v44  ;;  %v3027_v55 = vsel %vm7315_vm5, %v3022_v46, %v3026_v36  ;;  %v407_v56 = vshll.u32 %v326_v41, 16  ;;  %v411_v57 = vshrl.u32 %v326_v41, 16  ;;  %v329_v46 = vld [vmem:[%s7270_s22 + $0x1c] sm:$0xf] }
  0x2c   : > { %v3032_v59 = vrot.slane %v3031_v49, 4  ;;  %v3430_v60 = vunpack.c.l.bf16 %v3027_v55  ;;  %v403_v61 = vrot.slane %v401_v52, 5  ;;  %v417_v63 = vshll.u32 %v327_v47, 16 }
  0x2d   : > { %6451 = vrot.lane.b32.xlu0 %v6450_v54, %s7217_s28  ;;  %v409_v1 = vrot.slane %v407_v56, 5  ;;  %v413_v2 = vrot.slane %v411_v57, 4  ;;  %v5881_v3 = vrot.slane %v5833_v48, 9  ;;  %v3721_v4 = vrot.slane %v5834_v53, 5  ;;  %v330_v54 = vld [vmem:[%s7270_s22 + $0x20] sm:$0x1] }
  0x2e   : > { %v3037_v6 = vsel %vm7315_vm5, %v3032_v59, %v3036_v50  ;;  %v404_v7 = vor.u32 %v403_v61, %v400_v51  ;;  %v419_v8 = vrot.slane %v417_v63, 5  ;;  %v3724_v9 = vrot.slane %v5835_v58, 5 }
  0x2f   : > { %v3431_v11 = vunpack.c.l.bf16 %v3037_v6  ;;  %v414_v12 = vor.u32 %v413_v2, %v409_v1  ;;  %v3722_v13 = vsel %vm7272_vm2, %v5881_v3, %v3721_v4  ;;  %v3723_v14 = vrot.slane %v3721_v4, 4  ;;  %v989_v3 = vld [vmem:[%s7270_s22 + $0x1c] sm:$0xf] }
  0x30   : > { %v405_v15 = vrot.slane %v404_v7, 4  ;;  %v3863_v16 = vunpack.c.l.bf16 %v3722_v13  ;;  %v1720_v17 = vshrl.u32 %v5644_v5, 16  ;;  %v1723_v18 = vshll.u32 %v5644_v5, 16  ;;  %v5788_v13 = vld [vmem:[%s7270_s22 + $0x24] sm:$0xf] }
  0x31   : > { %v6465_v19 = vpack.i.bf16 %v3431_v11, %v3430_v60  ;;  %v415_v20 = vrot.slane %v414_v12, 4  ;;  %v3725_v22 = vsel %vm7272_vm2, %v3723_v14, %v3724_v9  ;;  %v1729_v24 = vshll.u32 %v5645_v10, 16  ;;  %v988_v60 = vld [vmem:[%s7270_s22 + $0x18] sm:$0xe] }
  0x32   : > { %v410_v26 = vsel %vm7315_vm5, %v405_v15, %v409_v1  ;;  %v3864_v28 = vunpack.c.l.bf16 %v3725_v22  ;;  %v1722_v29 = vrot.slane %v1720_v17, 4  ;;  %v1725_v30 = vrot.slane %v1723_v18, 5  ;;  %v5789_v18 = vld [vmem:[%s7270_s22 + $0x28] sm:$0xf] }
  0x33   : > { %6466 = vrot.lane.b32.xlu1 %v6465_v19, %s7218_s29  ;;  %v420_v33 = vsel %vm7315_vm5, %v415_v20, %v419_v8  ;;  %v791_v34 = vunpack.c.l.bf16 %v410_v26  ;;  %v1731_v35 = vrot.slane %v1729_v24, 5  ;;  %v1733_v36 = vshrl.u32 %v5645_v10, 16  ;;  %v990_v8 = vld [vmem:[%s7270_s22 + $0x20] sm:$0x1] }
  0x34   : > { %v792_v38 = vunpack.c.l.bf16 %v420_v33  ;;  %v6475_v39 = vpack.i.bf16 %v3864_v28, %v3863_v16  ;;  %v1726_v40 = vor.u32 %v1725_v30, %v1722_v29  ;;  %v1739_v41 = vshll.u32 %v5646_v23, 16 }
  0x35   : > { %v1735_v42 = vrot.slane %v1733_v36, 4  ;;  %v5738_v43 = vrot.slane %v5692_v25, 9  ;;  %v2409_v44 = vrot.slane %v5693_v31, 5  ;;  %v2412_v45 = vrot.slane %v5694_v32, 5  ;;  %v5790_v32 = vld [vmem:[%s7270_s22 + $0x2c] sm:$0x1] }
  0x36   : > { %v6460_v47 = vpack.i.bf16 %v792_v38, %v791_v34  ;;  %v1727_v48 = vrot.slane %v1726_v40, 4  ;;  %v1741_v49 = vrot.slane %v1739_v41, 5  ;;  %v422_v50 = vshrl.u32 %v328_v37, 16 }
  0x37   : > { %6476 = vrot.lane.b32.xlu1 %v6475_v39, %s7219_s30  ;;  %v1736_v51 = vor.u32 %v1735_v42, %v1731_v35  ;;  %v2410_v52 = vsel %vm7272_vm2, %v5738_v43, %v2409_v44  ;;  %v2411_v53 = vrot.slane %v2409_v44, 4  ;;  %v425_v55 = vshll.u32 %v328_v37, 16  ;;  %v5836_v37 = vld [vmem:[%s7270_s22 + $0x24] sm:$0xe]  ;;  %v5837_v42 = vld [vmem:[%s7270_s22 + $0x28] sm:$0xf] }
  0x38   : > { %6461 = vrot.lane.b32.xlu0 %v6460_v47, %s7217_s28  ;;  %v1732_v56 = vsel %vm7315_vm5, %v1727_v48, %v1731_v35  ;;  %v2546_v57 = vunpack.c.l.bf16 %v2410_v52  ;;  %v424_v58 = vrot.slane %v422_v50, 4  ;;  %v431_v59 = vshll.u32 %v329_v46, 16  ;;  %v5647_v52 = vld [vmem:[%s7270_s22 + $0x24] sm:$0xf] }
  0x39   : > { %v1737_v61 = vrot.slane %v1736_v51, 4  ;;  %v2113_v63 = vunpack.c.l.bf16 %v1732_v56  ;;  %v2413_v1 = vsel %vm7272_vm2, %v2411_v53, %v2412_v45  ;;  %v427_v2 = vrot.slane %v425_v55, 5  ;;  %v5838_v51 = vld [vmem:[%s7270_s22 + $0x2c] sm:$0x1] }
  0x3a   : > { %v2547_v4 = vunpack.c.l.bf16 %v2413_v1  ;;  %v433_v5 = vrot.slane %v431_v59, 5  ;;  %v435_v6 = vshrl.u32 %v329_v46, 16  ;;  %v441_v7 = vshll.u32 %v330_v54, 16 }
  0x3b   : > { %v1742_v9 = vsel %vm7315_vm5, %v1737_v61, %v1741_v49  ;;  %v428_v10 = vor.u32 %v427_v2, %v424_v58  ;;  %v2776_v11 = vunpack.c.h.bf16 %v7286_v21  ;;  %v5595_v12 = vrot.slane %v988_v60, 9  ;;  %v5648_v61 = vld [vmem:[%s7270_s22 + $0x28] sm:$0xf] }
  0x3c   : > { %v2114_v14 = vunpack.c.l.bf16 %v1742_v9  ;;  %v6485_v15 = vpack.i.bf16 %v2547_v4, %v2546_v57  ;;  %v437_v16 = vrot.slane %v435_v6, 4  ;;  %v443_v17 = vrot.slane %v441_v7, 5  ;;  %v5649_v7 = vld [vmem:[%s7270_s22 + $0x2c] sm:$0x1]  ;;  %v5695_v9 = vld [vmem:[%s7270_s22 + $0x24] sm:$0xe] }
  0x3d   : > { %v429_v19 = vrot.slane %v428_v10, 4  ;;  %v6495_v20 = vpack.i.bf16 %v2776_v11, %v2775_v27  ;;  %v1097_v22 = vrot.slane %v989_v3, 5  ;;  %v1100_v23 = vrot.slane %v990_v8, 5  ;;  %v5613_v27 = vld [vmem:[%s7270_s22 + $0x24] sm:$0xff]  }
  0x3e   : > { %v6470_v24 = vpack.i.bf16 %v2114_v14, %v2113_v63  ;;  %6486 = vrot.lane.b32.xlu1 %v6485_v15, %s7215_s26  ;;  %v438_v25 = vor.u32 %v437_v16, %v433_v5  ;;  %v3039_v26 = vshrl.u32 %v5788_v13, 16  ;;  %v3042_v28 = vshll.u32 %v5788_v13, 16  ;;  %v5696_v14 = vld [vmem:[%s7270_s22 + $0x28] sm:$0xf] }
  0x3f   : > { %v434_v29 = vsel %vm7315_vm5, %v429_v19, %v433_v5  ;;  %v1098_v30 = vsel %vm7272_vm2, %v5595_v12, %v1097_v22  ;;  %v1099_v31 = vrot.slane %v1097_v22, 4  ;;  %v3048_v21 = vshll.u32 %v5789_v18, 16  ;;  %v5697_v19 = vld [vmem:[%s7270_s22 + $0x2c] sm:$0x1] }
  0x40   : > { %6471 = vrot.lane.b32.xlu0 %v6470_v24, %s7216_s27  ;;  %v439_v33 = vrot.slane %v438_v25, 4  ;;  %v793_v34 = vunpack.c.l.bf16 %v434_v29  ;;  %v1229_v35 = vunpack.c.l.bf16 %v1098_v30  ;;  %v3041_v36 = vrot.slane %v3039_v26, 4 }
  0x41   : > { %v1101_v38 = vsel %vm7272_vm2, %v1099_v31, %v1100_v23  ;;  %v3044_v39 = vrot.slane %v3042_v28, 5  ;;  %v3050_v40 = vrot.slane %v3048_v21, 5  ;;  %v3052_v41 = vshrl.u32 %v5789_v18, 16  ;;  %v332_v31 = vld [vmem:[%s7270_s22 + $0x28] sm:$0xf] }
  0x42   : > { %v444_v43 = vsel %vm7315_vm5, %v439_v33, %v443_v17  ;;  %6496 = vrot.lane.b32.xlu1 %v6495_v20, %s7213_s24  ;;  %v1230_v44 = vunpack.c.l.bf16 %v1101_v38  ;;  %v3058_v45 = vshll.u32 %v5790_v32, 16  ;;  %v1458_v46 = vunpack.c.l.bf16 %v5613_v27  ;;  %v331_v20 = vld [vmem:[%s7270_s22 + $0x24] sm:$0xf] }
  0x43   : > { %v794_v47 = vunpack.c.l.bf16 %v444_v43  ;;  %v3045_v48 = vor.u32 %v3044_v39, %v3041_v36  ;;  %v3054_v49 = vrot.slane %v3052_v41, 4  ;;  %v1459_v50 = vunpack.c.h.bf16 %v5613_v27  ;;  %v333_v39 = vld [vmem:[%s7270_s22 + $0x2c] sm:$0x1]  ;;  %v6111_v43 = vld [vmem:[%s7270_s22 + $0x30] sm:$0xff]  }
  0x44   : > { %v6490_v53 = vpack.i.bf16 %v1230_v44, %v1229_v35  ;;  %v3060_v54 = vrot.slane %v3058_v45, 5  ;;  %v5882_v55 = vrot.slane %v5836_v37, 9  ;;  %v3728_v56 = vrot.slane %v5837_v42, 5 }
  0x45   : > { %v6480_v57 = vpack.i.bf16 %v794_v47, %v793_v34  ;;  %v3046_v58 = vrot.slane %v3045_v48, 4  ;;  %v3055_v59 = vor.u32 %v3054_v49, %v3050_v40  ;;  %v6500_v60 = vpack.i.bf16 %v1459_v50, %v1458_v46 }
  0x46   : > { %v3729_v63 = vsel %vm7272_vm2, %v5882_v55, %v3728_v56  ;;  %v3730_v1 = vrot.slane %v3728_v56, 4  ;;  %v3731_v2 = vrot.slane %v5838_v51, 5  ;;  %v1744_v3 = vshrl.u32 %v5647_v52, 16 }
  0x47   : > { %6481 = vrot.lane.b32.xlu0 %v6480_v57, %s7217_s28  ;;  %v3051_v4 = vsel %vm7315_vm5, %v3046_v58, %v3050_v40  ;;  %v3056_v5 = vrot.slane %v3055_v59, 4  ;;  %v3865_v6 = vunpack.c.l.bf16 %v3729_v63  ;;  %v1747_v8 = vshll.u32 %v5647_v52, 16  ;;  %v991_v52 = vld [vmem:[%s7270_s22 + $0x24] sm:$0xe]  ;;  %v993_v58 = vld [vmem:[%s7270_s22 + $0x2c] sm:$0x1] }
  0x48   : > { %v3432_v10 = vunpack.c.l.bf16 %v3051_v4  ;;  %v3732_v11 = vsel %vm7272_vm2, %v3730_v1, %v3731_v2  ;;  %v1746_v12 = vrot.slane %v1744_v3, 4  ;;  %v1753_v13 = vshll.u32 %v5648_v61, 16  ;;  %v5791_v1 = vld [vmem:[%s7270_s22 + $0x30] sm:$0xf] }
  0x49   : > { %v3061_v15 = vsel %vm7315_vm5, %v3056_v5, %v3060_v54  ;;  %v3866_v16 = vunpack.c.l.bf16 %v3732_v11  ;;  %v1749_v17 = vrot.slane %v1747_v8, 5  ;;  %v1757_v18 = vshrl.u32 %v5648_v61, 16 }
  0x4a   : > { %v3433_v22 = vunpack.c.l.bf16 %v3061_v15  ;;  %v1755_v23 = vrot.slane %v1753_v13, 5  ;;  %v1763_v24 = vshll.u32 %v5649_v7, 16  ;;  %v5739_v25 = vrot.slane %v5695_v9, 9 }
  0x4b   : > { %6491 = vrot.lane.b32.xlu0 %v6490_v53, %s7214_s25  ;;  %v6515_v26 = vpack.i.bf16 %v3866_v16, %v3865_v6  ;;  %v1750_v28 = vor.u32 %v1749_v17, %v1746_v12  ;;  %v1759_v29 = vrot.slane %v1757_v18, 4  ;;  %v2416_v30 = vrot.slane %v5696_v14, 5  ;;  %v992_v53 = vld [vmem:[%s7270_s22 + $0x28] sm:$0xf]  ;;  %v5792_v6 = vld [vmem:[%s7270_s22 + $0x34] sm:$0xf] }
  0x4c   : > { %v6505_v32 = vpack.i.bf16 %v3433_v22, %v3432_v10  ;;  %v1765_v21 = vrot.slane %v1763_v24, 5  ;;  %v2419_v27 = vrot.slane %v5697_v19, 5  ;;  %v446_v33 = vshrl.u32 %v331_v20, 16  ;;  %v5793_v14 = vld [vmem:[%s7270_s22 + $0x38] sm:$0x1] }
  0x4d   : > { %v1751_v34 = vrot.slane %v1750_v28, 4  ;;  %v1760_v35 = vor.u32 %v1759_v29, %v1755_v23  ;;  %v2417_v36 = vsel %vm7272_vm2, %v5739_v25, %v2416_v30  ;;  %v2418_v37 = vrot.slane %v2416_v30, 4  ;;  %v5840_v22 = vld [vmem:[%s7270_s22 + $0x34] sm:$0xf]  ;;  %v5841_v28 = vld [vmem:[%s7270_s22 + $0x38] sm:$0x1] }
  0x4e   : > { %6506 = vrot.lane.b32.xlu1 %v6505_v32, %s7218_s29  ;;  %v2548_v38 = vunpack.c.l.bf16 %v2417_v36  ;;  %v448_v40 = vrot.slane %v446_v33, 4  ;;  %v449_v41 = vshll.u32 %v331_v20, 16  ;;  %v455_v42 = vshll.u32 %v332_v31, 16  ;;  %v5839_v20 = vld [vmem:[%s7270_s22 + $0x30] sm:$0xe] }
  0x4f   : > { %6501 = vrot.lane.b32.xlu0 %v6500_v60, %s7212_s23  ;;  %v1756_v44 = vsel %vm7315_vm5, %v1751_v34, %v1755_v23  ;;  %v1761_v45 = vrot.slane %v1760_v35, 4  ;;  %v2420_v46 = vsel %vm7272_vm2, %v2418_v37, %v2419_v27  ;;  %v459_v47 = vshrl.u32 %v332_v31, 16  ;;  %v5650_v35 = vld [vmem:[%s7270_s22 + $0x30] sm:$0xf] }
  0x50   : > { %v2115_v48 = vunpack.c.l.bf16 %v1756_v44  ;;  %v2549_v49 = vunpack.c.l.bf16 %v2420_v46  ;;  %v451_v50 = vrot.slane %v449_v41, 5  ;;  %v457_v51 = vrot.slane %v455_v42, 5 }
  0x51   : > { %v1766_v54 = vsel %vm7315_vm5, %v1761_v45, %v1765_v21  ;;  %v461_v55 = vrot.slane %v459_v47, 4  ;;  %v465_v56 = vshll.u32 %v333_v39, 16  ;;  %v6069_v57 = vunpack.c.l.bf16 %v6111_v43 }
  0x52   : > { %6516 = vrot.lane.b32.xlu1 %v6515_v26, %s7219_s30  ;;  %v2116_v59 = vunpack.c.l.bf16 %v1766_v54  ;;  %v6525_v60 = vpack.i.bf16 %v2549_v49, %v2548_v38  ;;  %v452_v61 = vor.u32 %v451_v50, %v448_v40  ;;  %v6070_v63 = vunpack.c.h.bf16 %v6111_v43  ;;  %v5651_v40 = vld [vmem:[%s7270_s22 + $0x34] sm:$0xf]  ;;  %v5698_v54 = vld [vmem:[%s7270_s22 + $0x30] sm:$0xe] }
  0x53   : > { %v462_v2 = vor.u32 %v461_v55, %v457_v51  ;;  %v467_v3 = vrot.slane %v465_v56, 5  ;;  %v5596_v4 = vrot.slane %v991_v52, 9  ;;  %v1104_v5 = vrot.slane %v992_v53, 5 }
  0x54   : > { %v6510_v7 = vpack.i.bf16 %v2116_v59, %v2115_v48  ;;  %v453_v8 = vrot.slane %v452_v61, 4  ;;  %v7432_v9 = vpack.i.bf16 %v6070_v63, %v6069_v57  ;;  %v1107_v10 = vrot.slane %v993_v58, 5  ;;  %v5699_v59 = vld [vmem:[%s7270_s22 + $0x34] sm:$0xf] }
  0x55   : > { %v463_v11 = vrot.slane %v462_v2, 4  ;;  %v1105_v12 = vsel %vm7272_vm2, %v5596_v4, %v1104_v5  ;;  %v1106_v13 = vrot.slane %v1104_v5, 4  ;;  %v3063_v15 = vshrl.u32 %v5791_v1, 16 }
  0x56   : > { %6511 = vrot.lane.b32.xlu0 %v6510_v7, %s7216_s27  ;;  %6526 = vrot.lane.b32.xlu1 %v6525_v60, %s7215_s26  ;;  %v458_v16 = vsel %vm7315_vm5, %v453_v8, %v457_v51  ;;  %v1231_v17 = vunpack.c.l.bf16 %v1105_v12  ;;  %v3066_v18 = vshll.u32 %v5791_v1, 16  ;;  %v3072_v19 = vshll.u32 %v5792_v6, 16  ;;  %v5652_v51 = vld [vmem:[%s7270_s22 + $0x38] sm:$0x1] }
  0x57   : > { %v468_v23 = vsel %vm7315_vm5, %v463_v11, %v467_v3  ;;  %v795_v24 = vunpack.c.l.bf16 %v458_v16  ;;  %v1108_v25 = vsel %vm7272_vm2, %v1106_v13, %v1107_v10  ;;  %v3065_v26 = vrot.slane %v3063_v15, 4  ;;  %v5700_v60 = vld [vmem:[%s7270_s22 + $0x38] sm:$0x1]  ;;  %v334_v3 = vld [vmem:[%s7270_s22 + $0x30] sm:$0xf] }
  0x58   : > { %v796_v29 = vunpack.c.l.bf16 %v468_v23  ;;  %v1232_v30 = vunpack.c.l.bf16 %v1108_v25  ;;  %v3068_v31 = vrot.slane %v3066_v18, 5  ;;  %v3074_v32 = vrot.slane %v3072_v19, 5 }
  0x59   : > { %v3076_v21 = vshrl.u32 %v5792_v6, 16  ;;  %v3082_v27 = vshll.u32 %v5793_v14, 16  ;;  %v5883_v33 = vrot.slane %v5839_v20, 9  ;;  %v3735_v34 = vrot.slane %v5840_v22, 5  ;;  %v335_v20 = vld [vmem:[%s7270_s22 + $0x34] sm:$0xf] }
  0x5a   : > { %v6520_v36 = vpack.i.bf16 %v796_v29, %v795_v24  ;;  %6536 = vrot.lane.b32.xlu1 %v7432_v9, %s7213_s24  ;;  %v6530_v37 = vpack.i.bf16 %v1232_v30, %v1231_v17  ;;  %v3069_v38 = vor.u32 %v3068_v31, %v3065_v26  ;;  %v3738_v39 = vrot.slane %v5841_v28, 5  ;;  %v336_v26 = vld [vmem:[%s7270_s22 + $0x38] sm:$0x1]  ;;  %v5759_v29 = vld [vmem:[%s7270_s22 + $0x3c] sm:$0xff]  }
  0x5b   : > { %v3078_v41 = vrot.slane %v3076_v21, 4  ;;  %v3084_v42 = vrot.slane %v3082_v27, 5  ;;  %v3736_v43 = vsel %vm7272_vm2, %v5883_v33, %v3735_v34  ;;  %v3737_v44 = vrot.slane %v3735_v34, 4 }
  0x5c   : > { %6521 = vrot.lane.b32.xlu0 %v6520_v36, %s7217_s28  ;;  %v3070_v45 = vrot.slane %v3069_v38, 4  ;;  %v3867_v46 = vunpack.c.l.bf16 %v3736_v43  ;;  %v1768_v47 = vshrl.u32 %v5650_v35, 16  ;;  %v1771_v48 = vshll.u32 %v5650_v35, 16  ;;  %v994_v35 = vld [vmem:[%s7270_s22 + $0x30] sm:$0xe] }
  0x5d   : > { %v3079_v49 = vor.u32 %v3078_v41, %v3074_v32  ;;  %v3739_v50 = vsel %vm7272_vm2, %v3737_v44, %v3738_v39  ;;  %v1777_v52 = vshll.u32 %v5651_v40, 16  ;;  %v1781_v53 = vshrl.u32 %v5651_v40, 16  ;;  %v995_v36 = vld [vmem:[%s7270_s22 + $0x34] sm:$0xf]  ;;  %v996_v41 = vld [vmem:[%s7270_s22 + $0x38] sm:$0x1] }
  0x5e   : > { %v3075_v55 = vsel %vm7315_vm5, %v3070_v45, %v3074_v32  ;;  %v3868_v56 = vunpack.c.l.bf16 %v3739_v50  ;;  %v1770_v57 = vrot.slane %v1768_v47, 4  ;;  %v1773_v58 = vrot.slane %v1771_v48, 5  ;;  %v5795_v47 = vld [vmem:[%s7270_s22 + $0x40] sm:$0xf] }
  0x5f   : > { %v3080_v61 = vrot.slane %v3079_v49, 4  ;;  %v3434_v63 = vunpack.c.l.bf16 %v3075_v55  ;;  %v1779_v1 = vrot.slane %v1777_v52, 5  ;;  %v1783_v2 = vrot.slane %v1781_v53, 4 }
  0x60   : > { %6531 = vrot.lane.b32.xlu0 %v6530_v37, %s7214_s25  ;;  %v6555_v4 = vpack.i.bf16 %v3868_v56, %v3867_v46  ;;  %v1774_v5 = vor.u32 %v1773_v58, %v1770_v57  ;;  %v1787_v6 = vshll.u32 %v5652_v51, 16  ;;  %v5740_v7 = vrot.slane %v5698_v54, 9  ;;  %v5796_v57 = vld [vmem:[%s7270_s22 + $0x44] sm:$0x1] }
  0x61   : > { %v3085_v8 = vsel %vm7315_vm5, %v3080_v61, %v3084_v42  ;;  %v1784_v10 = vor.u32 %v1783_v2, %v1779_v1  ;;  %v2423_v11 = vrot.slane %v5699_v59, 5  ;;  %v2426_v12 = vrot.slane %v5700_v60, 5  ;;  %v5794_v42 = vld [vmem:[%s7270_s22 + $0x3c] sm:$0xf] }
  0x62   : > { %v3435_v13 = vunpack.c.l.bf16 %v3085_v8  ;;  %v1775_v14 = vrot.slane %v1774_v5, 4  ;;  %v1789_v15 = vrot.slane %v1787_v6, 5  ;;  %v470_v16 = vshrl.u32 %v334_v3, 16  ;;  %v5842_v8 = vld [vmem:[%s7270_s22 + $0x3c] sm:$0xe] }
  0x63   : > { %v1785_v17 = vrot.slane %v1784_v10, 4  ;;  %v2424_v18 = vsel %vm7272_vm2, %v5740_v7, %v2423_v11  ;;  %v2425_v19 = vrot.slane %v2423_v11, 4  ;;  %v473_v22 = vshll.u32 %v334_v3, 16  ;;  %v5617_v3 = vld [vmem:[%s7270_s22 + $0x3c] sm:$0xff]  }
  0x64   : > { %v6545_v23 = vpack.i.bf16 %v3435_v13, %v3434_v63  ;;  %6541 = vrot.lane.b32.xlu0 %v7432_v9, %s7212_s23  ;;  %v1780_v24 = vsel %vm7315_vm5, %v1775_v14, %v1779_v1  ;;  %v2550_v25 = vunpack.c.l.bf16 %v2424_v18  ;;  %v472_v28 = vrot.slane %v470_v16, 4  ;;  %v5843_v14 = vld [vmem:[%s7270_s22 + $0x40] sm:$0xf] }
  0x65   : > { %v1790_v30 = vsel %vm7315_vm5, %v1785_v17, %v1789_v15  ;;  %v2117_v31 = vunpack.c.l.bf16 %v1780_v24  ;;  %v2427_v32 = vsel %vm7272_vm2, %v2425_v19, %v2426_v12  ;;  %v475_v21 = vrot.slane %v473_v22, 5  ;;  %v5844_v19 = vld [vmem:[%s7270_s22 + $0x44] sm:$0x1] }
  0x66   : > { %6546 = vrot.lane.b32.xlu1 %v6545_v23, %s7218_s29  ;;  %v2118_v9 = vunpack.c.l.bf16 %v1790_v30  ;;  %v2551_v27 = vunpack.c.l.bf16 %v2427_v32  ;;  %v479_v33 = vshll.u32 %v335_v20, 16  ;;  %v483_v34 = vshrl.u32 %v335_v20, 16  ;;  %v5653_v20 = vld [vmem:[%s7270_s22 + $0x3c] sm:$0xf] }
  0x67   : > { %v476_v37 = vor.u32 %v475_v21, %v472_v28  ;;  %v489_v38 = vshll.u32 %v336_v26, 16  ;;  %v2779_v39 = vunpack.c.l.bf16 %v5759_v29  ;;  %v2780_v40 = vunpack.c.h.bf16 %v5759_v29 }
  0x68   : > { %v6550_v43 = vpack.i.bf16 %v2118_v9, %v2117_v31  ;;  %v6565_v44 = vpack.i.bf16 %v2551_v27, %v2550_v25  ;;  %v481_v45 = vrot.slane %v479_v33, 5  ;;  %v485_v46 = vrot.slane %v483_v34, 4  ;;  %v5654_v9 = vld [vmem:[%s7270_s22 + $0x40] sm:$0xf] }
  0x69   : > { %v477_v48 = vrot.slane %v476_v37, 4  ;;  %v491_v49 = vrot.slane %v489_v38, 5  ;;  %v6575_v50 = vpack.i.bf16 %v2780_v40, %v2779_v39  ;;  %v5597_v51 = vrot.slane %v994_v35, 9  ;;  %v5701_v38 = vld [vmem:[%s7270_s22 + $0x3c] sm:$0xe] }
  0x6a   : > { %6556 = vrot.lane.b32.xlu1 %v6555_v4, %s7219_s30  ;;  %6551 = vrot.lane.b32.xlu0 %v6550_v43, %s7216_s27  ;;  %v486_v52 = vor.u32 %v485_v46, %v481_v45  ;;  %v1111_v53 = vrot.slane %v995_v36, 5  ;;  %v1114_v54 = vrot.slane %v996_v41, 5  ;;  %v3087_v55 = vshrl.u32 %v5794_v42, 16  ;;  %v5655_v36 = vld [vmem:[%s7270_s22 + $0x44] sm:$0x1] }
  0x6b   : > { %v482_v56 = vsel %vm7315_vm5, %v477_v48, %v481_v45  ;;  %v3090_v58 = vshll.u32 %v5794_v42, 16  ;;  %v3096_v59 = vshll.u32 %v5795_v47, 16  ;;  %v3100_v60 = vshrl.u32 %v5795_v47, 16  ;;  %v5702_v43 = vld [vmem:[%s7270_s22 + $0x40] sm:$0xf] }
  0x6c   : > { %v487_v61 = vrot.slane %v486_v52, 4  ;;  %v797_v63 = vunpack.c.l.bf16 %v482_v56  ;;  %v1112_v1 = vsel %vm7272_vm2, %v5597_v51, %v1111_v53  ;;  %v1113_v2 = vrot.slane %v1111_v53, 4  ;;  %v5703_v48 = vld [vmem:[%s7270_s22 + $0x44] sm:$0x1]  ;;  %v337_v53 = vld [vmem:[%s7270_s22 + $0x3c] sm:$0xf] }
  0x6d   : > { %v1233_v4 = vunpack.c.l.bf16 %v1112_v1  ;;  %v3089_v5 = vrot.slane %v3087_v55, 4  ;;  %v3092_v6 = vrot.slane %v3090_v58, 5  ;;  %v3098_v7 = vrot.slane %v3096_v59, 5  ;;  %v338_v58 = vld [vmem:[%s7270_s22 + $0x40] sm:$0xf] }
  0x6e   : > { %6566 = vrot.lane.b32.xlu1 %v6565_v44, %s7215_s26  ;;  %v492_v10 = vsel %vm7315_vm5, %v487_v61, %v491_v49  ;;  %v1115_v11 = vsel %vm7272_vm2, %v1113_v2, %v1114_v54  ;;  %v3102_v12 = vrot.slane %v3100_v60, 4  ;;  %v3106_v13 = vshll.u32 %v5796_v57, 16 }
  0x6f   : > { %v798_v15 = vunpack.c.l.bf16 %v492_v10  ;;  %v1234_v16 = vunpack.c.l.bf16 %v1115_v11  ;;  %v3093_v17 = vor.u32 %v3092_v6, %v3089_v5  ;;  %v1462_v18 = vunpack.c.l.bf16 %v5617_v3  ;;  %v6112_v11 = vld [vmem:[%s7270_s22 + $0x48] sm:$0xff]  }
  0x70   : > { %v3103_v22 = vor.u32 %v3102_v12, %v3098_v7  ;;  %v3108_v23 = vrot.slane %v3106_v13, 5  ;;  %v1463_v24 = vunpack.c.h.bf16 %v5617_v3  ;;  %v5884_v25 = vrot.slane %v5842_v8, 9 }
  0x71   : > { %v6560_v26 = vpack.i.bf16 %v798_v15, %v797_v63  ;;  %v6570_v28 = vpack.i.bf16 %v1234_v16, %v1233_v4  ;;  %v3094_v29 = vrot.slane %v3093_v17, 4  ;;  %v3742_v30 = vrot.slane %v5843_v14, 5 }
  0x72   : > { %6576 = vrot.lane.b32.xlu1 %v6575_v50, %s7213_s24  ;;  %v3104_v31 = vrot.slane %v3103_v22, 4  ;;  %v6580_v32 = vpack.i.bf16 %v1463_v24, %v1462_v18  ;;  %v3745_v21 = vrot.slane %v5844_v19, 5  ;;  %v1792_v27 = vshrl.u32 %v5653_v20, 16  ;;  %v998_v22 = vld [vmem:[%s7270_s22 + $0x40] sm:$0xf] }
  0x73   : > { %6561 = vrot.lane.b32.xlu0 %v6560_v26, %s7217_s28  ;;  %v3099_v33 = vsel %vm7315_vm5, %v3094_v29, %v3098_v7  ;;  %v3743_v34 = vsel %vm7272_vm2, %v5884_v25, %v3742_v30  ;;  %v3744_v35 = vrot.slane %v3742_v30, 4  ;;  %v1795_v37 = vshll.u32 %v5653_v20, 16  ;;  %v339_v7 = vld [vmem:[%s7270_s22 + $0x44] sm:$0x1]  ;;  %v997_v20 = vld [vmem:[%s7270_s22 + $0x3c] sm:$0xe] }
  0x74   : > { %v3109_v39 = vsel %vm7315_vm5, %v3104_v31, %v3108_v23  ;;  %v3436_v40 = vunpack.c.l.bf16 %v3099_v33  ;;  %v3869_v41 = vunpack.c.l.bf16 %v3743_v34  ;;  %v1794_v42 = vrot.slane %v1792_v27, 4 }
  0x75   : > { %v3437_v44 = vunpack.c.l.bf16 %v3109_v39  ;;  %v3746_v45 = vsel %vm7272_vm2, %v3744_v35, %v3745_v21  ;;  %v1797_v46 = vrot.slane %v1795_v37, 5  ;;  %v1801_v47 = vshll.u32 %v5654_v9, 16  ;;  %v5797_v21 = vld [vmem:[%s7270_s22 + $0x48] sm:$0xf]  ;;  %v5798_v35 = vld [vmem:[%s7270_s22 + $0x4c] sm:$0xf] }
  0x76   : > { %v3870_v49 = vunpack.c.l.bf16 %v3746_v45  ;;  %v1805_v50 = vshrl.u32 %v5654_v9, 16  ;;  %v1811_v51 = vshll.u32 %v5655_v36, 16  ;;  %v5741_v52 = vrot.slane %v5701_v38, 9 }
  0x77   : > { %6571 = vrot.lane.b32.xlu0 %v6570_v28, %s7214_s25  ;;  %v6585_v54 = vpack.i.bf16 %v3437_v44, %v3436_v40  ;;  %v1798_v55 = vor.u32 %v1797_v46, %v1794_v42  ;;  %v1803_v56 = vrot.slane %v1801_v47, 5  ;;  %v2430_v57 = vrot.slane %v5702_v43, 5  ;;  %v999_v28 = vld [vmem:[%s7270_s22 + $0x44] sm:$0x1]  ;;  %v5799_v47 = vld [vmem:[%s7270_s22 + $0x50] sm:$0x1] }
  0x78   : > { %v6595_v59 = vpack.i.bf16 %v3870_v49, %v3869_v41  ;;  %v1807_v60 = vrot.slane %v1805_v50, 4  ;;  %v1813_v61 = vrot.slane %v1811_v51, 5  ;;  %v2433_v63 = vrot.slane %v5703_v48, 5  ;;  %v5845_v49 = vld [vmem:[%s7270_s22 + $0x48] sm:$0xe] }
  0x79   : > { %6586 = vrot.lane.b32.xlu1 %v6585_v54, %s7218_s29  ;;  %v1799_v1 = vrot.slane %v1798_v55, 4  ;;  %v2431_v2 = vsel %vm7272_vm2, %v5741_v52, %v2430_v57  ;;  %v2432_v3 = vrot.slane %v2430_v57, 4  ;;  %v494_v4 = vshrl.u32 %v337_v53, 16  ;;  %v5846_v54 = vld [vmem:[%s7270_s22 + $0x4c] sm:$0xf] }
  0x7a   : > { %v1808_v5 = vor.u32 %v1807_v60, %v1803_v56  ;;  %v2552_v6 = vunpack.c.l.bf16 %v2431_v2  ;;  %v497_v8 = vshll.u32 %v337_v53, 16  ;;  %v503_v10 = vshll.u32 %v338_v58, 16  ;;  %v5847_v55 = vld [vmem:[%s7270_s22 + $0x50] sm:$0x1]  ;;  %v5656_v60 = vld [vmem:[%s7270_s22 + $0x48] sm:$0xf] }
  0x7b   : > { %6581 = vrot.lane.b32.xlu0 %v6580_v32, %s7212_s23  ;;  %v1804_v12 = vsel %vm7315_vm5, %v1799_v1, %v1803_v56  ;;  %v2434_v13 = vsel %vm7272_vm2, %v2432_v3, %v2433_v63  ;;  %v496_v14 = vrot.slane %v494_v4, 4  ;;  %v507_v15 = vshrl.u32 %v338_v58, 16 }
  0x7c   : > { %v1809_v16 = vrot.slane %v1808_v5, 4  ;;  %v2119_v17 = vunpack.c.l.bf16 %v1804_v12  ;;  %v2553_v18 = vunpack.c.l.bf16 %v2434_v13  ;;  %v499_v19 = vrot.slane %v497_v8, 5 }
  0x7d   : > { %6596 = vrot.lane.b32.xlu1 %v6595_v59, %s7219_s30  ;;  %v505_v23 = vrot.slane %v503_v10, 5  ;;  %v509_v24 = vrot.slane %v507_v15, 4  ;;  %v513_v25 = vshll.u32 %v339_v7, 16  ;;  %v6073_v26 = vunpack.c.l.bf16 %v6112_v11  ;;  %v5657_v7 = vld [vmem:[%s7270_s22 + $0x4c] sm:$0xf] }
  0x7e   : > { %v1814_v29 = vsel %vm7315_vm5, %v1809_v16, %v1813_v61  ;;  %v6605_v30 = vpack.i.bf16 %v2553_v18, %v2552_v6  ;;  %v500_v31 = vor.u32 %v499_v19, %v496_v14  ;;  %v6074_v32 = vunpack.c.h.bf16 %v6112_v11  ;;  %v5658_v19 = vld [vmem:[%s7270_s22 + $0x50] sm:$0x1] }
  0x7f   : > { %v2120_v9 = vunpack.c.l.bf16 %v1814_v29  ;;  %v510_v27 = vor.u32 %v509_v24, %v505_v23  ;;  %v515_v33 = vrot.slane %v513_v25, 5  ;;  %v5598_v34 = vrot.slane %v997_v20, 9  ;;  %v5705_v29 = vld [vmem:[%s7270_s22 + $0x4c] sm:$0xf] }
  0x80   : > { %v501_v36 = vrot.slane %v500_v31, 4  ;;  %v7539_v37 = vpack.i.bf16 %v6074_v32, %v6073_v26  ;;  %v1118_v38 = vrot.slane %v998_v22, 5  ;;  %v1121_v39 = vrot.slane %v999_v28, 5 }
  0x81   : > { %v6590_v40 = vpack.i.bf16 %v2120_v9, %v2119_v17  ;;  %6606 = vrot.lane.b32.xlu1 %v6605_v30, %s7215_s26  ;;  %v511_v41 = vrot.slane %v510_v27, 4  ;;  %v3111_v42 = vshrl.u32 %v5797_v21, 16  ;;  %v3114_v43 = vshll.u32 %v5797_v21, 16  ;;  %v5706_v30 = vld [vmem:[%s7270_s22 + $0x50] sm:$0x1] }
  0x82   : > { %v506_v44 = vsel %vm7315_vm5, %v501_v36, %v505_v23  ;;  %v1119_v45 = vsel %vm7272_vm2, %v5598_v34, %v1118_v38  ;;  %v1120_v46 = vrot.slane %v1118_v38, 4  ;;  %v3120_v48 = vshll.u32 %v5798_v35, 16  ;;  %v5704_v23 = vld [vmem:[%s7270_s22 + $0x48] sm:$0xe] }
  0x83   : > { %6591 = vrot.lane.b32.xlu0 %v6590_v40, %s7216_s27  ;;  %v516_v50 = vsel %vm7315_vm5, %v511_v41, %v515_v33  ;;  %v799_v51 = vunpack.c.l.bf16 %v506_v44  ;;  %v1235_v52 = vunpack.c.l.bf16 %v1119_v45  ;;  %v3113_v53 = vrot.slane %v3111_v42, 4  ;;  %v340_v36 = vld [vmem:[%s7270_s22 + $0x48] sm:$0xf] }
  0x84   : > { %v800_v56 = vunpack.c.l.bf16 %v516_v50  ;;  %v1122_v57 = vsel %vm7272_vm2, %v1120_v46, %v1121_v39  ;;  %v3116_v58 = vrot.slane %v3114_v43, 5  ;;  %v3122_v59 = vrot.slane %v3120_v48, 5  ;;  %v341_v48 = vld [vmem:[%s7270_s22 + $0x4c] sm:$0xf] }
  0x85   : > { %6616 = vrot.lane.b32.xlu1 %v7539_v37, %s7213_s24  ;;  %v1236_v61 = vunpack.c.l.bf16 %v1122_v57  ;;  %v3124_v63 = vshrl.u32 %v5798_v35, 16  ;;  %v3130_v1 = vshll.u32 %v5799_v47, 16  ;;  %v5885_v2 = vrot.slane %v5845_v49, 9 }
  0x86   : > { %v6600_v3 = vpack.i.bf16 %v800_v56, %v799_v51  ;;  %v3117_v4 = vor.u32 %v3116_v58, %v3113_v53  ;;  %v3749_v5 = vrot.slane %v5846_v54, 5  ;;  %v3752_v6 = vrot.slane %v5847_v55, 5  ;;  %v342_v55 = vld [vmem:[%s7270_s22 + $0x50] sm:$0x1]  ;;  %v5763_v56 = vld [vmem:[%s7270_s22 + $0x54] sm:$0xff]  }
  0x87   : > { %v6610_v8 = vpack.i.bf16 %v1236_v61, %v1235_v52  ;;  %v3126_v10 = vrot.slane %v3124_v63, 4  ;;  %v3132_v11 = vrot.slane %v3130_v1, 5  ;;  %v1816_v12 = vshrl.u32 %v5656_v60, 16 }
  0x88   : > { %6601 = vrot.lane.b32.xlu0 %v6600_v3, %s7217_s28  ;;  %v3118_v13 = vrot.slane %v3117_v4, 4  ;;  %v3750_v14 = vsel %vm7272_vm2, %v5885_v2, %v3749_v5  ;;  %v3751_v15 = vrot.slane %v3749_v5, 4  ;;  %v1819_v16 = vshll.u32 %v5656_v60, 16  ;;  %v1000_v2 = vld [vmem:[%s7270_s22 + $0x48] sm:$0xe] }
  0x89   : > { %v3127_v17 = vor.u32 %v3126_v10, %v3122_v59  ;;  %v3871_v18 = vunpack.c.l.bf16 %v3750_v14  ;;  %v1818_v20 = vrot.slane %v1816_v12, 4  ;;  %v1825_v22 = vshll.u32 %v5657_v7, 16  ;;  %v5800_v14 = vld [vmem:[%s7270_s22 + $0x54] sm:$0xf] }
  0x8a   : > { %v3123_v24 = vsel %vm7315_vm5, %v3118_v13, %v3122_v59  ;;  %v3753_v25 = vsel %vm7272_vm2, %v3751_v15, %v3752_v6  ;;  %v1821_v26 = vrot.slane %v1819_v16, 5  ;;  %v1829_v28 = vshrl.u32 %v5657_v7, 16  ;;  %v1001_v7 = vld [vmem:[%s7270_s22 + $0x4c] sm:$0xf]  ;;  %v5801_v15 = vld [vmem:[%s7270_s22 + $0x58] sm:$0xf] }
  0x8b   : > { %v3128_v31 = vrot.slane %v3127_v17, 4  ;;  %v3438_v32 = vunpack.c.l.bf16 %v3123_v24  ;;  %v3872_v21 = vunpack.c.l.bf16 %v3753_v25  ;;  %v1827_v9 = vrot.slane %v1825_v22, 5  ;;  %v7594_v25 = vpop.permute.xlu0 %6431 }
  0x8c   : > { %6611 = vrot.lane.b32.xlu0 %v6610_v8, %s7214_s25  ;;  %v1822_v27 = vor.u32 %v1821_v26, %v1818_v20  ;;  %v1831_v33 = vrot.slane %v1829_v28, 4  ;;  %v1835_v34 = vshll.u32 %v5658_v19, 16  ;;  %v5742_v35 = vrot.slane %v5704_v23, 9  ;;  %v1002_v8 = vld [vmem:[%s7270_s22 + $0x50] sm:$0x1] }
  0x8d   : > { %v3133_v38 = vsel %vm7315_vm5, %v3128_v31, %v3132_v11  ;;  %v6635_v39 = vpack.i.bf16 %v3872_v21, %v3871_v18  ;;  %v2437_v40 = vrot.slane %v5705_v29, 5  ;;  %v2440_v41 = vrot.slane %v5706_v30, 5  ;;  %v5802_v28 = vld [vmem:[%s7270_s22 + $0x5c] sm:$0x1] }
  0x8e   : > { %v3439_v42 = vunpack.c.l.bf16 %v3133_v38  ;;  %v1823_v43 = vrot.slane %v1822_v27, 4  ;;  %v1832_v44 = vor.u32 %v1831_v33, %v1827_v9  ;;  %v1837_v45 = vrot.slane %v1835_v34, 5  ;;  %v5621_v33 = vld [vmem:[%s7270_s22 + $0x54] sm:$0xff]  }
  0x8f   : > { %v2438_v46 = vsel %vm7272_vm2, %v5742_v35, %v2437_v40  ;;  %v2439_v47 = vrot.slane %v2437_v40, 4  ;;  %v518_v49 = vshrl.u32 %v340_v36, 16  ;;  %v521_v50 = vshll.u32 %v340_v36, 16 }
  0x90   : > { %v6625_v51 = vpack.i.bf16 %v3439_v42, %v3438_v32  ;;  %6621 = vrot.lane.b32.xlu0 %v7539_v37, %s7212_s23  ;;  %v1828_v52 = vsel %vm7315_vm5, %v1823_v43, %v1827_v9  ;;  %v1833_v53 = vrot.slane %v1832_v44, 4  ;;  %v2554_v54 = vunpack.c.l.bf16 %v2438_v46  ;;  %v5849_v44 = vld [vmem:[%s7270_s22 + $0x58] sm:$0xf] }
  0x91   : > { %v2121_v57 = vunpack.c.l.bf16 %v1828_v52  ;;  %v2441_v58 = vsel %vm7272_vm2, %v2439_v47, %v2440_v41  ;;  %v520_v59 = vrot.slane %v518_v49, 4  ;;  %v523_v60 = vrot.slane %v521_v50, 5  ;;  %v5850_v50 = vld [vmem:[%s7270_s22 + $0x5c] sm:$0x1] }
  0x92   : > { %6626 = vrot.lane.b32.xlu1 %v6625_v51, %s7218_s29  ;;  %v1838_v37 = vsel %vm7315_vm5, %v1833_v53, %v1837_v45  ;;  %v2555_v61 = vunpack.c.l.bf16 %v2441_v58  ;;  %v527_v63 = vshll.u32 %v341_v48, 16  ;;  %v531_v1 = vshrl.u32 %v341_v48, 16  ;;  %v7610_v45 = vpop.permute.xlu1 %6421  ;;  %v5659_v51 = vld [vmem:[%s7270_s22 + $0x54] sm:$0xf] }
  0x93   : > { %v2122_v3 = vunpack.c.l.bf16 %v1838_v37  ;;  %v524_v4 = vor.u32 %v523_v60, %v520_v59  ;;  %v537_v5 = vshll.u32 %v342_v55, 16  ;;  %v2783_v6 = vunpack.c.l.bf16 %v5763_v56 }
  0x94   : > { %v6645_v10 = vpack.i.bf16 %v2555_v61, %v2554_v54  ;;  %v529_v11 = vrot.slane %v527_v63, 5  ;;  %v533_v12 = vrot.slane %v531_v1, 4  ;;  %v2784_v13 = vunpack.c.h.bf16 %v5763_v56  ;;  %v7614_v56 = vpop.permute.xlu0 %6436  ;;  %v5660_v1 = vld [vmem:[%s7270_s22 + $0x58] sm:$0xf] }
  0x95   : > { %v6630_v16 = vpack.i.bf16 %v2122_v3, %v2121_v57  ;;  %v525_v17 = vrot.slane %v524_v4, 4  ;;  %v539_v18 = vrot.slane %v537_v5, 5  ;;  %v5599_v19 = vrot.slane %v1000_v2, 9 }
  0x96   : > { %6636 = vrot.lane.b32.xlu1 %v6635_v39, %s7219_s30  ;;  %v534_v20 = vor.u32 %v533_v12, %v529_v11  ;;  %v6655_v22 = vpack.i.bf16 %v2784_v13, %v2783_v6  ;;  %v1125_v23 = vrot.slane %v1001_v7, 5  ;;  %v1128_v24 = vrot.slane %v1002_v8, 5  ;;  %v5848_v39 = vld [vmem:[%s7270_s22 + $0x54] sm:$0xe]  ;;  %v5661_v6 = vld [vmem:[%s7270_s22 + $0x5c] sm:$0x1] }
  0x97   : > { %6631 = vrot.lane.b32.xlu0 %v6630_v16, %s7216_s27  ;;  %v530_v26 = vsel %vm7315_vm5, %v525_v17, %v529_v11  ;;  %v3135_v29 = vshrl.u32 %v5800_v14, 16  ;;  %v3138_v30 = vshll.u32 %v5800_v14, 16  ;;  %v3144_v31 = vshll.u32 %v5801_v15, 16  ;;  %v5707_v8 = vld [vmem:[%s7270_s22 + $0x54] sm:$0xe] }
  0x98   : > { %v535_v32 = vrot.slane %v534_v20, 4  ;;  %v801_v21 = vunpack.c.l.bf16 %v530_v26  ;;  %v1126_v9 = vsel %vm7272_vm2, %v5599_v19, %v1125_v23  ;;  %v1127_v27 = vrot.slane %v1125_v23, 4  ;;  %v5708_v14 = vld [vmem:[%s7270_s22 + $0x58] sm:$0xf]  ;;  %v5709_v20 = vld [vmem:[%s7270_s22 + $0x5c] sm:$0x1] }
  0x99   : > { %v1237_v34 = vunpack.c.l.bf16 %v1126_v9  ;;  %v3137_v35 = vrot.slane %v3135_v29, 4  ;;  %v3140_v36 = vrot.slane %v3138_v30, 5  ;;  %v3146_v38 = vrot.slane %v3144_v31, 5  ;;  %v7634_v29 = vpop.permute.xlu0 %6446  ;;  %v344_v9 = vld [vmem:[%s7270_s22 + $0x58] sm:$0xf] }
  0x9a   : > { %6646 = vrot.lane.b32.xlu1 %v6645_v10, %s7215_s26  ;;  %v540_v40 = vsel %vm7315_vm5, %v535_v32, %v539_v18  ;;  %v1129_v41 = vsel %vm7272_vm2, %v1127_v27, %v1128_v24  ;;  %v3148_v42 = vshrl.u32 %v5801_v15, 16  ;;  %v3154_v43 = vshll.u32 %v5802_v28, 16  ;;  %v7626_v15 = vpop.permute.xlu1 %6426  ;;  %v343_v28 = vld [vmem:[%s7270_s22 + $0x54] sm:$0xf] }
  0x9b   : > { %v802_v46 = vunpack.c.l.bf16 %v540_v40  ;;  %v1238_v47 = vunpack.c.l.bf16 %v1129_v41  ;;  %v3141_v48 = vor.u32 %v3140_v36, %v3137_v35  ;;  %v1466_v49 = vunpack.c.l.bf16 %v5621_v33 }
  0x9c   : > { %v3150_v52 = vrot.slane %v3148_v42, 4  ;;  %v3156_v53 = vrot.slane %v3154_v43, 5  ;;  %v1467_v54 = vunpack.c.h.bf16 %v5621_v33  ;;  %v5886_v55 = vrot.slane %v5848_v39, 9  ;;  %v345_v43 = vld [vmem:[%s7270_s22 + $0x5c] sm:$0x1] }
  0x9d   : > { %v6640_v57 = vpack.i.bf16 %v802_v46, %v801_v21  ;;  %v6650_v58 = vpack.i.bf16 %v1238_v47, %v1237_v34  ;;  %v3142_v59 = vrot.slane %v3141_v48, 4  ;;  %v3756_v60 = vrot.slane %v5849_v44, 5 }
  0x9e   : > { %6656 = vrot.lane.b32.xlu1 %v6655_v22, %s7213_s24  ;;  %v3151_v37 = vor.u32 %v3150_v52, %v3146_v38  ;;  %v6660_v61 = vpack.i.bf16 %v1467_v54, %v1466_v49  ;;  %v3759_v63 = vrot.slane %v5850_v50, 5  ;;  %v1840_v2 = vshrl.u32 %v5659_v51, 16  ;;  %v7641_v47 = vpop.permute.xlu1 %6441  ;;  %v6113_v52 = vld [vmem:[%s7270_s22 + $0x60] sm:$0xff]  }
  0x9f   : > { %6641 = vrot.lane.b32.xlu0 %v6640_v57, %s7217_s28  ;;  %v3147_v3 = vsel %vm7315_vm5, %v3142_v59, %v3146_v38  ;;  %v3757_v4 = vsel %vm7272_vm2, %v5886_v55, %v3756_v60  ;;  %v3758_v5 = vrot.slane %v3756_v60, 4  ;;  %v1843_v7 = vshll.u32 %v5659_v51, 16  ;;  %v7651_v59 = vpop.permute.xlu0 %6451 }
  0xa0   : > { %v3152_v10 = vrot.slane %v3151_v37, 4  ;;  %v3440_v11 = vunpack.c.l.bf16 %v3147_v3  ;;  %v3873_v12 = vunpack.c.l.bf16 %v3757_v4  ;;  %v1842_v13 = vrot.slane %v1840_v2, 4 }
  0xa1   : > { %v3760_v16 = vsel %vm7272_vm2, %v3758_v5, %v3759_v63  ;;  %v1845_v17 = vrot.slane %v1843_v7, 5  ;;  %v1849_v18 = vshll.u32 %v5660_v1, 16  ;;  %v1853_v19 = vshrl.u32 %v5660_v1, 16  ;;  %v1004_v1 = vld [vmem:[%s7270_s22 + $0x58] sm:$0xf] }
  0xa2   : > { %v3157_v22 = vsel %vm7315_vm5, %v3152_v10, %v3156_v53  ;;  %v3874_v23 = vunpack.c.l.bf16 %v3760_v16  ;;  %v1859_v24 = vshll.u32 %v5661_v6, 16  ;;  %v5743_v26 = vrot.slane %v5707_v8, 9  ;;  %v1005_v6 = vld [vmem:[%s7270_s22 + $0x5c] sm:$0x1]  ;;  %v5803_v7 = vld [vmem:[%s7270_s22 + $0x60] sm:$0xf] }
  0xa3   : > { %6651 = vrot.lane.b32.xlu0 %v6650_v58, %s7214_s25  ;;  %v3441_v30 = vunpack.c.l.bf16 %v3157_v22  ;;  %v1846_v31 = vor.u32 %v1845_v17, %v1842_v13  ;;  %v1851_v32 = vrot.slane %v1849_v18, 5  ;;  %v1855_v21 = vrot.slane %v1853_v19, 4  ;;  %v1003_v58 = vld [vmem:[%s7270_s22 + $0x54] sm:$0xe]  ;;  %v5804_v13 = vld [vmem:[%s7270_s22 + $0x64] sm:$0xf]  ;;  %v7662_v19 = vpop.permute.xlu1 %6456 }
  0xa4   : > { %v6675_v27 = vpack.i.bf16 %v3874_v23, %v3873_v12  ;;  %v1861_v33 = vrot.slane %v1859_v24, 5  ;;  %v2444_v34 = vrot.slane %v5708_v14, 5  ;;  %v2447_v35 = vrot.slane %v5709_v20, 5 }
  0xa5   : > { %v6665_v36 = vpack.i.bf16 %v3441_v30, %v3440_v11  ;;  %v1847_v38 = vrot.slane %v1846_v31, 4  ;;  %v1856_v39 = vor.u32 %v1855_v21, %v1851_v32  ;;  %v542_v40 = vshrl.u32 %v343_v28, 16  ;;  %v5805_v31 = vld [vmem:[%s7270_s22 + $0x68] sm:$0x1] }
  0xa6   : > { %v2445_v41 = vsel %vm7272_vm2, %v5743_v26, %v2444_v34  ;;  %v2446_v42 = vrot.slane %v2444_v34, 4  ;;  %v545_v44 = vshll.u32 %v343_v28, 16  ;;  %v551_v46 = vshll.u32 %v344_v9, 16 }
  0xa7   : > { %6666 = vrot.lane.b32.xlu1 %v6665_v36, %s7218_s29  ;;  %6661 = vrot.lane.b32.xlu0 %v6660_v61, %s7212_s23  ;;  %v1852_v48 = vsel %vm7315_vm5, %v1847_v38, %v1851_v32  ;;  %v1857_v49 = vrot.slane %v1856_v39, 4  ;;  %v2556_v50 = vunpack.c.l.bf16 %v2445_v41  ;;  %v544_v51 = vrot.slane %v542_v40, 4 }
  0xa8   : > { %v2123_v53 = vunpack.c.l.bf16 %v1852_v48  ;;  %v2448_v54 = vsel %vm7272_vm2, %v2446_v42, %v2447_v35  ;;  %v547_v55 = vrot.slane %v545_v44, 5  ;;  %v553_v57 = vrot.slane %v551_v46, 5  ;;  %v5851_v44 = vld [vmem:[%s7270_s22 + $0x60] sm:$0xe]  ;;  %v5852_v46 = vld [vmem:[%s7270_s22 + $0x64] sm:$0xf] }
  0xa9   : > { %v1862_v60 = vsel %vm7315_vm5, %v1857_v49, %v1861_v33  ;;  %v2557_v37 = vunpack.c.l.bf16 %v2448_v54  ;;  %v555_v61 = vshrl.u32 %v344_v9, 16  ;;  %v561_v63 = vshll.u32 %v345_v43, 16  ;;  %v7683_v54 = vpop.permute.xlu1 %6466 }
  0xaa   : > { %v2124_v2 = vunpack.c.l.bf16 %v1862_v60  ;;  %v548_v3 = vor.u32 %v547_v55, %v544_v51  ;;  %v6077_v4 = vunpack.c.l.bf16 %v6113_v52  ;;  %v6078_v5 = vunpack.c.h.bf16 %v6113_v52  ;;  %v7670_v21 = vpop.permute.xlu0 %6461  ;;  %v5853_v52 = vld [vmem:[%s7270_s22 + $0x68] sm:$0x1] }
  0xab   : > { %6676 = vrot.lane.b32.xlu1 %v6675_v27, %s7219_s30  ;;  %v6685_v8 = vpack.i.bf16 %v2557_v37, %v2556_v50  ;;  %v557_v10 = vrot.slane %v555_v61, 4  ;;  %v563_v11 = vrot.slane %v561_v63, 5  ;;  %v5600_v12 = vrot.slane %v1003_v58, 9  ;;  %v5663_v37 = vld [vmem:[%s7270_s22 + $0x64] sm:$0xf] }
  0xac   : > { %v6670_v14 = vpack.i.bf16 %v2124_v2, %v2123_v53  ;;  %v549_v16 = vrot.slane %v548_v3, 4  ;;  %v7660_v17 = vpack.i.bf16 %v6078_v5, %v6077_v4  ;;  %v1132_v18 = vrot.slane %v1004_v1, 5  ;;  %v5662_v53 = vld [vmem:[%s7270_s22 + $0x60] sm:$0xf] }
  0xad   : > { %v558_v20 = vor.u32 %v557_v10, %v553_v57  ;;  %v1135_v22 = vrot.slane %v1005_v6, 5  ;;  %v3159_v23 = vshrl.u32 %v5803_v7, 16  ;;  %v3162_v24 = vshll.u32 %v5803_v7, 16 }
  0xae   : > { %6671 = vrot.lane.b32.xlu0 %v6670_v14, %s7216_s27  ;;  %v554_v26 = vsel %vm7315_vm5, %v549_v16, %v553_v57  ;;  %v1133_v28 = vsel %vm7272_vm2, %v5600_v12, %v1132_v18  ;;  %v1134_v30 = vrot.slane %v1132_v18, 4  ;;  %v3168_v32 = vshll.u32 %v5804_v13, 16 }
  0xaf   : > { %6686 = vrot.lane.b32.xlu1 %v6685_v8, %s7215_s26  ;;  %v559_v9 = vrot.slane %v558_v20, 4  ;;  %v803_v27 = vunpack.c.l.bf16 %v554_v26  ;;  %v1239_v33 = vunpack.c.l.bf16 %v1133_v28  ;;  %v3161_v34 = vrot.slane %v3159_v23, 4  ;;  %v7700_v28 = vpop.permute.xlu1 %6476 }
  0xb0   : > { %v1136_v35 = vsel %vm7272_vm2, %v1134_v30, %v1135_v22  ;;  %v3164_v36 = vrot.slane %v3162_v24, 5  ;;  %v3170_v38 = vrot.slane %v3168_v32, 5  ;;  %v3172_v39 = vshrl.u32 %v5804_v13, 16 }
  0xb1   : > { %v564_v40 = vsel %vm7315_vm5, %v559_v9, %v563_v11  ;;  %v1240_v41 = vunpack.c.l.bf16 %v1136_v35  ;;  %v3178_v42 = vshll.u32 %v5805_v31, 16  ;;  %v6424_v43 = vunpack.i.h.bf16 %v7610_v45  ;;  %v5664_v11 = vld [vmem:[%s7270_s22 + $0x68] sm:$0x1] }
  0xb2   : > { %v804_v48 = vunpack.c.l.bf16 %v564_v40  ;;  %v3165_v49 = vor.u32 %v3164_v36, %v3161_v34  ;;  %v3174_v50 = vrot.slane %v3172_v39, 4  ;;  %v6423_v51 = vunpack.i.l.bf16 %v7610_v45  ;;  %v7690_v3 = vpop.permute.xlu0 %6471  ;;  %v5712_v39 = vld [vmem:[%s7270_s22 + $0x68] sm:$0x1]  ;;  %v346_v40 = vld [vmem:[%s7270_s22 + $0x60] sm:$0xf] }
  0xb3   : > { %6696 = vrot.lane.b32.xlu1 %v7660_v17, %s7213_s24  ;;  %v6690_v55 = vpack.i.bf16 %v1240_v41, %v1239_v33  ;;  %v3180_v57 = vrot.slane %v3178_v42, 5  ;;  %v6434_v58 = vunpack.i.h.bf16 %v7594_v25  ;;  %v6433_v60 = vunpack.i.l.bf16 %v7594_v25 }
  0xb4   : > { %v6680_v61 = vpack.i.bf16 %v804_v48, %v803_v27  ;;  %v3166_v63 = vrot.slane %v3165_v49, 4  ;;  %v3175_v1 = vor.u32 %v3174_v50, %v3170_v38  ;;  %v5887_v2 = vrot.slane %v5851_v44, 9  ;;  %v5710_v27 = vld [vmem:[%s7270_s22 + $0x60] sm:$0xe]  ;;  %v347_v49 = vld [vmem:[%s7270_s22 + $0x64] sm:$0xf] }
  0xb5   : > { %v3763_v4 = vrot.slane %v5852_v46, 5  ;;  %v3766_v5 = vrot.slane %v5853_v52, 5  ;;  %v1864_v6 = vshrl.u32 %v5662_v53, 16  ;;  %v1867_v7 = vshll.u32 %v5662_v53, 16 }
  0xb6   : > { %6681 = vrot.lane.b32.xlu0 %v6680_v61, %s7217_s28  ;;  %v3171_v8 = vsel %vm7315_vm5, %v3166_v63, %v3170_v38  ;;  %v3176_v10 = vrot.slane %v3175_v1, 4  ;;  %v1873_v12 = vshll.u32 %v5663_v37, 16  ;;  %v1877_v13 = vshrl.u32 %v5663_v37, 16  ;;  %v5711_v38 = vld [vmem:[%s7270_s22 + $0x64] sm:$0xf] }
  0xb7   : > { %v3442_v14 = vunpack.c.l.bf16 %v3171_v8  ;;  %v3764_v16 = vsel %vm7272_vm2, %v5887_v2, %v3763_v4  ;;  %v3765_v18 = vrot.slane %v3763_v4, 4  ;;  %v1866_v20 = vrot.slane %v1864_v6, 4  ;;  %v348_v2 = vld [vmem:[%s7270_s22 + $0x68] sm:$0x1] }
  0xb8   : > { %v3181_v22 = vsel %vm7315_vm5, %v3176_v10, %v3180_v57  ;;  %v3875_v23 = vunpack.c.l.bf16 %v3764_v16  ;;  %v1869_v24 = vrot.slane %v1867_v7, 5  ;;  %v1875_v26 = vrot.slane %v1873_v12, 5  ;;  %v7722_v7 = vpop.permute.xlu1 %6486 }
  0xb9   : > { %v3443_v30 = vunpack.c.l.bf16 %v3181_v22  ;;  %v3767_v31 = vsel %vm7272_vm2, %v3765_v18, %v3766_v5  ;;  %v1879_v32 = vrot.slane %v1877_v13, 4  ;;  %v1883_v9 = vshll.u32 %v5664_v11, 16  ;;  %v7711_v41 = vpop.permute.xlu0 %6481 }
  0xba   : > { %6691 = vrot.lane.b32.xlu0 %v6690_v55, %s7214_s25  ;;  %v3876_v33 = vunpack.c.l.bf16 %v3767_v31  ;;  %v1870_v34 = vor.u32 %v1869_v24, %v1866_v20  ;;  %v6429_v35 = vunpack.i.h.bf16 %v7626_v15  ;;  %v6428_v36 = vunpack.i.l.bf16 %v7626_v15 }
  0xbb   : > { %v6705_v42 = vpack.i.bf16 %v3443_v30, %v3442_v14  ;;  %v1880_v44 = vor.u32 %v1879_v32, %v1875_v26  ;;  %v1885_v46 = vrot.slane %v1883_v9, 5  ;;  %v6439_v48 = vunpack.i.h.bf16 %v7614_v56 }
  0xbc   : > { %v6715_v50 = vpack.i.bf16 %v3876_v33, %v3875_v23  ;;  %v1871_v52 = vrot.slane %v1870_v34, 4  ;;  %v6438_v53 = vunpack.i.l.bf16 %v7614_v56  ;;  %v5744_v55 = vrot.slane %v5710_v27, 9  ;;  %v1006_v27 = vld [vmem:[%s7270_s22 + $0x60] sm:$0xe]  ;;  %v1007_v33 = vld [vmem:[%s7270_s22 + $0x64] sm:$0xf] }
  0xbd   : > { %6706 = vrot.lane.b32.xlu1 %v6705_v42, %s7218_s29  ;;  %v1881_v57 = vrot.slane %v1880_v44, 4  ;;  %v2451_v37 = vrot.slane %v5711_v38, 5  ;;  %v2454_v61 = vrot.slane %v5712_v39, 5  ;;  %v566_v63 = vshrl.u32 %v346_v40, 16  ;;  %v7728_v18 = vpop.permute.xlu0 %6491  ;;  %v1008_v42 = vld [vmem:[%s7270_s22 + $0x68] sm:$0x1] }
  0xbe   : > { %6701 = vrot.lane.b32.xlu0 %v7660_v17, %s7212_s23  ;;  %v1876_v1 = vsel %vm7315_vm5, %v1871_v52, %v1875_v26  ;;  %v569_v4 = vshll.u32 %v346_v40, 16  ;;  %v575_v5 = vshll.u32 %v347_v49, 16  ;;  %v579_v6 = vshrl.u32 %v347_v49, 16  ;;  %v5767_v26 = vld [vmem:[%s7270_s22 + $0x6c] sm:$0xff]   ;;  %v7742_v52 = vpop.permute.xlu1 %6496 }
  0xbf   : > { %v1886_v8 = vsel %vm7315_vm5, %v1881_v57, %v1885_v46  ;;  %v2125_v10 = vunpack.c.l.bf16 %v1876_v1  ;;  %v2452_v11 = vsel %vm7272_vm2, %v5744_v55, %v2451_v37  ;;  %v2453_v12 = vrot.slane %v2451_v37, 4 }
  0xc0   : > { %v2126_v17 = vunpack.c.l.bf16 %v1886_v8  ;;  %v2558_v13 = vunpack.c.l.bf16 %v2452_v11  ;;  %v568_v14 = vrot.slane %v566_v63, 4  ;;  %v571_v16 = vrot.slane %v569_v4, 5 }
  0xc1   : > { %6716 = vrot.lane.b32.xlu1 %v6715_v50, %s7219_s30  ;;  %v2455_v20 = vsel %vm7272_vm2, %v2453_v12, %v2454_v61  ;;  %v577_v22 = vrot.slane %v575_v5, 5  ;;  %v581_v23 = vrot.slane %v579_v6, 4  ;;  %v585_v24 = vshll.u32 %v348_v2, 16  ;;  %v7749_v5 = vpop.permute.xlu0 %6501  ;;  %v6000_v12 = vld [vmem:[%s7270_s22] sm:$0xff]  }
  0xc2   : > { %v6710_v30 = vpack.i.bf16 %v2126_v17, %v2125_v10  ;;  %v2559_v31 = vunpack.c.l.bf16 %v2455_v20  ;;  %v572_v32 = vor.u32 %v571_v16, %v568_v14  ;;  %v6444_v9 = vunpack.i.h.bf16 %v7641_v47  ;;  %v5806_v16 = vld [vmem:[%s7270_s22 + $0x6c] sm:$0xf]  ;;  %v5807_v20 = vld [vmem:[%s7270_s22 + $0x70] sm:$0xf] }
  0xc3   : > { %v582_v34 = vor.u32 %v581_v23, %v577_v22  ;;  %v587_v38 = vrot.slane %v585_v24, 5  ;;  %v6443_v39 = vunpack.i.l.bf16 %v7641_v47  ;;  %v6449_v40 = vunpack.i.h.bf16 %v7634_v29  ;;  %v5808_v23 = vld [vmem:[%s7270_s22 + $0x74] sm:$0x1]  ;;  %v5625_v24 = vld [vmem:[%s7270_s22 + $0x6c] sm:$0xff]  }
  0xc4   : > { %6711 = vrot.lane.b32.xlu0 %v6710_v30, %s7216_s27  ;;  %v6725_v44 = vpack.i.bf16 %v2559_v31, %v2558_v13  ;;  %v573_v46 = vrot.slane %v572_v32, 4  ;;  %v6448_v49 = vunpack.i.l.bf16 %v7634_v29  ;;  %v2787_v50 = vunpack.c.l.bf16 %v5767_v26 }
  0xc5   : > { %v583_v55 = vrot.slane %v582_v34, 4  ;;  %v2788_v57 = vunpack.c.h.bf16 %v5767_v26  ;;  %v5601_v37 = vrot.slane %v1006_v27, 9  ;;  %v1139_v61 = vrot.slane %v1007_v33, 5  ;;  %v7765_v27 = vpop.permute.xlu1 %6506 }
  0xc6   : > { %6726 = vrot.lane.b32.xlu1 %v6725_v44, %s7215_s26  ;;  %v578_v63 = vsel %vm7315_vm5, %v573_v46, %v577_v22  ;;  %v1142_v1 = vrot.slane %v1008_v42, 5  ;;  %v6459_v2 = vunpack.i.h.bf16 %v7662_v19  ;;  %v6458_v4 = vunpack.i.l.bf16 %v7662_v19 }
  0xc7   : > { %v588_v6 = vsel %vm7315_vm5, %v583_v55, %v587_v38  ;;  %v805_v8 = vunpack.c.l.bf16 %v578_v63  ;;  %v6735_v10 = vpack.i.bf16 %v2788_v57, %v2787_v50  ;;  %v1140_v11 = vsel %vm7272_vm2, %v5601_v37, %v1139_v61 }
  0xc8   : > { %v806_v17 = vunpack.c.l.bf16 %v588_v6  ;;  %v1141_v13 = vrot.slane %v1139_v61, 4  ;;  %v1241_v14 = vunpack.c.l.bf16 %v1140_v11  ;;  %v6454_v22 = vunpack.i.h.bf16 %v7651_v59  ;;  %v7769_v57 = vpop.permute.xlu0 %6511 }
  0xc9   : > { %v6453_v31 = vunpack.i.l.bf16 %v7651_v59  ;;  %v6001_v32 = vunpack.c.l.bf16 %v6000_v12  ;;  %v6002_v34 = vunpack.c.h.bf16 %v6000_v12  ;;  %v3183_v38 = vshrl.u32 %v5806_v16, 16 }
  0xca   : > { %v6720_v26 = vpack.i.bf16 %v806_v17, %v805_v8  ;;  %6736 = vrot.lane.b32.xlu1 %v6735_v10, %s7213_s24  ;;  %v1143_v30 = vsel %vm7272_vm2, %v1141_v13, %v1142_v1  ;;  %v3186_v42 = vshll.u32 %v5806_v16, 16  ;;  %v3192_v44 = vshll.u32 %v5807_v20, 16  ;;  %v227_v10 = vld [vmem:[%s7270_s22 + $0xc] sm:$0xff]   ;;  %v7797_v16 = vpop.permute.xlu1 %6516 }
  0xcb   : > { %v1242_v33 = vunpack.c.l.bf16 %v1143_v30  ;;  %290 = vst.msk [vmem:[#allocation2] sm:$0xff] %vm289_vm6, %v6001_v32  ;;  %v3196_v46 = vshrl.u32 %v5807_v20, 16  ;;  %v3202_v50 = vshll.u32 %v5808_v23, 16  ;;  %v1470_v55 = vunpack.c.l.bf16 %v5625_v24  ;;  %291 = vst.msk [vmem:[#allocation2 + $0x8] sm:$0xff] %vm289_vm6, %v6002_v34  ;;  %v5855_v17 = vld [vmem:[%s7270_s22 + $0x70] sm:$0xf] }
  0xcc   : > { %6721 = vrot.lane.b32.xlu0 %v6720_v26, %s7217_s28  ;;  %950 = vst.msk [vmem:[#allocation2] sm:$0xff] %vm949_vm7, %v6453_v31  ;;  %v3185_v59 = vrot.slane %v3183_v38, 4  ;;  %v3188_v61 = vrot.slane %v3186_v42, 5  ;;  %v1471_v63 = vunpack.c.h.bf16 %v5625_v24  ;;  %951 = vst.msk [vmem:[#allocation2 + $0x8] sm:$0xff] %vm949_vm7, %v6454_v22  ;;  %v3194_v1 = vrot.slane %v3192_v44, 5 }
  0xcd   : > { %v6730_v37 = vpack.i.bf16 %v1242_v33, %v1241_v14  ;;  %1386 = vst.msk [vmem:[#allocation2] sm:$0xff] %vm1385_vm8, %v6438_v53  ;;  %v3198_v6 = vrot.slane %v3196_v46, 4  ;;  %v3204_v8 = vrot.slane %v3202_v50, 5  ;;  %1387 = vst.msk [vmem:[#allocation2 + $0x8] sm:$0xff] %vm1385_vm8, %v6439_v48  ;;  %v5854_v53 = vld [vmem:[%s7270_s22 + $0x6c] sm:$0xe]  ;;  %v6469_v48 = vunpack.i.h.bf16 %v7683_v54 }
  0xce   : > { %1615 = vst.msk [vmem:[#allocation2] sm:$0xff] %vm1614_vm9, %v6423_v51  ;;  %v3189_v11 = vor.u32 %v3188_v61, %v3185_v59  ;;  %v6740_v12 = vpack.i.bf16 %v1471_v63, %v1470_v55  ;;  %1616 = vst.msk [vmem:[#allocation2 + $0x8] sm:$0xff] %vm1614_vm9, %v6424_v43  ;;  %v6468_v13 = vunpack.i.l.bf16 %v7683_v54  ;;  %v5856_v51 = vld [vmem:[%s7270_s22 + $0x74] sm:$0x1]  ;;  %v5665_v14 = vld [vmem:[%s7270_s22 + $0x6c] sm:$0xf]  ;;  %v6464_v45 = vunpack.i.h.bf16 %v7670_v21  ;;  %v7847_v29 = vpop.permute.xlu1 %6526 }
  0xcf   : > { %v3199_v56 = vor.u32 %v3198_v6, %v3194_v1  ;;  %2272 = vst.msk [vmem:[#allocation2] sm:$0xff] %vm2271_vm10, %v6458_v4  ;;  %2273 = vst.msk [vmem:[#allocation2 + $0x8] sm:$0xff] %vm2271_vm10, %v6459_v2  ;;  %v6463_v43 = vunpack.i.l.bf16 %v7670_v21  ;;  %v259_v54 = vunpack.c.l.bf16 %v227_v10  ;;  %v260_v19 = vunpack.c.h.bf16 %v227_v10  ;;  %v5666_v23 = vld [vmem:[%s7270_s22 + $0x70] sm:$0xf]  ;;  %v5667_v21 = vld [vmem:[%s7270_s22 + $0x74] sm:$0x1] }
  0xd0   : > { %6731 = vrot.lane.b32.xlu0 %v6730_v37, %s7214_s25  ;;  %v3190_v20 = vrot.slane %v3189_v11, 4  ;;  %2705 = vst.msk [vmem:[#allocation2] sm:$0xff] %vm2704_vm11, %v6443_v39  ;;  %2706 = vst.msk [vmem:[#allocation2 + $0x8] sm:$0xff] %vm2704_vm11, %v6444_v9  ;;  %v5888_v2 = vrot.slane %v5854_v53, 9  ;;  %v3770_v22 = vrot.slane %v5855_v17, 5  ;;  %v7814_v39 = vpop.permute.xlu0 %6521  ;;  %v3773_v47 = vrot.slane %v5856_v51, 5 }
  0xd1   : > { %v3200_v4 = vrot.slane %v3199_v56, 4  ;;  %2934 = vst.msk [vmem:[#allocation2] sm:$0xff] %vm2933_vm12, %v6428_v36  ;;  %2935 = vst.msk [vmem:[#allocation2 + $0x8] sm:$0xff] %vm2933_vm12, %v6429_v35  ;;  %v1888_v36 = vshrl.u32 %v5665_v14, 16  ;;  %v1891_v9 = vshll.u32 %v5665_v14, 16  ;;  %v1897_v42 = vshll.u32 %v5666_v23, 16 }
  0xd2   : > { %v3195_v24 = vsel %vm7315_vm5, %v3190_v20, %v3194_v1  ;;  %3591 = vst.msk [vmem:[#allocation2] sm:$0xff] %vm3590_vm13, %v6468_v13  ;;  %3592 = vst.msk [vmem:[#allocation2 + $0x8] sm:$0xff] %vm3590_vm13, %v6469_v48  ;;  %v3771_v15 = vsel %vm7272_vm2, %v5888_v2, %v3770_v22  ;;  %v3772_v35 = vrot.slane %v3770_v22, 4  ;;  %v1901_v44 = vshrl.u32 %v5666_v23, 16  ;;  %v4088_v46 = vld [vmem:[%s9447_s1] sm:$0xff]  ;;  %v4089_v55 = vld [vmem:[%s9447_s1 + $0x8] sm:$0xff] }
  0xd3   : > { %292 = vst.msk [vmem:[#allocation2 + $0x10] sm:$0xff] %vm289_vm6, %v259_v54  ;;  %v3205_v26 = vsel %vm7315_vm5, %v3200_v4, %v3204_v8  ;;  %v3444_v30 = vunpack.c.l.bf16 %v3195_v24  ;;  %293 = vst.msk [vmem:[#allocation2 + $0x18] sm:$0xff] %vm289_vm6, %v260_v19  ;;  %v3877_v32 = vunpack.c.l.bf16 %v3771_v15  ;;  %v1890_v33 = vrot.slane %v1888_v36, 4  ;;  %v5713_v37 = vld [vmem:[%s7270_s22 + $0x6c] sm:$0xe]  ;;  %v6114_v10 = vld [vmem:[%s7270_s22 + $0x78] sm:$0xff]   ;;  %v7874_v19 = vpop.permute.xlu1 %6536 }
  0xd4   : > { %6741 = vrot.lane.b32.xlu0 %v6740_v12, %s7212_s23  ;;  %952 = vst.msk [vmem:[#allocation2 + $0x10] sm:$0xff] %vm949_vm7, %v6463_v43  ;;  %v3445_v31 = vunpack.c.l.bf16 %v3205_v26  ;;  %953 = vst.msk [vmem:[#allocation2 + $0x18] sm:$0xff] %vm949_vm7, %v6464_v45  ;;  %v1893_v34 = vrot.slane %v1891_v9, 5  ;;  %v3774_v38 = vsel %vm7272_vm2, %v3772_v35, %v3773_v47  ;;  %v5714_v59 = vld [vmem:[%s7270_s22 + $0x70] sm:$0xf]  ;;  %v1899_v61 = vrot.slane %v1897_v42, 5  ;;  %v7860_v11 = vpop.permute.xlu0 %6531 }
  0xd5   : > { %1388 = vst.msk [vmem:[#allocation2 + $0x10] sm:$0xff] %vm1385_vm8, %v6448_v49  ;;  %1389 = vst.msk [vmem:[#allocation2 + $0x18] sm:$0xff] %vm1385_vm8, %v6449_v40  ;;  %v1907_v49 = vshll.u32 %v5667_v21, 16  ;;  %v1903_v63 = vrot.slane %v1901_v44, 4  ;;  %v6479_v6 = vunpack.i.h.bf16 %v7700_v28  ;;  %v5715_v8 = vld [vmem:[%s7270_s22 + $0x74] sm:$0x1]  ;;  %v6478_v12 = vunpack.i.l.bf16 %v7700_v28 }
  0xd6   : > { %1617 = vst.msk [vmem:[#allocation2 + $0x10] sm:$0xff] %vm1614_vm9, %v6433_v60  ;;  %v6745_v50 = vpack.i.bf16 %v3445_v31, %v3444_v30  ;;  %1618 = vst.msk [vmem:[#allocation2 + $0x18] sm:$0xff] %vm1614_vm9, %v6434_v58  ;;  %v3878_v60 = vunpack.c.l.bf16 %v3774_v38  ;;  %v1894_v40 = vor.u32 %v1893_v34, %v1890_v33  ;;  %v6474_v53 = vunpack.i.h.bf16 %v7690_v3  ;;  %v6095_v4 = vld [vmem:[%s7270_s22 + $0x18] sm:$0xff]   ;;  %v4090_v47 = vld [vmem:[%s9447_s1 + $0x10] sm:$0xff] }
  0xd7   : > { %v1909_v1 = vrot.slane %v1907_v49, 5  ;;  %v1904_v17 = vor.u32 %v1903_v63, %v1899_v61  ;;  %4025 = vst.msk [vmem:[#allocation2 + $0x8] sm:$0xff] %vm4023_vm14, %v6479_v6  ;;  %v6473_v56 = vunpack.i.l.bf16 %v7690_v3  ;;  %v6330_v48 = vpack.c.bf16 %v4089_v55, %v4088_v46  ;;  %4024 = vst.msk [vmem:[#allocation2] sm:$0xff] %vm4023_vm14, %v6478_v12  ;;  %v4091_v21 = vld [vmem:[%s9447_s1 + $0x18] sm:$0xff]  ;;  %v5811_v35 = vld [vmem:[%s7270_s22 + $0x80] sm:$0x1] }
  0xd8   : > { %6746 = vrot.lane.b32.xlu1 %v6745_v50, %s7218_s29  ;;  %v6755_v25 = vpack.i.bf16 %v3878_v60, %v3877_v32  ;;  %v1895_v58 = vrot.slane %v1894_v40, 4  ;;  %v5745_v13 = vrot.slane %v5713_v37, 9  ;;  %2275 = vst.msk [vmem:[#allocation2 + $0x18] sm:$0xff] %vm2271_vm10, %v6474_v53  ;;  %v2458_v14 = vrot.slane %v5714_v59, 5  ;;  %v5809_v36 = vld [vmem:[%s7270_s22 + $0x78] sm:$0xf]  ;;  %v7896_v31 = vpop.permute.xlu0 %6541 }
  0xd9   : > { %v2461_v20 = vrot.slane %v5715_v8, 5  ;;  %v6081_v28 = vunpack.c.l.bf16 %v6114_v10  ;;  %v1905_v45 = vrot.slane %v1904_v17, 4  ;;  %2274 = vst.msk [vmem:[#allocation2 + $0x10] sm:$0xff] %vm2271_vm10, %v6473_v56  ;;  %6331 = vmatprep.subr.bf16.mxu0 %v6330_v48  ;;  %v6082_v54 = vunpack.c.h.bf16 %v6114_v10  ;;  %v5810_v15 = vld [vmem:[%s7270_s22 + $0x7c] sm:$0xf]  ;;  %v7910_v8 = vpop.permute.xlu1 %6546 }
  0xda   : > { %v1900_v51 = vsel %vm7315_vm5, %v1895_v58, %v1899_v61  ;;  %v6489_v3 = vunpack.i.h.bf16 %v7722_v7  ;;  %6333 = vmatpush3.bf16.msra.mxu0 %v6330_v48  ;;  %v2459_v2 = vsel %vm7272_vm2, %v5745_v13, %v2458_v14  ;;  %v2460_v22 = vrot.slane %v2458_v14, 4  ;;  %v5857_v42 = vld [vmem:[%s7270_s22 + $0x78] sm:$0xe]  ;;  %v5858_v60 = vld [vmem:[%s7270_s22 + $0x7c] sm:$0xf] }
  0xdb   : > { %v2127_v43 = vunpack.c.l.bf16 %v1900_v51  ;;  %v6488_v23 = vunpack.i.l.bf16 %v7722_v7  ;;  %v6484_v24 = vunpack.i.h.bf16 %v7711_v41  ;;  %v1910_v9 = vsel %vm7315_vm5, %v1905_v45, %v1909_v1  ;;  %v5859_v59 = vld [vmem:[%s7270_s22 + $0x80] sm:$0x1]  ;;  %v349_v51 = vld [vmem:[%s7270_s22 + $0x6c] sm:$0xf] }
  0xdc   : > { %6756 = vrot.lane.b32.xlu1 %v6755_v25, %s7219_s30  ;;  %v2560_v26 = vunpack.c.l.bf16 %v2459_v2  ;;  %v7890_v30 = vpack.i.bf16 %v6082_v54, %v6081_v28  ;;  %2708 = vst.msk [vmem:[#allocation2 + $0x18] sm:$0xff] %vm2704_vm11, %v6489_v3  ;;  %v6483_v7 = vunpack.i.l.bf16 %v7711_v41  ;;  %v2128_v32 = vunpack.c.l.bf16 %v1910_v9  ;;  %v4092_v13 = vld [vmem:[%s9447_s1 + $0x20] sm:$0xf]  ;;  %v7919_v14 = vpop.permute.xlu0 %6551  ;;  %v350_v54 = vld [vmem:[%s7270_s22 + $0x70] sm:$0xf] }
  0xdd   : > { %v2462_v33 = vsel %vm7272_vm2, %v2460_v22, %v2461_v20  ;;  %2707 = vst.msk [vmem:[#allocation2 + $0x10] sm:$0xff] %vm2704_vm11, %v6488_v23  ;;  %v6005_v34 = vunpack.c.l.bf16 %v6095_v4  ;;  %v6006_v38 = vunpack.c.h.bf16 %v6095_v4  ;;  %v6334_v49 = vpack.c.bf16 %v4091_v21, %v4090_v47 }
  0xde   : > { %v2561_v44 = vunpack.c.l.bf16 %v2462_v33  ;;  %v3207_v46 = vshrl.u32 %v5809_v36, 16  ;;  %v3210_v50 = vshll.u32 %v5809_v36, 16  ;;  %v6750_v41 = vpack.i.bf16 %v2128_v32, %v2127_v43 }
  0xdf   : > { %294 = vst.msk [vmem:[#allocation2 + $0x20] sm:$0xff] %vm289_vm6, %v6005_v34  ;;  %295 = vst.msk [vmem:[#allocation2 + $0x28] sm:$0xff] %vm289_vm6, %v6006_v38  ;;  %v3216_v40 = vshll.u32 %v5810_v15, 16  ;;  %v3220_v55 = vshrl.u32 %v5810_v15, 16  ;;  %v3226_v37 = vshll.u32 %v5811_v35, 16  ;;  %6335 = vmatprep.subr.bf16.mxu0 %v6334_v49  ;;  %v5889_v6 = vrot.slane %v5857_v42, 9 }
  0xe0   : > { %6766 = vrot.lane.b32.xlu1 %v7890_v30, %s7213_s24  ;;  %v6760_v61 = vpack.i.bf16 %v2561_v44, %v2560_v26  ;;  %954 = vst.msk [vmem:[#allocation2 + $0x20] sm:$0xff] %vm949_vm7, %v6483_v7  ;;  %955 = vst.msk [vmem:[#allocation2 + $0x28] sm:$0xff] %vm949_vm7, %v6484_v24  ;;  %v3209_v63 = vrot.slane %v3207_v46, 4  ;;  %v3212_v1 = vrot.slane %v3210_v50, 5  ;;  %6751 = vrot.lane.b32.xlu0 %v6750_v41, %s7216_s27  ;;  %v3777_v12 = vrot.slane %v5858_v60, 5  ;;  %v7939_v7 = vpop.permute.xlu1 %6556  ;;  %v4056_v34 = vld [vmem:[#allocation2] sm:$0xff] }
  0xe1   : > { %6337 = vmatpush3.bf16.msra.mxu0 %v6334_v49  ;;  %v3218_v10 = vrot.slane %v3216_v40, 5  ;;  %v3222_v25 = vrot.slane %v3220_v55, 4  ;;  %v3228_v58 = vrot.slane %v3226_v37, 5  ;;  %v3780_v17 = vrot.slane %v5859_v59, 5  ;;  %v1009_v26 = vld [vmem:[%s7270_s22 + $0x6c] sm:$0xe]  ;;  %6232 = vmatprep.mubr.msk.f32.mxu0 %vm4093_vm0, %v4056_v34 }
  0xe2   : > { %v3213_v53 = vor.u32 %v3212_v1, %v3209_v63  ;;  %v6499_v56 = vunpack.i.h.bf16 %v7742_v52  ;;  %v6498_v48 = vunpack.i.l.bf16 %v7742_v52  ;;  %v3778_v28 = vsel %vm7272_vm2, %v5889_v6, %v3777_v12  ;;  %6230 = vmatprep.subr.msk.mxu0 %vm4190_vm15, %v4092_v13  ;;  %v1010_v38 = vld [vmem:[%s7270_s22 + $0x70] sm:$0xf]  ;;  %v1011_v50 = vld [vmem:[%s7270_s22 + $0x74] sm:$0x1]  ;;  %v4057_v60 = vld [vmem:[#allocation2 + $0x8] sm:$0xff] }
  0xe3   : > { %v3223_v20 = vor.u32 %v3222_v25, %v3218_v10  ;;  %v3779_v45 = vrot.slane %v3777_v12, 4  ;;  %v6494_v43 = vunpack.i.h.bf16 %v7728_v18  ;;  %v3879_v4 = vunpack.c.l.bf16 %v3778_v28  ;;  %v5668_v12 = vld [vmem:[%s7270_s22 + $0x78] sm:$0xf]  ;;  %v5771_v34 = vld [vmem:[%s7270_s22 + $0x84] sm:$0xff]  }
  0xe4   : > { %v3214_v3 = vrot.slane %v3213_v53, 4  ;;  %2936 = vst.msk [vmem:[#allocation2 + $0x10] sm:$0xff] %vm2933_vm12, %v6498_v48  ;;  %2937 = vst.msk [vmem:[#allocation2 + $0x18] sm:$0xff] %vm2933_vm12, %v6499_v56  ;;  %v6493_v52 = vunpack.i.l.bf16 %v7728_v18  ;;  %6761 = vrot.lane.b32.xlu0 %v6760_v61, %s7215_s26  ;;  %v590_v23 = vshrl.u32 %v349_v51, 16  ;;  %v593_v24 = vshll.u32 %v349_v51, 16 }
  0xe5   : > { %v3224_v2 = vrot.slane %v3223_v20, 4  ;;  %v3781_v22 = vsel %vm7272_vm2, %v3779_v45, %v3780_v17  ;;  %1391 = vst.msk [vmem:[#allocation2 + $0x28] sm:$0xff] %vm1385_vm8, %v6494_v43  ;;  %6231 = vmatpush3.msk.msra.mxu0 %vm4190_vm15, %v4092_v13  ;;  %v351_v18 = vld [vmem:[%s7270_s22 + $0x74] sm:$0x1]  ;;  %v599_v36 = vshll.u32 %v350_v54, 16  ;;  %v603_v9 = vshrl.u32 %v350_v54, 16  ;;  %v7945_v41 = vpop.permute.xlu0 %6561  ;;  %v7960_v13 = vpop.permute.xlu1 %6566 }
  0xe6   : > { %v3219_v47 = vsel %vm7315_vm5, %v3214_v3, %v3218_v10  ;;  %v3880_v21 = vunpack.c.l.bf16 %v3781_v22  ;;  %1390 = vst.msk [vmem:[#allocation2 + $0x20] sm:$0xff] %vm1385_vm8, %v6493_v52  ;;  %v592_v32 = vrot.slane %v590_v23, 4  ;;  %v595_v33 = vrot.slane %v593_v24, 5  ;;  %6233 = vmatmul.mubr.msk.f32.vlgmr.msra.gmra.mrb[0].mxu0 %vm4093_vm0, %v4057_v60  ;;  %v5669_v48 = vld [vmem:[%s7270_s22 + $0x7c] sm:$0xf] }
  0xe7   : > { %v3229_v15 = vsel %vm7315_vm5, %v3224_v2, %v3228_v58  ;;  %v3446_v35 = vunpack.c.l.bf16 %v3219_v47  ;;  %v601_v49 = vrot.slane %v599_v36, 5  ;;  %v605_v46 = vrot.slane %v603_v9, 4  ;;  %v5670_v43 = vld [vmem:[%s7270_s22 + $0x80] sm:$0x1]  ;;  %v5716_v24 = vld [vmem:[%s7270_s22 + $0x78] sm:$0xe] }
  0xe8   : > { %v3447_v42 = vunpack.c.l.bf16 %v3229_v15  ;;  %v6775_v44 = vpack.i.bf16 %v3880_v21, %v3879_v4  ;;  %v596_v40 = vor.u32 %v595_v33, %v592_v32  ;;  %v609_v55 = vshll.u32 %v351_v18, 16  ;;  %v5717_v47 = vld [vmem:[%s7270_s22 + $0x7c] sm:$0xf] }
  0xe9   : > { %v6509_v37 = vunpack.i.h.bf16 %v7765_v27  ;;  %v606_v61 = vor.u32 %v605_v46, %v601_v49  ;;  %v6508_v63 = vunpack.i.l.bf16 %v7765_v27  ;;  %v5602_v1 = vrot.slane %v1009_v26, 9  ;;  %v7973_v52 = vpop.permute.xlu0 %6571  ;;  %v5718_v26 = vld [vmem:[%s7270_s22 + $0x80] sm:$0x1]  ;;  %v7984_v46 = vpop.permute.xlu1 %6576 }
  0xea   : > { %v6770_v59 = vpack.i.bf16 %v3447_v42, %v3446_v35  ;;  %6776 = vrot.lane.b32.xlu1 %v6775_v44, %s7219_s30  ;;  %v597_v6 = vrot.slane %v596_v40, 4  ;;  %v611_v10 = vrot.slane %v609_v55, 5  ;;  %v1146_v25 = vrot.slane %v1010_v38, 5 }
  0xeb   : > { %3594 = vst.msk [vmem:[#allocation2 + $0x18] sm:$0xff] %vm3590_vm13, %v6509_v37  ;;  %v1149_v58 = vrot.slane %v1011_v50, 5  ;;  %v607_v53 = vrot.slane %v606_v61, 4  ;;  %3593 = vst.msk [vmem:[#allocation2 + $0x10] sm:$0xff] %vm3590_vm13, %v6508_v63  ;;  %v6504_v17 = vunpack.i.h.bf16 %v7749_v5  ;;  %v6503_v27 = vunpack.i.l.bf16 %v7749_v5  ;;  %v231_v63 = vld [vmem:[%s7270_s22 + $0x24] sm:$0xff]  }
  0xec   : > { %6771 = vrot.lane.b32.xlu0 %v6770_v59, %s7218_s29  ;;  %v6519_v56 = vunpack.i.h.bf16 %v7797_v16  ;;  %v602_v51 = vsel %vm7315_vm5, %v597_v6, %v601_v49  ;;  %v1147_v20 = vsel %vm7272_vm2, %v5602_v1, %v1146_v25  ;;  %v1148_v28 = vrot.slane %v1146_v25, 4 }
  0xed   : > { %v6518_v45 = vunpack.i.l.bf16 %v7797_v16  ;;  %v612_v5 = vsel %vm7315_vm5, %v607_v53, %v611_v10  ;;  %v807_v54 = vunpack.c.l.bf16 %v602_v51  ;;  %v1243_v3 = vunpack.c.l.bf16 %v1147_v20  ;;  %1619 = vst.msk [vmem:[#allocation2 + $0x20] sm:$0xff] %vm1614_vm9, %v6503_v27  ;;  %1620 = vst.msk [vmem:[#allocation2 + $0x28] sm:$0xff] %vm1614_vm9, %v6504_v17  ;;  %v7993_v1 = vpop.permute.xlu0 %6581 }
  0xee   : > { %4027 = vst.msk [vmem:[#allocation2 + $0x18] sm:$0xff] %vm4023_vm14, %v6519_v56  ;;  %v1912_v4 = vshrl.u32 %v5668_v12, 16  ;;  %v808_v2 = vunpack.c.l.bf16 %v612_v5  ;;  %v1150_v16 = vsel %vm7272_vm2, %v1148_v28, %v1149_v58  ;;  %v1915_v22 = vshll.u32 %v5668_v12, 16  ;;  %v5812_v56 = vld [vmem:[%s7270_s22 + $0x84] sm:$0xf] }
  0xef   : > { %4026 = vst.msk [vmem:[#allocation2 + $0x10] sm:$0xff] %vm4023_vm14, %v6518_v45  ;;  %v1921_v23 = vshll.u32 %v5669_v48, 16  ;;  %v1244_v21 = vunpack.c.l.bf16 %v1150_v16  ;;  %v1925_v36 = vshrl.u32 %v5669_v48, 16  ;;  %v1931_v9 = vshll.u32 %v5670_v43, 16  ;;  %v5813_v48 = vld [vmem:[%s7270_s22 + $0x88] sm:$0xf] }
  0xf0   : > { %v1914_v18 = vrot.slane %v1912_v4, 4  ;;  %v6780_v15 = vpack.i.bf16 %v808_v2, %v807_v54  ;;  %v1917_v35 = vrot.slane %v1915_v22, 5  ;;  %v6514_v33 = vunpack.i.h.bf16 %v7769_v57  ;;  %v5814_v5 = vld [vmem:[%s7270_s22 + $0x8c] sm:$0x1] }
  0xf1   : > { %v1923_v32 = vrot.slane %v1921_v23, 5  ;;  %v6785_v38 = vpack.i.bf16 %v1244_v21, %v1243_v3  ;;  %v1927_v42 = vrot.slane %v1925_v36, 4  ;;  %v1933_v44 = vrot.slane %v1931_v9, 5  ;;  %v5861_v9 = vld [vmem:[%s7270_s22 + $0x88] sm:$0xf] }
  0xf2   : > { %v6513_v49 = vunpack.i.l.bf16 %v7769_v57  ;;  %6781 = vrot.lane.b32.xlu0 %v6780_v15, %s7217_s28  ;;  %v1918_v50 = vor.u32 %v1917_v35, %v1914_v18  ;;  %2277 = vst.msk [vmem:[#allocation2 + $0x28] sm:$0xff] %vm2271_vm10, %v6514_v33  ;;  %v5746_v60 = vrot.slane %v5716_v24, 9  ;;  %v2465_v40 = vrot.slane %v5717_v47, 5  ;;  %v5860_v24 = vld [vmem:[%s7270_s22 + $0x84] sm:$0xe] }
  0xf3   : > { %v2468_v55 = vrot.slane %v5718_v26, 5  ;;  %6786 = vrot.lane.b32.xlu1 %v6785_v38, %s7214_s25  ;;  %v1928_v37 = vor.u32 %v1927_v42, %v1923_v32  ;;  %v6529_v59 = vunpack.i.h.bf16 %v7847_v29  ;;  %v6528_v57 = vunpack.i.l.bf16 %v7847_v29  ;;  %v5862_v26 = vld [vmem:[%s7270_s22 + $0x8c] sm:$0x1]  ;;  %v352_v38 = vld [vmem:[%s7270_s22 + $0x78] sm:$0xf] }
  0xf4   : > { %2276 = vst.msk [vmem:[#allocation2 + $0x20] sm:$0xff] %vm2271_vm10, %v6513_v49  ;;  %v2791_v61 = vunpack.c.l.bf16 %v5771_v34  ;;  %v1919_v6 = vrot.slane %v1918_v50, 4  ;;  %v2466_v10 = vsel %vm7272_vm2, %v5746_v60, %v2465_v40  ;;  %v2467_v25 = vrot.slane %v2465_v40, 4  ;;  %v353_v60 = vld [vmem:[%s7270_s22 + $0x7c] sm:$0xf] }
  0xf5   : > { %v2792_v58 = vunpack.c.h.bf16 %v5771_v34  ;;  %v4059_v12 = vld [vmem:[#allocation2 + $0x18] sm:$0xff]  ;;  %v1929_v53 = vrot.slane %v1928_v37, 4  ;;  %v2562_v17 = vunpack.c.l.bf16 %v2466_v10  ;;  %2709 = vst.msk [vmem:[#allocation2 + $0x20] sm:$0xff] %vm2704_vm11, %v6528_v57  ;;  %2710 = vst.msk [vmem:[#allocation2 + $0x28] sm:$0xff] %vm2704_vm11, %v6529_v59  ;;  %v6524_v29 = vunpack.i.h.bf16 %v7814_v39  ;;  %v8023_v15 = vpop.permute.xlu0 %6591 }
  0xf6   : > { %v6523_v27 = vunpack.i.l.bf16 %v7814_v39  ;;  %v4058_v51 = vld [vmem:[#allocation2 + $0x10] sm:$0xff]  ;;  %6791 = vrot.lane.b32.xlu0 %v7890_v30, %s7212_s23  ;;  %v1924_v20 = vsel %vm7315_vm5, %v1919_v6, %v1923_v32  ;;  %v2469_v28 = vsel %vm7272_vm2, %v2467_v25, %v2468_v55  ;;  %v263_v43 = vunpack.c.l.bf16 %v231_v63  ;;  %v8014_v30 = vpop.permute.xlu1 %6586 }
  0xf7   : > { %v6805_v45 = vpack.i.bf16 %v2792_v58, %v2791_v61  ;;  %6235 = vmatprep.mubr.msk.f32.mxu0 %vm4093_vm0, %v4058_v51  ;;  %v1934_v39 = vsel %vm7315_vm5, %v1929_v53, %v1933_v44  ;;  %v2129_v54 = vunpack.c.l.bf16 %v1924_v20  ;;  %v2563_v3 = vunpack.c.l.bf16 %v2469_v28 }
  0xf8   : > { %v264_v4 = vunpack.c.h.bf16 %v231_v63  ;;  %6236 = vmatmul.mubr.msk.f32.gmra.mrb[2].mxu0 %vm4093_vm0, %v4059_v12  ;;  %v2130_v2 = vunpack.c.l.bf16 %v1934_v39  ;;  %296 = vst.msk [vmem:[#allocation2 + $0x30] sm:$0xff] %vm289_vm6, %v263_v43  ;;  %v3231_v16 = vshrl.u32 %v5812_v56, 16  ;;  %v3234_v22 = vshll.u32 %v5812_v56, 16  ;;  %v1012_v43 = vld [vmem:[%s7270_s22 + $0x78] sm:$0xe] }
  0xf9   : > { %v3240_v23 = vshll.u32 %v5813_v48, 16  ;;  %v6800_v47 = vpack.i.bf16 %v2563_v3, %v2562_v17  ;;  %956 = vst.msk [vmem:[#allocation2 + $0x30] sm:$0xff] %vm949_vm7, %v6523_v27  ;;  %v3244_v21 = vshrl.u32 %v5813_v48, 16  ;;  %v3250_v18 = vshll.u32 %v5814_v5, 16 }
  0xfa   : > { %297 = vst.msk [vmem:[#allocation2 + $0x38] sm:$0xff] %vm289_vm6, %v264_v4  ;;  %v6539_v36 = vunpack.i.h.bf16 %v7874_v19  ;;  %v6795_v35 = vpack.i.bf16 %v2130_v2, %v2129_v54  ;;  %v3233_v32 = vrot.slane %v3231_v16, 4  ;;  %v3236_v33 = vrot.slane %v3234_v22, 5  ;;  %v8042_v56 = vpop.permute.xlu0 %6601  ;;  %v1013_v4 = vld [vmem:[%s7270_s22 + $0x7c] sm:$0xf] }
  0xfb   : > { %957 = vst.msk [vmem:[#allocation2 + $0x38] sm:$0xff] %vm949_vm7, %v6524_v29  ;;  %v3242_v34 = vrot.slane %v3240_v23, 5  ;;  %6801 = vrot.lane.b32.xlu0 %v6800_v47, %s7215_s26  ;;  %v3246_v42 = vrot.slane %v3244_v21, 4  ;;  %v3252_v44 = vrot.slane %v3250_v18, 5  ;;  %v6538_v49 = vunpack.i.l.bf16 %v7874_v19  ;;  %v8035_v19 = vpop.permute.xlu1 %6596  ;;  %v354_v29 = vld [vmem:[%s7270_s22 + $0x80] sm:$0x1] }
  0xfc   : > { %2939 = vst.msk [vmem:[#allocation2 + $0x28] sm:$0xff] %vm2933_vm12, %v6539_v36  ;;  %v5890_v50 = vrot.slane %v5860_v24, 9  ;;  %6796 = vrot.lane.b32.xlu1 %v6795_v35, %s7216_s27  ;;  %v3237_v40 = vor.u32 %v3236_v33, %v3233_v32  ;;  %v3784_v55 = vrot.slane %v5861_v9, 5  ;;  %v3787_v37 = vrot.slane %v5862_v26, 5  ;;  %v1014_v23 = vld [vmem:[%s7270_s22 + $0x80] sm:$0x1] }
  0xfd   : > { %v6534_v59 = vunpack.i.h.bf16 %v7860_v11  ;;  %v3247_v57 = vor.u32 %v3246_v42, %v3242_v34  ;;  %2938 = vst.msk [vmem:[#allocation2 + $0x20] sm:$0xff] %vm2933_vm12, %v6538_v49  ;;  %v6533_v61 = vunpack.i.l.bf16 %v7860_v11  ;;  %v614_v63 = vshrl.u32 %v352_v38, 16  ;;  %v5629_v33 = vld [vmem:[%s7270_s22 + $0x84] sm:$0xff]  }
  0xfe   : > { %v617_v6 = vshll.u32 %v352_v38, 16  ;;  %v3238_v10 = vrot.slane %v3237_v40, 4  ;;  %v3785_v25 = vsel %vm7272_vm2, %v5890_v50, %v3784_v55  ;;  %v3786_v58 = vrot.slane %v3784_v55, 4  ;;  %v8067_v49 = vpop.permute.xlu0 %6611 }
  0xff   : > { %1393 = vst.msk [vmem:[#allocation2 + $0x38] sm:$0xff] %vm1385_vm8, %v6534_v59  ;;  %v623_v12 = vshll.u32 %v353_v60, 16  ;;  %v3248_v53 = vrot.slane %v3247_v57, 4  ;;  %v3881_v17 = vunpack.c.l.bf16 %v3785_v25  ;;  %1392 = vst.msk [vmem:[#allocation2 + $0x30] sm:$0xff] %vm1385_vm8, %v6533_v61  ;;  %v616_v11 = vrot.slane %v614_v63, 4  ;;  %v8056_v36 = vpop.permute.xlu1 %6606 }
 0x100   : > { %v619_v27 = vrot.slane %v617_v6, 5  ;;  %6806 = vrot.lane.b32.xlu1 %v6805_v45, %s7213_s24  ;;  %v3243_v48 = vsel %vm7315_vm5, %v3238_v10, %v3242_v34  ;;  %v3788_v51 = vsel %vm7272_vm2, %v3786_v58, %v3787_v37  ;;  %v627_v28 = vshrl.u32 %v353_v60, 16  ;;  %v5672_v61 = vld [vmem:[%s7270_s22 + $0x88] sm:$0xf]  ;;  %v5673_v63 = vld [vmem:[%s7270_s22 + $0x8c] sm:$0x1] }
 0x101   : > { %v625_v20 = vrot.slane %v623_v12, 5  ;;  %v3253_v5 = vsel %vm7315_vm5, %v3248_v53, %v3252_v44  ;;  %v3448_v39 = vunpack.c.l.bf16 %v3243_v48  ;;  %v3882_v54 = vunpack.c.l.bf16 %v3788_v51  ;;  %v5671_v44 = vld [vmem:[%s7270_s22 + $0x84] sm:$0xf] }
 0x102   : > { %v620_v3 = vor.u32 %v619_v27, %v616_v11  ;;  %v3449_v2 = vunpack.c.l.bf16 %v3253_v5  ;;  %v629_v16 = vrot.slane %v627_v28, 4  ;;  %v633_v45 = vshll.u32 %v354_v29, 16  ;;  %v5719_v11 = vld [vmem:[%s7270_s22 + $0x84] sm:$0xe]  ;;  %v5720_v27 = vld [vmem:[%s7270_s22 + $0x88] sm:$0xf] }
 0x103   : > { %v6549_v22 = vunpack.i.h.bf16 %v7910_v8  ;;  %v6815_v24 = vpack.i.bf16 %v3882_v54, %v3881_v17  ;;  %v6548_v21 = vunpack.i.l.bf16 %v7910_v8  ;;  %v5603_v18 = vrot.slane %v1012_v43, 9  ;;  %v8085_v48 = vpop.permute.xlu1 %6616  ;;  %v5721_v5 = vld [vmem:[%s7270_s22 + $0x8c] sm:$0x1] }
 0x104   : > { %v621_v47 = vrot.slane %v620_v3, 4  ;;  %v6810_v9 = vpack.i.bf16 %v3449_v2, %v3448_v39  ;;  %v630_v26 = vor.u32 %v629_v16, %v625_v20  ;;  %v635_v35 = vrot.slane %v633_v45, 5  ;;  %v8091_v2 = vpop.permute.xlu0 %6621 }
 0x105   : > { %3596 = vst.msk [vmem:[#allocation2 + $0x28] sm:$0xff] %vm3590_vm13, %v6549_v22  ;;  %v1153_v32 = vrot.slane %v1013_v4, 5  ;;  %6816 = vrot.lane.b32.xlu1 %v6815_v24, %s7219_s30  ;;  %3595 = vst.msk [vmem:[#allocation2 + $0x20] sm:$0xff] %vm3590_vm13, %v6548_v21  ;;  %v1156_v38 = vrot.slane %v1014_v23, 5  ;;  %v6544_v8 = vunpack.i.h.bf16 %v7896_v31  ;;  %v6543_v42 = vunpack.i.l.bf16 %v7896_v31  ;;  %v6115_v4 = vld [vmem:[%s7270_s22 + $0x90] sm:$0xff]  }
 0x106   : > { %v626_v34 = vsel %vm7315_vm5, %v621_v47, %v625_v20  ;;  %6811 = vrot.lane.b32.xlu0 %v6810_v9, %s7218_s29  ;;  %v631_v50 = vrot.slane %v630_v26, 4  ;;  %v1474_v59 = vunpack.c.l.bf16 %v5629_v33  ;;  %v1475_v31 = vunpack.c.h.bf16 %v5629_v33 }
 0x107   : > { %v809_v60 = vunpack.c.l.bf16 %v626_v34  ;;  %v1154_v40 = vsel %vm7272_vm2, %v5603_v18, %v1153_v32  ;;  %v1155_v55 = vrot.slane %v1153_v32, 4  ;;  %1621 = vst.msk [vmem:[#allocation2 + $0x30] sm:$0xff] %vm1614_vm9, %v6543_v42  ;;  %1622 = vst.msk [vmem:[#allocation2 + $0x38] sm:$0xff] %vm1614_vm9, %v6544_v8  ;;  %v6559_v57 = vunpack.i.h.bf16 %v7939_v7  ;;  %v6096_v32 = vld [vmem:[%s7270_s22 + $0x30] sm:$0xff]   ;;  %v8103_v42 = vpop.permute.xlu1 %6626 }
 0x108   : > { %v1245_v37 = vunpack.c.l.bf16 %v1154_v40  ;;  %v636_v6 = vsel %vm7315_vm5, %v631_v50, %v635_v35  ;;  %v6558_v25 = vunpack.i.l.bf16 %v7939_v7  ;;  %v1936_v58 = vshrl.u32 %v5671_v44, 16  ;;  %v5815_v40 = vld [vmem:[%s7270_s22 + $0x90] sm:$0xf] }
 0x109   : > { %v1157_v10 = vsel %vm7272_vm2, %v1155_v55, %v1156_v38  ;;  %v810_v12 = vunpack.c.l.bf16 %v636_v6  ;;  %v6830_v17 = vpack.i.bf16 %v1475_v31, %v1474_v59  ;;  %4029 = vst.msk [vmem:[#allocation2 + $0x28] sm:$0xff] %vm4023_vm14, %v6559_v57  ;;  %v1939_v29 = vshll.u32 %v5671_v44, 16  ;;  %v5816_v55 = vld [vmem:[%s7270_s22 + $0x94] sm:$0xf] }
 0x10a   : > { %v1246_v53 = vunpack.c.l.bf16 %v1157_v10  ;;  %4028 = vst.msk [vmem:[#allocation2 + $0x20] sm:$0xff] %vm4023_vm14, %v6558_v25  ;;  %v1938_v51 = vrot.slane %v1936_v58, 4  ;;  %v1945_v20 = vshll.u32 %v5672_v61, 16  ;;  %v1949_v28 = vshrl.u32 %v5672_v61, 16  ;;  %v8119_v10 = vpop.permute.xlu0 %6631 }
 0x10b   : > { %v1955_v43 = vshll.u32 %v5673_v63, 16  ;;  %v6820_v7 = vpack.i.bf16 %v810_v12, %v809_v60  ;;  %v1941_v54 = vrot.slane %v1939_v29, 5  ;;  %v6554_v3 = vunpack.i.h.bf16 %v7919_v14  ;;  %v5817_v63 = vld [vmem:[%s7270_s22 + $0x98] sm:$0x1] }
 0x10c   : > { %v6825_v39 = vpack.i.bf16 %v1246_v53, %v1245_v37  ;;  %v1947_v16 = vrot.slane %v1945_v20, 5  ;;  %v1951_v45 = vrot.slane %v1949_v28, 4  ;;  %v6553_v23 = vunpack.i.l.bf16 %v7919_v14 }
 0x10d   : > { %v1957_v22 = vrot.slane %v1955_v43, 5  ;;  %6821 = vrot.lane.b32.xlu0 %v6820_v7, %s7217_s28  ;;  %v1942_v24 = vor.u32 %v1941_v54, %v1938_v51  ;;  %2279 = vst.msk [vmem:[#allocation2 + $0x38] sm:$0xff] %vm2271_vm10, %v6554_v3  ;;  %v5747_v47 = vrot.slane %v5719_v11, 9  ;;  %v2472_v21 = vrot.slane %v5720_v27, 5  ;;  %v5863_v27 = vld [vmem:[%s7270_s22 + $0x90] sm:$0xe] }
 0x10e   : > { %6826 = vrot.lane.b32.xlu1 %v6825_v39, %s7214_s25  ;;  %v2475_v18 = vrot.slane %v5721_v5, 5  ;;  %v1952_v9 = vor.u32 %v1951_v45, %v1947_v16  ;;  %2278 = vst.msk [vmem:[#allocation2 + $0x30] sm:$0xff] %vm2271_vm10, %v6553_v23  ;;  %v6569_v26 = vunpack.i.h.bf16 %v7960_v13  ;;  %v6568_v35 = vunpack.i.l.bf16 %v7960_v13  ;;  %v5864_v5 = vld [vmem:[%s7270_s22 + $0x94] sm:$0xf]  ;;  %v5865_v7 = vld [vmem:[%s7270_s22 + $0x98] sm:$0x1]  ;;  %v8134_v45 = vpop.permute.xlu1 %6636 }
 0x10f   : > { %v6085_v14 = vunpack.c.l.bf16 %v6115_v4  ;;  %v1943_v33 = vrot.slane %v1942_v24, 4  ;;  %v2473_v34 = vsel %vm7272_vm2, %v5747_v47, %v2472_v21  ;;  %v2474_v38 = vrot.slane %v2472_v21, 4  ;;  %v356_v21 = vld [vmem:[%s7270_s22 + $0x88] sm:$0xf] }
 0x110   : > { %v6086_v8 = vunpack.c.h.bf16 %v6115_v4  ;;  %v1953_v44 = vrot.slane %v1952_v9, 4  ;;  %v2564_v50 = vunpack.c.l.bf16 %v2473_v34  ;;  %2711 = vst.msk [vmem:[#allocation2 + $0x30] sm:$0xff] %vm2704_vm11, %v6568_v35  ;;  %2712 = vst.msk [vmem:[#allocation2 + $0x38] sm:$0xff] %vm2704_vm11, %v6569_v26  ;;  %v6564_v60 = vunpack.i.h.bf16 %v7945_v41  ;;  %v4061_v37 = vld [vmem:[#allocation2 + $0x28] sm:$0xff] }
 0x111   : > { %v6563_v13 = vunpack.i.l.bf16 %v7945_v41  ;;  %6831 = vrot.lane.b32.xlu0 %v6830_v17, %s7212_s23  ;;  %v1948_v59 = vsel %vm7315_vm5, %v1943_v33, %v1947_v16  ;;  %v2476_v31 = vsel %vm7272_vm2, %v2474_v38, %v2475_v18  ;;  %v6009_v61 = vunpack.c.l.bf16 %v6096_v32  ;;  %v4060_v6 = vld [vmem:[#allocation2 + $0x20] sm:$0xff] }
 0x112   : > { %v8116_v57 = vpack.i.bf16 %v6086_v8, %v6085_v14  ;;  %v1958_v41 = vsel %vm7315_vm5, %v1953_v44, %v1957_v22  ;;  %v2131_v25 = vunpack.c.l.bf16 %v1948_v59  ;;  %v2565_v58 = vunpack.c.l.bf16 %v2476_v31  ;;  %6238 = vmatprep.mubr.msk.f32.mxu0 %vm4093_vm0, %v4060_v6  ;;  %v355_v16 = vld [vmem:[%s7270_s22 + $0x84] sm:$0xf]  ;;  %v8142_v14 = vpop.permute.xlu0 %6641  ;;  %v8158_v6 = vpop.permute.xlu1 %6646 }
 0x113   : > { %v6010_v12 = vunpack.c.h.bf16 %v6096_v32  ;;  %v2132_v53 = vunpack.c.l.bf16 %v1958_v41  ;;  %298 = vst.msk [vmem:[#allocation2 + $0x40] sm:$0xff] %vm289_vm6, %v6009_v61  ;;  %v3255_v17 = vshrl.u32 %v5815_v40, 16  ;;  %v3258_v29 = vshll.u32 %v5815_v40, 16  ;;  %6239 = vmatmul.mubr.msk.f32.gmra.mrb[4].mxu0 %vm4093_vm0, %v4061_v37  ;;  %v357_v40 = vld [vmem:[%s7270_s22 + $0x8c] sm:$0x1] }
 0x114   : > { %v3264_v11 = vshll.u32 %v5816_v55, 16  ;;  %v6840_v51 = vpack.i.bf16 %v2565_v58, %v2564_v50  ;;  %958 = vst.msk [vmem:[#allocation2 + $0x40] sm:$0xff] %vm949_vm7, %v6563_v13  ;;  %v3268_v20 = vshrl.u32 %v5816_v55, 16  ;;  %v3274_v28 = vshll.u32 %v5817_v63, 16  ;;  %v1015_v63 = vld [vmem:[%s7270_s22 + $0x84] sm:$0xe] }
 0x115   : > { %299 = vst.msk [vmem:[#allocation2 + $0x48] sm:$0xff] %vm289_vm6, %v6010_v12  ;;  %v6579_v43 = vunpack.i.h.bf16 %v7984_v46  ;;  %v6835_v39 = vpack.i.bf16 %v2132_v53, %v2131_v25  ;;  %v3257_v54 = vrot.slane %v3255_v17, 4  ;;  %v3260_v3 = vrot.slane %v3258_v29, 5  ;;  %v1016_v53 = vld [vmem:[%s7270_s22 + $0x88] sm:$0xf] }
 0x116   : > { %959 = vst.msk [vmem:[#allocation2 + $0x48] sm:$0xff] %vm949_vm7, %v6564_v60  ;;  %v3266_v4 = vrot.slane %v3264_v11, 5  ;;  %6841 = vrot.lane.b32.xlu0 %v6840_v51, %s7215_s26  ;;  %v3270_v22 = vrot.slane %v3268_v20, 4  ;;  %v3276_v23 = vrot.slane %v3274_v28, 5  ;;  %v6578_v24 = vunpack.i.l.bf16 %v7984_v46  ;;  %v1017_v51 = vld [vmem:[%s7270_s22 + $0x8c] sm:$0x1]  ;;  %v8165_v20 = vpop.permute.xlu0 %6651 }
 0x117   : > { %2941 = vst.msk [vmem:[#allocation2 + $0x38] sm:$0xff] %vm2933_vm12, %v6579_v43  ;;  %v5891_v47 = vrot.slane %v5863_v27, 9  ;;  %6836 = vrot.lane.b32.xlu1 %v6835_v39, %s7216_s27  ;;  %v3261_v18 = vor.u32 %v3260_v3, %v3257_v54  ;;  %v3791_v9 = vrot.slane %v5864_v5, 5  ;;  %v3794_v26 = vrot.slane %v5865_v7, 5 }
 0x118   : > { %v6574_v35 = vunpack.i.h.bf16 %v7973_v52  ;;  %v3271_v32 = vor.u32 %v3270_v22, %v3266_v4  ;;  %2940 = vst.msk [vmem:[#allocation2 + $0x30] sm:$0xff] %vm2933_vm12, %v6578_v24  ;;  %v6573_v33 = vunpack.i.l.bf16 %v7973_v52  ;;  %v638_v46 = vshrl.u32 %v355_v16, 16 }
 0x119   : > { %v641_v34 = vshll.u32 %v355_v16, 16  ;;  %v3262_v38 = vrot.slane %v3261_v18, 4  ;;  %v3792_v8 = vsel %vm7272_vm2, %v5891_v47, %v3791_v9  ;;  %v3793_v44 = vrot.slane %v3791_v9, 4  ;;  %v5674_v16 = vld [vmem:[%s7270_s22 + $0x90] sm:$0xf] }
 0x11a   : > { %1395 = vst.msk [vmem:[#allocation2 + $0x48] sm:$0xff] %vm1385_vm8, %v6574_v35  ;;  %v647_v50 = vshll.u32 %v356_v21, 16  ;;  %v3272_v60 = vrot.slane %v3271_v32, 4  ;;  %v3883_v13 = vunpack.c.l.bf16 %v3792_v8  ;;  %1394 = vst.msk [vmem:[#allocation2 + $0x40] sm:$0xff] %vm1385_vm8, %v6573_v33  ;;  %v640_v55 = vrot.slane %v638_v46, 4  ;;  %v8180_v35 = vpop.permute.xlu1 %6656 }
 0x11b   : > { %v643_v37 = vrot.slane %v641_v34, 5  ;;  %6846 = vrot.lane.b32.xlu1 %v8116_v57, %s7213_s24  ;;  %v3267_v52 = vsel %vm7315_vm5, %v3262_v38, %v3266_v4  ;;  %v3795_v59 = vsel %vm7272_vm2, %v3793_v44, %v3794_v26  ;;  %v651_v61 = vshrl.u32 %v356_v21, 16  ;;  %v5675_v47 = vld [vmem:[%s7270_s22 + $0x94] sm:$0xf]  ;;  %v5676_v46 = vld [vmem:[%s7270_s22 + $0x98] sm:$0x1] }
 0x11c   : > { %v649_v31 = vrot.slane %v647_v50, 5  ;;  %v3277_v41 = vsel %vm7315_vm5, %v3272_v60, %v3276_v23  ;;  %v3450_v25 = vunpack.c.l.bf16 %v3267_v52  ;;  %v3884_v58 = vunpack.c.l.bf16 %v3795_v59  ;;  %v8191_v60 = vpop.permute.xlu0 %6661  ;;  %v5723_v52 = vld [vmem:[%s7270_s22 + $0x94] sm:$0xf] }
 0x11d   : > { %v644_v12 = vor.u32 %v643_v37, %v640_v55  ;;  %v3451_v17 = vunpack.c.l.bf16 %v3277_v41  ;;  %v653_v29 = vrot.slane %v651_v61, 4  ;;  %v657_v11 = vshll.u32 %v357_v40, 16  ;;  %v5722_v37 = vld [vmem:[%s7270_s22 + $0x90] sm:$0xe]  ;;  %v5724_v41 = vld [vmem:[%s7270_s22 + $0x98] sm:$0x1] }
 0x11e   : > { %v6589_v27 = vunpack.i.h.bf16 %v8014_v30  ;;  %v6855_v28 = vpack.i.bf16 %v3884_v58, %v3883_v13  ;;  %v6588_v5 = vunpack.i.l.bf16 %v8014_v30  ;;  %v5604_v7 = vrot.slane %v1015_v63, 9 }
 0x11f   : > { %v645_v43 = vrot.slane %v644_v12, 4  ;;  %v6850_v39 = vpack.i.bf16 %v3451_v17, %v3450_v25  ;;  %v654_v54 = vor.u32 %v653_v29, %v649_v31  ;;  %v659_v3 = vrot.slane %v657_v11, 5  ;;  %v5775_v17 = vld [vmem:[%s7270_s22 + $0x9c] sm:$0xff]  }
 0x120   : > { %3598 = vst.msk [vmem:[#allocation2 + $0x38] sm:$0xff] %vm3590_vm13, %v6589_v27  ;;  %v1160_v4 = vrot.slane %v1016_v53, 5  ;;  %6856 = vrot.lane.b32.xlu1 %v6855_v28, %s7219_s30  ;;  %3597 = vst.msk [vmem:[#allocation2 + $0x30] sm:$0xff] %vm3590_vm13, %v6588_v5  ;;  %v1163_v23 = vrot.slane %v1017_v51, 5  ;;  %v6584_v24 = vunpack.i.h.bf16 %v7993_v1  ;;  %v6583_v30 = vunpack.i.l.bf16 %v7993_v1  ;;  %v8202_v28 = vpop.permute.xlu1 %6666 }
 0x121   : > { %v650_v22 = vsel %vm7315_vm5, %v645_v43, %v649_v31  ;;  %6851 = vrot.lane.b32.xlu0 %v6850_v39, %s7218_s29  ;;  %v655_v21 = vrot.slane %v654_v54, 4  ;;  %v6599_v33 = vunpack.i.h.bf16 %v8035_v19  ;;  %v6598_v1 = vunpack.i.l.bf16 %v8035_v19  ;;  %v235_v39 = vld [vmem:[%s7270_s22 + $0x3c] sm:$0xff]  }
 0x122   : > { %v811_v18 = vunpack.c.l.bf16 %v650_v22  ;;  %v1161_v9 = vsel %vm7272_vm2, %v5604_v7, %v1160_v4  ;;  %v1162_v26 = vrot.slane %v1160_v4, 4  ;;  %1623 = vst.msk [vmem:[#allocation2 + $0x40] sm:$0xff] %vm1614_vm9, %v6583_v30  ;;  %1624 = vst.msk [vmem:[#allocation2 + $0x48] sm:$0xff] %vm1614_vm9, %v6584_v24  ;;  %v1960_v34 = vshrl.u32 %v5674_v16, 16  ;;  %v8212_v22 = vpop.permute.xlu0 %6671 }
 0x123   : > { %v1247_v32 = vunpack.c.l.bf16 %v1161_v9  ;;  %v660_v38 = vsel %vm7315_vm5, %v655_v21, %v659_v3  ;;  %v1963_v44 = vshll.u32 %v5674_v16, 16  ;;  %v1969_v50 = vshll.u32 %v5675_v47, 16  ;;  %4030 = vst.msk [vmem:[#allocation2 + $0x30] sm:$0xff] %vm4023_vm14, %v6598_v1  ;;  %4031 = vst.msk [vmem:[#allocation2 + $0x38] sm:$0xff] %vm4023_vm14, %v6599_v33  ;;  %v5819_v21 = vld [vmem:[%s7270_s22 + $0xa0] sm:$0xf] }
 0x124   : > { %v1164_v8 = vsel %vm7272_vm2, %v1162_v26, %v1163_v23  ;;  %v812_v13 = vunpack.c.l.bf16 %v660_v38  ;;  %v1962_v19 = vrot.slane %v1960_v34, 4  ;;  %v1973_v55 = vshrl.u32 %v5675_v47, 16  ;;  %v5820_v33 = vld [vmem:[%s7270_s22 + $0xa4] sm:$0x1] }
 0x125   : > { %v1248_v40 = vunpack.c.l.bf16 %v1164_v8  ;;  %v1965_v59 = vrot.slane %v1963_v44, 5  ;;  %v1971_v31 = vrot.slane %v1969_v50, 5  ;;  %v1979_v61 = vshll.u32 %v5676_v46, 16 }
 0x126   : > { %v6594_v63 = vunpack.i.h.bf16 %v8023_v15  ;;  %v6860_v25 = vpack.i.bf16 %v812_v13, %v811_v18  ;;  %v1975_v12 = vrot.slane %v1973_v55, 4  ;;  %v6593_v53 = vunpack.i.l.bf16 %v8023_v15  ;;  %v5867_v55 = vld [vmem:[%s7270_s22 + $0xa0] sm:$0xf] }
 0x127   : > { %v6865_v58 = vpack.i.bf16 %v1248_v40, %v1247_v32  ;;  %v1966_v29 = vor.u32 %v1965_v59, %v1962_v19  ;;  %v1981_v11 = vrot.slane %v1979_v61, 5  ;;  %v5748_v27 = vrot.slane %v5722_v37, 9  ;;  %v5866_v19 = vld [vmem:[%s7270_s22 + $0x9c] sm:$0xe]  ;;  %v5868_v61 = vld [vmem:[%s7270_s22 + $0xa4] sm:$0x1] }
 0x128   : > { %2281 = vst.msk [vmem:[#allocation2 + $0x48] sm:$0xff] %vm2271_vm10, %v6594_v63  ;;  %v2479_v51 = vrot.slane %v5723_v52, 5  ;;  %6861 = vrot.lane.b32.xlu0 %v6860_v25, %s7217_s28  ;;  %v1976_v43 = vor.u32 %v1975_v12, %v1971_v31  ;;  %2280 = vst.msk [vmem:[#allocation2 + $0x40] sm:$0xff] %vm2271_vm10, %v6593_v53  ;;  %v2482_v5 = vrot.slane %v5724_v41, 5  ;;  %v6609_v15 = vunpack.i.h.bf16 %v8056_v36  ;;  %v358_v12 = vld [vmem:[%s7270_s22 + $0x90] sm:$0xf]  ;;  %v8241_v53 = vpop.permute.xlu0 %6681 }
 0x129   : > { %6866 = vrot.lane.b32.xlu1 %v6865_v58, %s7214_s25  ;;  %v6608_v7 = vunpack.i.l.bf16 %v8056_v36  ;;  %v1967_v54 = vrot.slane %v1966_v29, 4  ;;  %v2795_v16 = vunpack.c.l.bf16 %v5775_v17  ;;  %v2796_v30 = vunpack.c.h.bf16 %v5775_v17  ;;  %v5818_v36 = vld [vmem:[%s7270_s22 + $0x9c] sm:$0xf] }
 0x12a   : > { %v2480_v3 = vsel %vm7272_vm2, %v5748_v27, %v2479_v51  ;;  %v2481_v4 = vrot.slane %v2479_v51, 4  ;;  %v1977_v23 = vrot.slane %v1976_v43, 4  ;;  %2714 = vst.msk [vmem:[#allocation2 + $0x48] sm:$0xff] %vm2704_vm11, %v6609_v15  ;;  %v6604_v47 = vunpack.i.h.bf16 %v8042_v56  ;;  %v4062_v1 = vld [vmem:[#allocation2 + $0x30] sm:$0xff]  ;;  %v4063_v46 = vld [vmem:[#allocation2 + $0x38] sm:$0xff] }
 0x12b   : > { %v2566_v24 = vunpack.c.l.bf16 %v2480_v3  ;;  %2713 = vst.msk [vmem:[#allocation2 + $0x40] sm:$0xff] %vm2704_vm11, %v6608_v7  ;;  %v1972_v18 = vsel %vm7315_vm5, %v1967_v54, %v1971_v31  ;;  %v6603_v26 = vunpack.i.l.bf16 %v8042_v56  ;;  %v267_v32 = vunpack.c.l.bf16 %v235_v39  ;;  %6241 = vmatprep.mubr.msk.f32.mxu0 %vm4093_vm0, %v4062_v1  ;;  %v359_v7 = vld [vmem:[%s7270_s22 + $0x94] sm:$0xf]  ;;  %v1018_v1 = vld [vmem:[%s7270_s22 + $0x90] sm:$0xe] }
 0x12c   : > { %v2483_v9 = vsel %vm7272_vm2, %v2481_v4, %v2482_v5  ;;  %6871 = vrot.lane.b32.xlu0 %v8116_v57, %s7212_s23  ;;  %v1982_v34 = vsel %vm7315_vm5, %v1977_v23, %v1981_v11  ;;  %v2133_v38 = vunpack.c.l.bf16 %v1972_v18  ;;  %v6885_v44 = vpack.i.bf16 %v2796_v30, %v2795_v16  ;;  %6242 = vmatmul.mubr.msk.f32.gmra.mrb[6].mxu0 %vm4093_vm0, %v4063_v46  ;;  %v8234_v57 = vpop.permute.xlu1 %6676  ;;  %v8265_v46 = vpop.permute.xlu0 %6691 }
 0x12d   : > { %v2567_v8 = vunpack.c.l.bf16 %v2483_v9  ;;  %v2134_v50 = vunpack.c.l.bf16 %v1982_v34  ;;  %v268_v56 = vunpack.c.h.bf16 %v235_v39  ;;  %300 = vst.msk [vmem:[#allocation2 + $0x50] sm:$0xff] %vm289_vm6, %v267_v32  ;;  %v3279_v13 = vshrl.u32 %v5818_v36, 16 }
 0x12e   : > { %v3282_v40 = vshll.u32 %v5818_v36, 16  ;;  %960 = vst.msk [vmem:[#allocation2 + $0x50] sm:$0xff] %vm949_vm7, %v6603_v26  ;;  %v3288_v52 = vshll.u32 %v5819_v21, 16  ;;  %v3292_v59 = vshrl.u32 %v5819_v21, 16  ;;  %v3298_v31 = vshll.u32 %v5820_v33, 16 }
 0x12f   : > { %v6880_v37 = vpack.i.bf16 %v2567_v8, %v2566_v24  ;;  %v6875_v63 = vpack.i.bf16 %v2134_v50, %v2133_v38  ;;  %301 = vst.msk [vmem:[#allocation2 + $0x58] sm:$0xff] %vm289_vm6, %v268_v56  ;;  %v3281_v41 = vrot.slane %v3279_v13, 4  ;;  %v6619_v58 = vunpack.i.h.bf16 %v8085_v48  ;;  %v360_v21 = vld [vmem:[%s7270_s22 + $0x98] sm:$0x1] }
 0x130   : > { %v3284_v25 = vrot.slane %v3282_v40, 5  ;;  %961 = vst.msk [vmem:[#allocation2 + $0x58] sm:$0xff] %vm949_vm7, %v6604_v47  ;;  %v3290_v17 = vrot.slane %v3288_v52, 5  ;;  %v3294_v29 = vrot.slane %v3292_v59, 4  ;;  %v3300_v11 = vrot.slane %v3298_v31, 5  ;;  %v8254_v30 = vpop.permute.xlu1 %6686 }
 0x131   : > { %6881 = vrot.lane.b32.xlu0 %v6880_v37, %s7215_s26  ;;  %v6618_v27 = vunpack.i.l.bf16 %v8085_v48  ;;  %6876 = vrot.lane.b32.xlu1 %v6875_v63, %s7216_s27  ;;  %2943 = vst.msk [vmem:[#allocation2 + $0x48] sm:$0xff] %vm2933_vm12, %v6619_v58  ;;  %v5892_v43 = vrot.slane %v5866_v19, 9  ;;  %v3798_v5 = vrot.slane %v5867_v55, 5  ;;  %v3801_v15 = vrot.slane %v5868_v61, 5  ;;  %v1019_v19 = vld [vmem:[%s7270_s22 + $0x94] sm:$0xf] }
 0x132   : > { %v3285_v51 = vor.u32 %v3284_v25, %v3281_v41  ;;  %v3295_v39 = vor.u32 %v3294_v29, %v3290_v17  ;;  %v6614_v54 = vunpack.i.h.bf16 %v8067_v49  ;;  %v6613_v3 = vunpack.i.l.bf16 %v8067_v49  ;;  %v1020_v55 = vld [vmem:[%s7270_s22 + $0x98] sm:$0x1]  ;;  %v5633_v61 = vld [vmem:[%s7270_s22 + $0x9c] sm:$0xff]  }
 0x133   : > { %2942 = vst.msk [vmem:[#allocation2 + $0x40] sm:$0xff] %vm2933_vm12, %v6618_v27  ;;  %v662_v4 = vshrl.u32 %v358_v12, 16  ;;  %v3799_v48 = vsel %vm7272_vm2, %v5892_v43, %v3798_v5  ;;  %v3800_v23 = vrot.slane %v3798_v5, 4  ;;  %v665_v24 = vshll.u32 %v358_v12, 16 }
 0x134   : > { %v3286_v16 = vrot.slane %v3285_v51, 4  ;;  %v3296_v47 = vrot.slane %v3295_v39, 4  ;;  %v3885_v36 = vunpack.c.l.bf16 %v3799_v48  ;;  %1396 = vst.msk [vmem:[#allocation2 + $0x50] sm:$0xff] %vm1385_vm8, %v6613_v3  ;;  %1397 = vst.msk [vmem:[#allocation2 + $0x58] sm:$0xff] %vm1385_vm8, %v6614_v54  ;;  %v671_v9 = vshll.u32 %v359_v7, 16  ;;  %v8274_v12 = vpop.permute.xlu1 %6696 }
 0x135   : > { %v664_v18 = vrot.slane %v662_v4, 4  ;;  %6886 = vrot.lane.b32.xlu1 %v6885_v44, %s7213_s24  ;;  %v3802_v26 = vsel %vm7272_vm2, %v3800_v23, %v3801_v15  ;;  %v667_v32 = vrot.slane %v665_v24, 5  ;;  %v675_v33 = vshrl.u32 %v359_v7, 16  ;;  %v5677_v15 = vld [vmem:[%s7270_s22 + $0x9c] sm:$0xf]  ;;  %v8285_v7 = vpop.permute.xlu0 %6701 }
 0x136   : > { %v3291_v49 = vsel %vm7315_vm5, %v3286_v16, %v3290_v17  ;;  %v3301_v34 = vsel %vm7315_vm5, %v3296_v47, %v3300_v11  ;;  %v3886_v8 = vunpack.c.l.bf16 %v3802_v26  ;;  %v673_v50 = vrot.slane %v671_v9, 5  ;;  %v5678_v4 = vld [vmem:[%s7270_s22 + $0xa0] sm:$0xf]  ;;  %v5679_v16 = vld [vmem:[%s7270_s22 + $0xa4] sm:$0x1] }
 0x137   : > { %v3452_v38 = vunpack.c.l.bf16 %v3291_v49  ;;  %v3453_v44 = vunpack.c.l.bf16 %v3301_v34  ;;  %v668_v56 = vor.u32 %v667_v32, %v664_v18  ;;  %v677_v13 = vrot.slane %v675_v33, 4  ;;  %v5726_v49 = vld [vmem:[%s7270_s22 + $0xa0] sm:$0xf]  ;;  %v5725_v34 = vld [vmem:[%s7270_s22 + $0x9c] sm:$0xe] }
 0x138   : > { %v681_v40 = vshll.u32 %v360_v21, 16  ;;  %v6895_v37 = vpack.i.bf16 %v3886_v8, %v3885_v36  ;;  %v6629_v52 = vunpack.i.h.bf16 %v8103_v42  ;;  %v6628_v59 = vunpack.i.l.bf16 %v8103_v42 }
 0x139   : > { %v5605_v31 = vrot.slane %v1018_v1, 9  ;;  %v6890_v63 = vpack.i.bf16 %v3453_v44, %v3452_v38  ;;  %v669_v41 = vrot.slane %v668_v56, 4  ;;  %v678_v25 = vor.u32 %v677_v13, %v673_v50  ;;  %v8303_v38 = vpop.permute.xlu1 %6706  ;;  %v5727_v56 = vld [vmem:[%s7270_s22 + $0xa4] sm:$0x1] }
 0x13a   : > { %v683_v58 = vrot.slane %v681_v40, 5  ;;  %6896 = vrot.lane.b32.xlu1 %v6895_v37, %s7219_s30  ;;  %3599 = vst.msk [vmem:[#allocation2 + $0x40] sm:$0xff] %vm3590_vm13, %v6628_v59  ;;  %3600 = vst.msk [vmem:[#allocation2 + $0x48] sm:$0xff] %vm3590_vm13, %v6629_v52  ;;  %v1167_v17 = vrot.slane %v1019_v19, 5  ;;  %v1170_v29 = vrot.slane %v1020_v55, 5  ;;  %v6624_v42 = vunpack.i.h.bf16 %v8091_v2  ;;  %v6116_v37 = vld [vmem:[%s7270_s22 + $0xa8] sm:$0xff]   ;;  %v8308_v52 = vpop.permute.xlu0 %6711 }
 0x13b   : > { %v6623_v11 = vunpack.i.l.bf16 %v8091_v2  ;;  %6891 = vrot.lane.b32.xlu0 %v6890_v63, %s7218_s29  ;;  %v674_v27 = vsel %vm7315_vm5, %v669_v41, %v673_v50  ;;  %v679_v51 = vrot.slane %v678_v25, 4  ;;  %v1478_v43 = vunpack.c.l.bf16 %v5633_v61 }
 0x13c   : > { %v1479_v5 = vunpack.c.h.bf16 %v5633_v61  ;;  %v813_v39 = vunpack.c.l.bf16 %v674_v27  ;;  %v1168_v54 = vsel %vm7272_vm2, %v5605_v31, %v1167_v17  ;;  %v1169_v3 = vrot.slane %v1167_v17, 4  ;;  %1626 = vst.msk [vmem:[#allocation2 + $0x58] sm:$0xff] %vm1614_vm9, %v6624_v42 }
 0x13d   : > { %1625 = vst.msk [vmem:[#allocation2 + $0x50] sm:$0xff] %vm1614_vm9, %v6623_v11  ;;  %v6639_v2 = vunpack.i.h.bf16 %v8134_v45  ;;  %v684_v48 = vsel %vm7315_vm5, %v679_v51, %v683_v58  ;;  %v1249_v23 = vunpack.c.l.bf16 %v1168_v54  ;;  %v6638_v47 = vunpack.i.l.bf16 %v8134_v45  ;;  %v8324_v54 = vpop.permute.xlu1 %6716 }
 0x13e   : > { %v6910_v24 = vpack.i.bf16 %v1479_v5, %v1478_v43  ;;  %v814_v36 = vunpack.c.l.bf16 %v684_v48  ;;  %v1171_v21 = vsel %vm7272_vm2, %v1169_v3, %v1170_v29  ;;  %v1984_v18 = vshrl.u32 %v5677_v15, 16  ;;  %v6097_v29 = vld [vmem:[%s7270_s22 + $0x48] sm:$0xff]  }
 0x13f   : > { %4033 = vst.msk [vmem:[#allocation2 + $0x48] sm:$0xff] %vm4023_vm14, %v6639_v2  ;;  %v1987_v9 = vshll.u32 %v5677_v15, 16  ;;  %v1250_v26 = vunpack.c.l.bf16 %v1171_v21  ;;  %4032 = vst.msk [vmem:[#allocation2 + $0x40] sm:$0xff] %vm4023_vm14, %v6638_v47  ;;  %v1993_v32 = vshll.u32 %v5678_v4, 16  ;;  %v1997_v33 = vshrl.u32 %v5678_v4, 16 }
 0x140   : > { %v2003_v1 = vshll.u32 %v5679_v16, 16  ;;  %v6900_v45 = vpack.i.bf16 %v814_v36, %v813_v39  ;;  %v1986_v8 = vrot.slane %v1984_v18, 4  ;;  %v6634_v44 = vunpack.i.h.bf16 %v8119_v10  ;;  %v5821_v15 = vld [vmem:[%s7270_s22 + $0xa8] sm:$0xf]  ;;  %v5822_v48 = vld [vmem:[%s7270_s22 + $0xac] sm:$0xf] }
 0x141   : > { %v1989_v50 = vrot.slane %v1987_v9, 5  ;;  %v6905_v13 = vpack.i.bf16 %v1250_v26, %v1249_v23  ;;  %v1995_v40 = vrot.slane %v1993_v32, 5  ;;  %v1999_v19 = vrot.slane %v1997_v33, 4  ;;  %v5823_v23 = vld [vmem:[%s7270_s22 + $0xb0] sm:$0x1]  ;;  %v8339_v9 = vpop.permute.xlu0 %6721 }
 0x142   : > { %v2005_v55 = vrot.slane %v2003_v1, 5  ;;  %6901 = vrot.lane.b32.xlu0 %v6900_v45, %s7217_s28  ;;  %v6633_v31 = vunpack.i.l.bf16 %v8119_v10  ;;  %2283 = vst.msk [vmem:[#allocation2 + $0x58] sm:$0xff] %vm2271_vm10, %v6634_v44  ;;  %v5749_v61 = vrot.slane %v5725_v34, 9  ;;  %v2486_v63 = vrot.slane %v5726_v49, 5  ;;  %v5869_v33 = vld [vmem:[%s7270_s22 + $0xa8] sm:$0xe] }
 0x143   : > { %v1990_v59 = vor.u32 %v1989_v50, %v1986_v8  ;;  %6906 = vrot.lane.b32.xlu1 %v6905_v13, %s7214_s25  ;;  %v2000_v41 = vor.u32 %v1999_v19, %v1995_v40  ;;  %v2489_v25 = vrot.slane %v5727_v56, 5  ;;  %v6649_v58 = vunpack.i.h.bf16 %v8158_v6  ;;  %v5870_v1 = vld [vmem:[%s7270_s22 + $0xac] sm:$0xf]  ;;  %v5871_v44 = vld [vmem:[%s7270_s22 + $0xb0] sm:$0x1] }
 0x144   : > { %v6648_v17 = vunpack.i.l.bf16 %v8158_v6  ;;  %2282 = vst.msk [vmem:[#allocation2 + $0x50] sm:$0xff] %vm2271_vm10, %v6633_v31  ;;  %v2487_v10 = vsel %vm7272_vm2, %v5749_v61, %v2486_v63  ;;  %v2488_v11 = vrot.slane %v2486_v63, 4  ;;  %v6089_v27 = vunpack.c.l.bf16 %v6116_v37  ;;  %v8353_v63 = vpop.permute.xlu1 %6726 }
 0x145   : > { %v1991_v42 = vrot.slane %v1990_v59, 4  ;;  %v2001_v51 = vrot.slane %v2000_v41, 4  ;;  %v2568_v43 = vunpack.c.l.bf16 %v2487_v10  ;;  %2716 = vst.msk [vmem:[#allocation2 + $0x58] sm:$0xff] %vm2704_vm11, %v6649_v58  ;;  %v6090_v5 = vunpack.c.h.bf16 %v6116_v37 }
 0x146   : > { %2715 = vst.msk [vmem:[#allocation2 + $0x50] sm:$0xff] %vm2704_vm11, %v6648_v17  ;;  %v6644_v6 = vunpack.i.h.bf16 %v8142_v14  ;;  %v4065_v39 = vld [vmem:[#allocation2 + $0x48] sm:$0xff]  ;;  %6911 = vrot.lane.b32.xlu0 %v6910_v24, %s7212_s23  ;;  %v2490_v2 = vsel %vm7272_vm2, %v2488_v11, %v2489_v25  ;;  %v6643_v4 = vunpack.i.l.bf16 %v8142_v14  ;;  %v6013_v16 = vunpack.c.l.bf16 %v6097_v29  ;;  %v4064_v47 = vld [vmem:[#allocation2 + $0x40] sm:$0xff] }
 0x147   : > { %v1996_v3 = vsel %vm7315_vm5, %v1991_v42, %v1995_v40  ;;  %v2006_v36 = vsel %vm7315_vm5, %v2001_v51, %v2005_v55  ;;  %v2569_v18 = vunpack.c.l.bf16 %v2490_v2  ;;  %v8336_v24 = vpack.i.bf16 %v6090_v5, %v6089_v27  ;;  %6244 = vmatprep.mubr.msk.f32.mxu0 %vm4093_vm0, %v4064_v47  ;;  %v361_v55 = vld [vmem:[%s7270_s22 + $0x9c] sm:$0xf]  ;;  %v8361_v27 = vpop.permute.xlu0 %6731 }
 0x148   : > { %v2135_v21 = vunpack.c.l.bf16 %v1996_v3  ;;  %v2136_v49 = vunpack.c.l.bf16 %v2006_v36  ;;  %v6014_v14 = vunpack.c.h.bf16 %v6097_v29  ;;  %302 = vst.msk [vmem:[#allocation2 + $0x60] sm:$0xff] %vm289_vm6, %v6013_v16  ;;  %v3303_v26 = vshrl.u32 %v5821_v15, 16  ;;  %6245 = vmatmul.mubr.msk.f32.gmra.mrb[8].mxu0 %vm4093_vm0, %v4065_v39  ;;  %v362_v29 = vld [vmem:[%s7270_s22 + $0xa0] sm:$0xf]  ;;  %v363_v3 = vld [vmem:[%s7270_s22 + $0xa4] sm:$0x1] }
 0x149   : > { %v3306_v32 = vshll.u32 %v5821_v15, 16  ;;  %v6920_v34 = vpack.i.bf16 %v2569_v18, %v2568_v43  ;;  %962 = vst.msk [vmem:[#allocation2 + $0x60] sm:$0xff] %vm949_vm7, %v6643_v4  ;;  %v3312_v45 = vshll.u32 %v5822_v48, 16  ;;  %v3316_v8 = vshrl.u32 %v5822_v48, 16  ;;  %v1021_v47 = vld [vmem:[%s7270_s22 + $0x9c] sm:$0xe] }
 0x14a   : > { %v3322_v50 = vshll.u32 %v5823_v23, 16  ;;  %v6915_v56 = vpack.i.bf16 %v2136_v49, %v2135_v21  ;;  %303 = vst.msk [vmem:[#allocation2 + $0x68] sm:$0xff] %vm289_vm6, %v6014_v14  ;;  %v3305_v13 = vrot.slane %v3303_v26, 4  ;;  %v6659_v19 = vunpack.i.h.bf16 %v8180_v35  ;;  %v8377_v14 = vpop.permute.xlu1 %6736 }
 0x14b   : > { %v3308_v40 = vrot.slane %v3306_v32, 5  ;;  %6921 = vrot.lane.b32.xlu0 %v6920_v34, %s7215_s26  ;;  %963 = vst.msk [vmem:[#allocation2 + $0x68] sm:$0xff] %vm949_vm7, %v6644_v6  ;;  %v3314_v37 = vrot.slane %v3312_v45, 5  ;;  %v3318_v59 = vrot.slane %v3316_v8, 4  ;;  %v6658_v61 = vunpack.i.l.bf16 %v8180_v35  ;;  %v1022_v34 = vld [vmem:[%s7270_s22 + $0xa0] sm:$0xf] }
 0x14c   : > { %v3324_v31 = vrot.slane %v3322_v50, 5  ;;  %6916 = vrot.lane.b32.xlu1 %v6915_v56, %s7216_s27  ;;  %2945 = vst.msk [vmem:[#allocation2 + $0x58] sm:$0xff] %vm2933_vm12, %v6659_v19  ;;  %v5893_v25 = vrot.slane %v5869_v33, 9  ;;  %v3805_v58 = vrot.slane %v5870_v1, 5  ;;  %v3808_v17 = vrot.slane %v5871_v44, 5 }
 0x14d   : > { %v3309_v41 = vor.u32 %v3308_v40, %v3305_v13  ;;  %v3319_v42 = vor.u32 %v3318_v59, %v3314_v37  ;;  %2944 = vst.msk [vmem:[#allocation2 + $0x50] sm:$0xff] %vm2933_vm12, %v6658_v61  ;;  %v6654_v10 = vunpack.i.h.bf16 %v8165_v20  ;;  %v6653_v11 = vunpack.i.l.bf16 %v8165_v20  ;;  %v1023_v45 = vld [vmem:[%s7270_s22 + $0xa4] sm:$0x1]  ;;  %v8383_v13 = vpop.permute.xlu0 %6741  ;;  %v5680_v59 = vld [vmem:[%s7270_s22 + $0xa8] sm:$0xf] }
 0x14e   : > { %v686_v35 = vshrl.u32 %v361_v55, 16  ;;  %v3806_v43 = vsel %vm7272_vm2, %v5893_v25, %v3805_v58  ;;  %v3807_v5 = vrot.slane %v3805_v58, 4  ;;  %v689_v6 = vshll.u32 %v361_v55, 16  ;;  %v5681_v25 = vld [vmem:[%s7270_s22 + $0xac] sm:$0xf] }
 0x14f   : > { %v3310_v51 = vrot.slane %v3309_v41, 4  ;;  %v3320_v15 = vrot.slane %v3319_v42, 4  ;;  %v3887_v39 = vunpack.c.l.bf16 %v3806_v43  ;;  %1398 = vst.msk [vmem:[#allocation2 + $0x60] sm:$0xff] %vm1385_vm8, %v6653_v11  ;;  %1399 = vst.msk [vmem:[#allocation2 + $0x68] sm:$0xff] %vm1385_vm8, %v6654_v10  ;;  %v695_v4 = vshll.u32 %v362_v29, 16  ;;  %v8402_v43 = vpop.permute.xlu1 %6746 }
 0x150   : > { %v688_v2 = vrot.slane %v686_v35, 4  ;;  %6926 = vrot.lane.b32.xlu1 %v8336_v24, %s7213_s24  ;;  %v3809_v16 = vsel %vm7272_vm2, %v3807_v5, %v3808_v17  ;;  %v691_v48 = vrot.slane %v689_v6, 5  ;;  %v699_v23 = vshrl.u32 %v362_v29, 16 }
 0x151   : > { %v3315_v20 = vsel %vm7315_vm5, %v3310_v51, %v3314_v37  ;;  %v3325_v36 = vsel %vm7315_vm5, %v3320_v15, %v3324_v31  ;;  %v3888_v18 = vunpack.c.l.bf16 %v3809_v16  ;;  %v697_v49 = vrot.slane %v695_v4, 5  ;;  %v5729_v16 = vld [vmem:[%s7270_s22 + $0xac] sm:$0xf] }
 0x152   : > { %v3454_v21 = vunpack.c.l.bf16 %v3315_v20  ;;  %v3455_v26 = vunpack.c.l.bf16 %v3325_v36  ;;  %v692_v32 = vor.u32 %v691_v48, %v688_v2  ;;  %v701_v33 = vrot.slane %v699_v23, 4  ;;  %v5728_v20 = vld [vmem:[%s7270_s22 + $0xa8] sm:$0xe]  ;;  %v8412_v48 = vpop.permute.xlu0 %6751 }
 0x153   : > { %v705_v1 = vshll.u32 %v363_v3, 16  ;;  %v6935_v8 = vpack.i.bf16 %v3888_v18, %v3887_v39  ;;  %v6669_v50 = vunpack.i.h.bf16 %v8202_v28  ;;  %v6668_v44 = vunpack.i.l.bf16 %v8202_v28  ;;  %v5730_v18 = vld [vmem:[%s7270_s22 + $0xb0] sm:$0x1] }
 0x154   : > { %v5606_v56 = vrot.slane %v1021_v47, 9  ;;  %v6930_v40 = vpack.i.bf16 %v3455_v26, %v3454_v21  ;;  %v693_v19 = vrot.slane %v692_v32, 4  ;;  %v702_v55 = vor.u32 %v701_v33, %v697_v49 }
 0x155   : > { %v707_v37 = vrot.slane %v705_v1, 5  ;;  %6936 = vrot.lane.b32.xlu1 %v6935_v8, %s7219_s30  ;;  %3601 = vst.msk [vmem:[#allocation2 + $0x50] sm:$0xff] %vm3590_vm13, %v6668_v44  ;;  %3602 = vst.msk [vmem:[#allocation2 + $0x58] sm:$0xff] %vm3590_vm13, %v6669_v50  ;;  %v1174_v31 = vrot.slane %v1022_v34, 5  ;;  %v1177_v61 = vrot.slane %v1023_v45, 5  ;;  %v6664_v41 = vunpack.i.h.bf16 %v8191_v60  ;;  %v5779_v1 = vld [vmem:[%s7270_s22 + $0xb4] sm:$0xff]  }
 0x156   : > { %v6663_v28 = vunpack.i.l.bf16 %v8191_v60  ;;  %6931 = vrot.lane.b32.xlu0 %v6930_v40, %s7218_s29  ;;  %v698_v58 = vsel %vm7315_vm5, %v693_v19, %v697_v49  ;;  %v703_v17 = vrot.slane %v702_v55, 4  ;;  %v6679_v29 = vunpack.i.h.bf16 %v8234_v57  ;;  %v5682_v60 = vld [vmem:[%s7270_s22 + $0xb0] sm:$0x1]  ;;  %v8422_v55 = vpop.permute.xlu1 %6756 }
 0x157   : > { %v6678_v42 = vunpack.i.l.bf16 %v8234_v57  ;;  %v815_v10 = vunpack.c.l.bf16 %v698_v58  ;;  %v1175_v11 = vsel %vm7272_vm2, %v5606_v56, %v1174_v31  ;;  %v1176_v35 = vrot.slane %v1174_v31, 4  ;;  %1628 = vst.msk [vmem:[#allocation2 + $0x68] sm:$0xff] %vm1614_vm9, %v6664_v41 }
 0x158   : > { %1627 = vst.msk [vmem:[#allocation2 + $0x60] sm:$0xff] %vm1614_vm9, %v6663_v28  ;;  %v2008_v51 = vshrl.u32 %v5680_v59, 16  ;;  %v708_v5 = vsel %vm7315_vm5, %v703_v17, %v707_v37  ;;  %v1251_v6 = vunpack.c.l.bf16 %v1175_v11  ;;  %v2011_v57 = vshll.u32 %v5680_v59, 16  ;;  %v5824_v17 = vld [vmem:[%s7270_s22 + $0xb4] sm:$0xf] }
 0x159   : > { %4034 = vst.msk [vmem:[#allocation2 + $0x50] sm:$0xff] %vm4023_vm14, %v6678_v42  ;;  %4035 = vst.msk [vmem:[#allocation2 + $0x58] sm:$0xff] %vm4023_vm14, %v6679_v29  ;;  %v2017_v15 = vshll.u32 %v5681_v25, 16  ;;  %v816_v39 = vunpack.c.l.bf16 %v708_v5  ;;  %v1178_v3 = vsel %vm7272_vm2, %v1176_v35, %v1177_v61  ;;  %v2021_v4 = vshrl.u32 %v5681_v25, 16  ;;  %v239_v61 = vld [vmem:[%s7270_s22 + $0x54] sm:$0xff]  }
 0x15a   : > { %v2010_v2 = vrot.slane %v2008_v51, 4  ;;  %v1252_v23 = vunpack.c.l.bf16 %v1178_v3  ;;  %v2013_v47 = vrot.slane %v2011_v57, 5  ;;  %v2027_v21 = vshll.u32 %v5682_v60, 16  ;;  %v5825_v51 = vld [vmem:[%s7270_s22 + $0xb8] sm:$0xf] }
 0x15b   : > { %v2019_v36 = vrot.slane %v2017_v15, 5  ;;  %v6940_v49 = vpack.i.bf16 %v816_v39, %v815_v10  ;;  %v2023_v26 = vrot.slane %v2021_v4, 4  ;;  %v6674_v32 = vunpack.i.h.bf16 %v8212_v22  ;;  %v8432_v10 = vpop.permute.xlu0 %6761  ;;  %v5826_v5 = vld [vmem:[%s7270_s22 + $0xbc] sm:$0x1] }
 0x15c   : > { %v6673_v33 = vunpack.i.l.bf16 %v8212_v22  ;;  %v6945_v34 = vpack.i.bf16 %v1252_v23, %v1251_v6  ;;  %v2014_v45 = vor.u32 %v2013_v47, %v2010_v2  ;;  %v2029_v8 = vrot.slane %v2027_v21, 5  ;;  %v5873_v23 = vld [vmem:[%s7270_s22 + $0xb8] sm:$0xf] }
 0x15d   : > { %v5750_v50 = vrot.slane %v5728_v20, 9  ;;  %6941 = vrot.lane.b32.xlu0 %v6940_v49, %s7217_s28  ;;  %v2024_v44 = vor.u32 %v2023_v26, %v2019_v36  ;;  %2285 = vst.msk [vmem:[#allocation2 + $0x68] sm:$0xff] %vm2271_vm10, %v6674_v32  ;;  %v2493_v56 = vrot.slane %v5729_v16, 5  ;;  %v2496_v40 = vrot.slane %v5730_v18, 5  ;;  %v5872_v16 = vld [vmem:[%s7270_s22 + $0xb4] sm:$0xe] }
 0x15e   : > { %2284 = vst.msk [vmem:[#allocation2 + $0x60] sm:$0xff] %vm2271_vm10, %v6673_v33  ;;  %v6689_v19 = vunpack.i.h.bf16 %v8254_v30  ;;  %6946 = vrot.lane.b32.xlu1 %v6945_v34, %s7214_s25  ;;  %v2015_v22 = vrot.slane %v2014_v45, 4  ;;  %v6688_v37 = vunpack.i.l.bf16 %v8254_v30  ;;  %v2799_v59 = vunpack.c.l.bf16 %v5779_v1  ;;  %v5874_v18 = vld [vmem:[%s7270_s22 + $0xbc] sm:$0x1] }
 0x15f   : > { %v2800_v31 = vunpack.c.h.bf16 %v5779_v1  ;;  %v2025_v41 = vrot.slane %v2024_v44, 4  ;;  %v2494_v28 = vsel %vm7272_vm2, %v5750_v50, %v2493_v56  ;;  %v2495_v25 = vrot.slane %v2493_v56, 4  ;;  %v364_v50 = vld [vmem:[%s7270_s22 + $0xa8] sm:$0xf]  ;;  %v8459_v44 = vpop.permute.xlu0 %6771 }
 0x160   : > { %2718 = vst.msk [vmem:[#allocation2 + $0x68] sm:$0xff] %vm2704_vm11, %v6689_v19  ;;  %v6684_v58 = vunpack.i.h.bf16 %v8241_v53  ;;  %v4066_v29 = vld [vmem:[#allocation2 + $0x50] sm:$0xff]  ;;  %v4067_v42 = vld [vmem:[#allocation2 + $0x58] sm:$0xff]  ;;  %v2020_v30 = vsel %vm7315_vm5, %v2015_v22, %v2019_v36  ;;  %v2570_v11 = vunpack.c.l.bf16 %v2494_v28  ;;  %2717 = vst.msk [vmem:[#allocation2 + $0x60] sm:$0xff] %vm2704_vm11, %v6688_v37  ;;  %v6683_v60 = vunpack.i.l.bf16 %v8241_v53  ;;  %v8448_v53 = vpop.permute.xlu1 %6766 }
 0x161   : > { %v6965_v35 = vpack.i.bf16 %v2800_v31, %v2799_v59  ;;  %6247 = vmatprep.mubr.msk.f32.mxu0 %vm4093_vm0, %v4066_v29  ;;  %6951 = vrot.lane.b32.xlu0 %v8336_v24, %s7212_s23  ;;  %v2030_v6 = vsel %vm7315_vm5, %v2025_v41, %v2029_v8  ;;  %v2137_v57 = vunpack.c.l.bf16 %v2020_v30  ;;  %v2497_v15 = vsel %vm7272_vm2, %v2495_v25, %v2496_v40  ;;  %v365_v37 = vld [vmem:[%s7270_s22 + $0xac] sm:$0xf] }
 0x162   : > { %v271_v39 = vunpack.c.l.bf16 %v239_v61  ;;  %6248 = vmatmul.mubr.msk.f32.gmra.mrb[10].mxu0 %vm4093_vm0, %v4067_v42  ;;  %v2138_v3 = vunpack.c.l.bf16 %v2030_v6  ;;  %v2571_v2 = vunpack.c.l.bf16 %v2497_v15  ;;  %v272_v4 = vunpack.c.h.bf16 %v239_v61 }
 0x163   : > { %v3327_v20 = vshrl.u32 %v5824_v17, 16  ;;  %v3330_v24 = vshll.u32 %v5824_v17, 16  ;;  %v3336_v47 = vshll.u32 %v5825_v51, 16  ;;  %v3340_v36 = vshrl.u32 %v5825_v51, 16 }
 0x164   : > { %304 = vst.msk [vmem:[#allocation2 + $0x70] sm:$0xff] %vm289_vm6, %v271_v39  ;;  %v3346_v21 = vshll.u32 %v5826_v5, 16  ;;  %v6955_v49 = vpack.i.bf16 %v2138_v3, %v2137_v57  ;;  %v6960_v26 = vpack.i.bf16 %v2571_v2, %v2570_v11  ;;  %305 = vst.msk [vmem:[#allocation2 + $0x78] sm:$0xff] %vm289_vm6, %v272_v4  ;;  %v6699_v33 = vunpack.i.h.bf16 %v8274_v12  ;;  %v8468_v28 = vpop.permute.xlu1 %6776  ;;  %v1024_v2 = vld [vmem:[%s7270_s22 + $0xa8] sm:$0xe] }
 0x165   : > { %964 = vst.msk [vmem:[#allocation2 + $0x70] sm:$0xff] %vm949_vm7, %v6683_v60  ;;  %v3329_v32 = vrot.slane %v3327_v20, 4  ;;  %965 = vst.msk [vmem:[#allocation2 + $0x78] sm:$0xff] %vm949_vm7, %v6684_v58  ;;  %v3332_v1 = vrot.slane %v3330_v24, 5  ;;  %v3338_v34 = vrot.slane %v3336_v47, 5  ;;  %v3342_v45 = vrot.slane %v3340_v36, 4 }
 0x166   : > { %v3348_v8 = vrot.slane %v3346_v21, 5  ;;  %6956 = vrot.lane.b32.xlu1 %v6955_v49, %s7216_s27  ;;  %6961 = vrot.lane.b32.xlu0 %v6960_v26, %s7215_s26  ;;  %v6698_v56 = vunpack.i.l.bf16 %v8274_v12  ;;  %2947 = vst.msk [vmem:[#allocation2 + $0x68] sm:$0xff] %vm2933_vm12, %v6699_v33  ;;  %v5894_v40 = vrot.slane %v5872_v16, 9  ;;  %v3812_v19 = vrot.slane %v5873_v23, 5  ;;  %v366_v60 = vld [vmem:[%s7270_s22 + $0xb0] sm:$0x1] }
 0x167   : > { %v3815_v22 = vrot.slane %v5874_v18, 5  ;;  %v3333_v59 = vor.u32 %v3332_v1, %v3329_v32  ;;  %v3343_v31 = vor.u32 %v3342_v45, %v3338_v34  ;;  %v6694_v61 = vunpack.i.h.bf16 %v8265_v46  ;;  %v1025_v24 = vld [vmem:[%s7270_s22 + $0xac] sm:$0xf]  ;;  %v1026_v47 = vld [vmem:[%s7270_s22 + $0xb0] sm:$0x1]  ;;  %v5637_v26 = vld [vmem:[%s7270_s22 + $0xb4] sm:$0xff]  }
 0x168   : > { %v6693_v41 = vunpack.i.l.bf16 %v8265_v46  ;;  %2946 = vst.msk [vmem:[#allocation2 + $0x60] sm:$0xff] %vm2933_vm12, %v6698_v56  ;;  %v3813_v12 = vsel %vm7272_vm2, %v5894_v40, %v3812_v19  ;;  %v3814_v25 = vrot.slane %v3812_v19, 4  ;;  %v710_v58 = vshrl.u32 %v364_v50, 16  ;;  %v8491_v32 = vpop.permute.xlu1 %6786 }
 0x169   : > { %v713_v17 = vshll.u32 %v364_v50, 16  ;;  %v3334_v29 = vrot.slane %v3333_v59, 4  ;;  %v3344_v42 = vrot.slane %v3343_v31, 4  ;;  %v3889_v30 = vunpack.c.l.bf16 %v3813_v12  ;;  %1401 = vst.msk [vmem:[#allocation2 + $0x78] sm:$0xff] %vm1385_vm8, %v6694_v61  ;;  %v5683_v59 = vld [vmem:[%s7270_s22 + $0xb4] sm:$0xf] }
 0x16a   : > { %1400 = vst.msk [vmem:[#allocation2 + $0x70] sm:$0xff] %vm1385_vm8, %v6693_v41  ;;  %v719_v11 = vshll.u32 %v365_v37, 16  ;;  %6966 = vrot.lane.b32.xlu1 %v6965_v35, %s7213_s24  ;;  %v3816_v46 = vsel %vm7272_vm2, %v3814_v25, %v3815_v22  ;;  %v712_v51 = vrot.slane %v710_v58, 4  ;;  %v723_v6 = vshrl.u32 %v365_v37, 16  ;;  %v8484_v35 = vpop.permute.xlu0 %6781  ;;  %v5684_v25 = vld [vmem:[%s7270_s22 + $0xb8] sm:$0xf] }
 0x16b   : > { %v715_v5 = vrot.slane %v713_v17, 5  ;;  %v3339_v57 = vsel %vm7315_vm5, %v3334_v29, %v3338_v34  ;;  %v3349_v15 = vsel %vm7315_vm5, %v3344_v42, %v3348_v8  ;;  %v3890_v39 = vunpack.c.l.bf16 %v3816_v46 }
 0x16c   : > { %v721_v3 = vrot.slane %v719_v11, 5  ;;  %v3456_v4 = vunpack.c.l.bf16 %v3339_v57  ;;  %v3457_v20 = vunpack.c.l.bf16 %v3349_v15  ;;  %v725_v23 = vrot.slane %v723_v6, 4 }
 0x16d   : > { %v716_v16 = vor.u32 %v715_v5, %v712_v51  ;;  %v6975_v36 = vpack.i.bf16 %v3890_v39, %v3889_v30  ;;  %v729_v21 = vshll.u32 %v366_v60, 16  ;;  %v6709_v18 = vunpack.i.h.bf16 %v8303_v38  ;;  %v5685_v30 = vld [vmem:[%s7270_s22 + $0xbc] sm:$0x1]  ;;  %v5732_v5 = vld [vmem:[%s7270_s22 + $0xb8] sm:$0xf] }
 0x16e   : > { %v6708_v49 = vunpack.i.l.bf16 %v8303_v38  ;;  %v6970_v33 = vpack.i.bf16 %v3457_v20, %v3456_v4  ;;  %v726_v34 = vor.u32 %v725_v23, %v721_v3  ;;  %v5607_v45 = vrot.slane %v1024_v2, 9  ;;  %v8506_v58 = vpop.permute.xlu0 %6791  ;;  %v8517_v6 = vpop.permute.xlu1 %6796  ;;  %v5733_v23 = vld [vmem:[%s7270_s22 + $0xbc] sm:$0x1] }
 0x16f   : > { %v717_v1 = vrot.slane %v716_v16, 4  ;;  %6976 = vrot.lane.b32.xlu1 %v6975_v36, %s7219_s30  ;;  %v731_v8 = vrot.slane %v729_v21, 5  ;;  %3604 = vst.msk [vmem:[#allocation2 + $0x68] sm:$0xff] %vm3590_vm13, %v6709_v18  ;;  %v1181_v50 = vrot.slane %v1025_v24, 5  ;;  %v1184_v56 = vrot.slane %v1026_v47, 5  ;;  %v6117_v18 = vld [vmem:[%s7270_s22 + $0xc0] sm:$0xff]  }
 0x170   : > { %3603 = vst.msk [vmem:[#allocation2 + $0x60] sm:$0xff] %vm3590_vm13, %v6708_v49  ;;  %v6704_v38 = vunpack.i.h.bf16 %v8285_v7  ;;  %6971 = vrot.lane.b32.xlu0 %v6970_v33, %s7218_s29  ;;  %v727_v19 = vrot.slane %v726_v34, 4  ;;  %v6703_v22 = vunpack.i.l.bf16 %v8285_v7  ;;  %v1482_v37 = vunpack.c.l.bf16 %v5637_v26 }
 0x171   : > { %v722_v40 = vsel %vm7315_vm5, %v717_v1, %v721_v3  ;;  %v1182_v61 = vsel %vm7272_vm2, %v5607_v45, %v1181_v50  ;;  %v1183_v41 = vrot.slane %v1181_v50, 4  ;;  %v1483_v12 = vunpack.c.h.bf16 %v5637_v26  ;;  %v5731_v3 = vld [vmem:[%s7270_s22 + $0xb4] sm:$0xe] }
 0x172   : > { %v817_v31 = vunpack.c.l.bf16 %v722_v40  ;;  %1630 = vst.msk [vmem:[#allocation2 + $0x78] sm:$0xff] %vm1614_vm9, %v6704_v38  ;;  %v732_v17 = vsel %vm7315_vm5, %v727_v19, %v731_v8  ;;  %v1253_v29 = vunpack.c.l.bf16 %v1182_v61  ;;  %1629 = vst.msk [vmem:[#allocation2 + $0x70] sm:$0xff] %vm1614_vm9, %v6703_v22  ;;  %v6719_v7 = vunpack.i.h.bf16 %v8324_v54  ;;  %v8528_v34 = vpop.permute.xlu0 %6801  ;;  %v6098_v38 = vld [vmem:[%s7270_s22 + $0x60] sm:$0xff]  }
 0x173   : > { %v6718_v42 = vunpack.i.l.bf16 %v8324_v54  ;;  %v818_v11 = vunpack.c.l.bf16 %v732_v17  ;;  %v1185_v46 = vsel %vm7272_vm2, %v1183_v41, %v1184_v56  ;;  %v6990_v60 = vpack.i.bf16 %v1483_v12, %v1482_v37  ;;  %v8537_v37 = vpop.permute.xlu1 %6806  ;;  %v5827_v12 = vld [vmem:[%s7270_s22 + $0xc0] sm:$0xf] }
 0x174   : > { %v2032_v51 = vshrl.u32 %v5683_v59, 16  ;;  %v1254_v57 = vunpack.c.l.bf16 %v1185_v46  ;;  %4037 = vst.msk [vmem:[#allocation2 + $0x68] sm:$0xff] %vm4023_vm14, %v6719_v7  ;;  %v2035_v15 = vshll.u32 %v5683_v59, 16  ;;  %v2041_v39 = vshll.u32 %v5684_v25, 16  ;;  %v5828_v7 = vld [vmem:[%s7270_s22 + $0xc4] sm:$0xf] }
 0x175   : > { %4036 = vst.msk [vmem:[#allocation2 + $0x60] sm:$0xff] %vm4023_vm14, %v6718_v42  ;;  %v2045_v54 = vshrl.u32 %v5684_v25, 16  ;;  %v6980_v2 = vpack.i.bf16 %v818_v11, %v817_v31  ;;  %v2051_v20 = vshll.u32 %v5685_v30, 16  ;;  %v6714_v16 = vunpack.i.h.bf16 %v8308_v52 }
 0x176   : > { %v2034_v4 = vrot.slane %v2032_v51, 4  ;;  %v6985_v24 = vpack.i.bf16 %v1254_v57, %v1253_v29  ;;  %v2037_v47 = vrot.slane %v2035_v15, 5  ;;  %v2043_v36 = vrot.slane %v2041_v39, 5 }
 0x177   : > { %v2047_v21 = vrot.slane %v2045_v54, 4  ;;  %6981 = vrot.lane.b32.xlu0 %v6980_v2, %s7217_s28  ;;  %v2053_v49 = vrot.slane %v2051_v20, 5  ;;  %v6713_v26 = vunpack.i.l.bf16 %v8308_v52  ;;  %2287 = vst.msk [vmem:[#allocation2 + $0x78] sm:$0xff] %vm2271_vm10, %v6714_v16  ;;  %v5751_v33 = vrot.slane %v5731_v3, 9  ;;  %v5875_v54 = vld [vmem:[%s7270_s22 + $0xc0] sm:$0xe] }
 0x178   : > { %v2500_v1 = vrot.slane %v5732_v5, 5  ;;  %6986 = vrot.lane.b32.xlu1 %v6985_v24, %s7214_s25  ;;  %v2038_v45 = vor.u32 %v2037_v47, %v2034_v4  ;;  %v2503_v50 = vrot.slane %v5733_v23, 5  ;;  %v6729_v56 = vunpack.i.h.bf16 %v8353_v63  ;;  %v5829_v5 = vld [vmem:[%s7270_s22 + $0xc8] sm:$0x1]  ;;  %v5876_v3 = vld [vmem:[%s7270_s22 + $0xc4] sm:$0xf]  ;;  %v8560_v2 = vpop.permute.xlu0 %6811 }
 0x179   : > { %v2048_v8 = vor.u32 %v2047_v21, %v2043_v36  ;;  %2286 = vst.msk [vmem:[#allocation2 + $0x70] sm:$0xff] %vm2271_vm10, %v6713_v26  ;;  %v6728_v19 = vunpack.i.l.bf16 %v8353_v63  ;;  %v6093_v22 = vunpack.c.l.bf16 %v6117_v18  ;;  %v6094_v41 = vunpack.c.h.bf16 %v6117_v18  ;;  %v5877_v24 = vld [vmem:[%s7270_s22 + $0xc8] sm:$0x1] }
 0x17a   : > { %v2501_v52 = vsel %vm7272_vm2, %v5751_v33, %v2500_v1  ;;  %v2502_v40 = vrot.slane %v2500_v1, 4  ;;  %v2039_v59 = vrot.slane %v2038_v45, 4  ;;  %2720 = vst.msk [vmem:[#allocation2 + $0x78] sm:$0xff] %vm2704_vm11, %v6729_v56  ;;  %v6724_v63 = vunpack.i.h.bf16 %v8339_v9 }
 0x17b   : > { %v2049_v31 = vrot.slane %v2048_v8, 4  ;;  %v2572_v61 = vunpack.c.l.bf16 %v2501_v52  ;;  %6991 = vrot.lane.b32.xlu0 %v6990_v60, %s7212_s23  ;;  %2719 = vst.msk [vmem:[#allocation2 + $0x70] sm:$0xff] %vm2704_vm11, %v6728_v19  ;;  %v6723_v17 = vunpack.i.l.bf16 %v8339_v9  ;;  %v6017_v29 = vunpack.c.l.bf16 %v6098_v38  ;;  %v4069_v30 = vld [vmem:[#allocation2 + $0x68] sm:$0xff]  ;;  %v367_v8 = vld [vmem:[%s7270_s22 + $0xb4] sm:$0xf] }
 0x17c   : > { %v2504_v25 = vsel %vm7272_vm2, %v2502_v40, %v2503_v50  ;;  %v4068_v42 = vld [vmem:[#allocation2 + $0x60] sm:$0xff]  ;;  %v2044_v11 = vsel %vm7315_vm5, %v2039_v59, %v2043_v36  ;;  %v8552_v51 = vpack.i.bf16 %v6094_v41, %v6093_v22  ;;  %v6018_v15 = vunpack.c.h.bf16 %v6098_v38  ;;  %v368_v40 = vld [vmem:[%s7270_s22 + $0xb8] sm:$0xf] }
 0x17d   : > { %v2054_v46 = vsel %vm7315_vm5, %v2049_v31, %v2053_v49  ;;  %v2573_v60 = vunpack.c.l.bf16 %v2504_v25  ;;  %6250 = vmatprep.mubr.msk.f32.mxu0 %vm4093_vm0, %v4068_v42  ;;  %v2139_v9 = vunpack.c.l.bf16 %v2044_v11  ;;  %306 = vst.msk [vmem:[#allocation2 + $0x80] sm:$0xff] %vm289_vm6, %v6017_v29  ;;  %v3351_v39 = vshrl.u32 %v5827_v12, 16  ;;  %v8566_v49 = vpop.permute.xlu1 %6816  ;;  %v369_v42 = vld [vmem:[%s7270_s22 + $0xbc] sm:$0x1] }
 0x17e   : > { %v2140_v57 = vunpack.c.l.bf16 %v2054_v46  ;;  %6251 = vmatmul.mubr.msk.f32.gmra.mrb[12].mxu0 %vm4093_vm0, %v4069_v30  ;;  %966 = vst.msk [vmem:[#allocation2 + $0x80] sm:$0xff] %vm949_vm7, %v6723_v17  ;;  %v3354_v20 = vshll.u32 %v5827_v12, 16  ;;  %v3360_v16 = vshll.u32 %v5828_v7, 16  ;;  %v3364_v23 = vshrl.u32 %v5828_v7, 16 }
 0x17f   : > { %v7000_v4 = vpack.i.bf16 %v2573_v60, %v2572_v61  ;;  %307 = vst.msk [vmem:[#allocation2 + $0x88] sm:$0xff] %vm289_vm6, %v6018_v15  ;;  %v3353_v36 = vrot.slane %v3351_v39, 4  ;;  %v3370_v21 = vshll.u32 %v5829_v5, 16  ;;  %v6739_v18 = vunpack.i.h.bf16 %v8377_v14  ;;  %v8580_v25 = vpop.permute.xlu0 %6821  ;;  %v1027_v39 = vld [vmem:[%s7270_s22 + $0xb4] sm:$0xe] }
 0x180   : > { %v6995_v47 = vpack.i.bf16 %v2140_v57, %v2139_v9  ;;  %967 = vst.msk [vmem:[#allocation2 + $0x88] sm:$0xff] %vm949_vm7, %v6724_v63  ;;  %v3356_v26 = vrot.slane %v3354_v20, 5  ;;  %v3362_v33 = vrot.slane %v3360_v16, 5  ;;  %v3366_v1 = vrot.slane %v3364_v23, 4  ;;  %v1028_v16 = vld [vmem:[%s7270_s22 + $0xb8] sm:$0xf] }
 0x181   : > { %7001 = vrot.lane.b32.xlu0 %v7000_v4, %s7215_s26  ;;  %v6738_v45 = vunpack.i.l.bf16 %v8377_v14  ;;  %v3372_v50 = vrot.slane %v3370_v21, 5  ;;  %2949 = vst.msk [vmem:[#allocation2 + $0x78] sm:$0xff] %vm2933_vm12, %v6739_v18  ;;  %v5895_v56 = vrot.slane %v5875_v54, 9  ;;  %v3819_v38 = vrot.slane %v5876_v3, 5  ;;  %v8589_v60 = vpop.permute.xlu1 %6826  ;;  %v1029_v23 = vld [vmem:[%s7270_s22 + $0xbc] sm:$0x1] }
 0x182   : > { %6996 = vrot.lane.b32.xlu1 %v6995_v47, %s7216_s27  ;;  %v3822_v52 = vrot.slane %v5877_v24, 5  ;;  %v3357_v19 = vor.u32 %v3356_v26, %v3353_v36  ;;  %v3367_v22 = vor.u32 %v3366_v1, %v3362_v33  ;;  %v6734_v59 = vunpack.i.h.bf16 %v8361_v27 }
 0x183   : > { %2948 = vst.msk [vmem:[#allocation2 + $0x70] sm:$0xff] %vm2933_vm12, %v6738_v45  ;;  %v6733_v31 = vunpack.i.l.bf16 %v8361_v27  ;;  %v3820_v14 = vsel %vm7272_vm2, %v5895_v56, %v3819_v38  ;;  %v3821_v61 = vrot.slane %v3819_v38, 4  ;;  %v734_v41 = vshrl.u32 %v367_v8, 16  ;;  %v8600_v45 = vpop.permute.xlu0 %6831 }
 0x184   : > { %v737_v12 = vshll.u32 %v367_v8, 16  ;;  %v3358_v63 = vrot.slane %v3357_v19, 4  ;;  %v3368_v17 = vrot.slane %v3367_v22, 4  ;;  %v3891_v29 = vunpack.c.l.bf16 %v3820_v14  ;;  %1403 = vst.msk [vmem:[#allocation2 + $0x88] sm:$0xff] %vm1385_vm8, %v6734_v59  ;;  %v5687_v59 = vld [vmem:[%s7270_s22 + $0xc4] sm:$0xf] }
 0x185   : > { %1402 = vst.msk [vmem:[#allocation2 + $0x80] sm:$0xff] %vm1385_vm8, %v6733_v31  ;;  %v743_v7 = vshll.u32 %v368_v40, 16  ;;  %v3823_v27 = vsel %vm7272_vm2, %v3821_v61, %v3822_v52  ;;  %v736_v30 = vrot.slane %v734_v41, 4  ;;  %v747_v46 = vshrl.u32 %v368_v40, 16 }
 0x186   : > { %7006 = vrot.lane.b32.xlu1 %v8552_v51, %s7213_s24  ;;  %v739_v11 = vrot.slane %v737_v12, 5  ;;  %v3363_v5 = vsel %vm7315_vm5, %v3358_v63, %v3362_v33  ;;  %v3373_v9 = vsel %vm7315_vm5, %v3368_v17, %v3372_v50  ;;  %v3892_v57 = vunpack.c.l.bf16 %v3823_v27  ;;  %v5688_v63 = vld [vmem:[%s7270_s22 + $0xc8] sm:$0x1] }
 0x187   : > { %v745_v15 = vrot.slane %v743_v7, 5  ;;  %v3458_v54 = vunpack.c.l.bf16 %v3363_v5  ;;  %v3459_v3 = vunpack.c.l.bf16 %v3373_v9  ;;  %v749_v20 = vrot.slane %v747_v46, 4  ;;  %v5735_v46 = vld [vmem:[%s7270_s22 + $0xc4] sm:$0xf] }
 0x188   : > { %v740_v4 = vor.u32 %v739_v11, %v736_v30  ;;  %v7015_v24 = vpack.i.bf16 %v3892_v57, %v3891_v29  ;;  %v753_v47 = vshll.u32 %v369_v42, 16  ;;  %v6749_v36 = vunpack.i.h.bf16 %v8402_v43  ;;  %v5734_v11 = vld [vmem:[%s7270_s22 + $0xc0] sm:$0xe] }
 0x189   : > { %v6748_v21 = vunpack.i.l.bf16 %v8402_v43  ;;  %v7010_v18 = vpack.i.bf16 %v3459_v3, %v3458_v54  ;;  %v750_v33 = vor.u32 %v749_v20, %v745_v15  ;;  %v5608_v1 = vrot.slane %v1027_v39, 9  ;;  %v5686_v43 = vld [vmem:[%s7270_s22 + $0xc0] sm:$0xf]  ;;  %v8613_v31 = vpop.permute.xlu1 %6836  ;;  %v5736_v39 = vld [vmem:[%s7270_s22 + $0xc8] sm:$0x1]  ;;  %v8630_v54 = vpop.permute.xlu0 %6841 }
 0x18a   : > { %v741_v26 = vrot.slane %v740_v4, 4  ;;  %7016 = vrot.lane.b32.xlu1 %v7015_v24, %s7219_s30  ;;  %v755_v8 = vrot.slane %v753_v47, 5  ;;  %3606 = vst.msk [vmem:[#allocation2 + $0x78] sm:$0xff] %vm3590_vm13, %v6749_v36  ;;  %v1188_v50 = vrot.slane %v1028_v16, 5  ;;  %v1191_v56 = vrot.slane %v1029_v23, 5  ;;  %v5783_v23 = vld [vmem:[%s7270_s22 + $0xcc] sm:$0xff]  }
 0x18b   : > { %3605 = vst.msk [vmem:[#allocation2 + $0x70] sm:$0xff] %vm3590_vm13, %v6748_v21  ;;  %v6744_v38 = vunpack.i.h.bf16 %v8383_v13  ;;  %7011 = vrot.lane.b32.xlu0 %v7010_v18, %s7218_s29  ;;  %v751_v40 = vrot.slane %v750_v33, 4  ;;  %v6743_v19 = vunpack.i.l.bf16 %v8383_v13  ;;  %v6759_v22 = vunpack.i.h.bf16 %v8422_v55 }
 0x18c   : > { %v746_v52 = vsel %vm7315_vm5, %v741_v26, %v745_v15  ;;  %v1189_v61 = vsel %vm7272_vm2, %v5608_v1, %v1188_v50  ;;  %v1190_v41 = vrot.slane %v1188_v50, 4  ;;  %v6758_v12 = vunpack.i.l.bf16 %v8422_v55 }
 0x18d   : > { %v819_v14 = vunpack.c.l.bf16 %v746_v52  ;;  %1632 = vst.msk [vmem:[#allocation2 + $0x88] sm:$0xff] %vm1614_vm9, %v6744_v38  ;;  %v756_v13 = vsel %vm7315_vm5, %v751_v40, %v755_v8  ;;  %v1255_v17 = vunpack.c.l.bf16 %v1189_v61  ;;  %1631 = vst.msk [vmem:[#allocation2 + $0x80] sm:$0xff] %vm1614_vm9, %v6743_v19  ;;  %v2056_v29 = vshrl.u32 %v5686_v43, 16  ;;  %v8635_v18 = vpop.permute.xlu1 %6846 }
 0x18e   : > { %4039 = vst.msk [vmem:[#allocation2 + $0x78] sm:$0xff] %vm4023_vm14, %v6759_v22  ;;  %v2059_v7 = vshll.u32 %v5686_v43, 16  ;;  %v820_v27 = vunpack.c.l.bf16 %v756_v13  ;;  %v1192_v42 = vsel %vm7272_vm2, %v1190_v41, %v1191_v56  ;;  %4038 = vst.msk [vmem:[#allocation2 + $0x70] sm:$0xff] %vm4023_vm14, %v6758_v12  ;;  %v2065_v55 = vshll.u32 %v5687_v59, 16  ;;  %v5830_v43 = vld [vmem:[%s7270_s22 + $0xcc] sm:$0xf] }
 0x18f   : > { %v2069_v30 = vshrl.u32 %v5687_v59, 16  ;;  %v1256_v5 = vunpack.c.l.bf16 %v1192_v42  ;;  %v2058_v9 = vrot.slane %v2056_v29, 4  ;;  %v2075_v15 = vshll.u32 %v5688_v63, 16  ;;  %v5831_v59 = vld [vmem:[%s7270_s22 + $0xd0] sm:$0xf] }
 0x190   : > { %v2061_v57 = vrot.slane %v2059_v7, 5  ;;  %v7020_v3 = vpack.i.bf16 %v820_v27, %v819_v14  ;;  %v2067_v4 = vrot.slane %v2065_v55, 5  ;;  %v6754_v16 = vunpack.i.h.bf16 %v8412_v48  ;;  %v5832_v13 = vld [vmem:[%s7270_s22 + $0xd4] sm:$0x1] }
 0x191   : > { %v2071_v20 = vrot.slane %v2069_v30, 4  ;;  %v7025_v24 = vpack.i.bf16 %v1256_v5, %v1255_v17  ;;  %v2077_v36 = vrot.slane %v2075_v15, 5  ;;  %v6753_v21 = vunpack.i.l.bf16 %v8412_v48  ;;  %v5878_v17 = vld [vmem:[%s7270_s22 + $0xcc] sm:$0xe]  ;;  %v5879_v5 = vld [vmem:[%s7270_s22 + $0xd0] sm:$0xf] }
 0x192   : > { %v2062_v47 = vor.u32 %v2061_v57, %v2058_v9  ;;  %7021 = vrot.lane.b32.xlu0 %v7020_v3, %s7217_s28  ;;  %2289 = vst.msk [vmem:[#allocation2 + $0x88] sm:$0xff] %vm2271_vm10, %v6754_v16  ;;  %v5752_v33 = vrot.slane %v5734_v11, 9  ;;  %v2507_v1 = vrot.slane %v5735_v46, 5  ;;  %v2510_v8 = vrot.slane %v5736_v39, 5  ;;  %v8667_v9 = vpop.permute.xlu1 %6856  ;;  %v5880_v3 = vld [vmem:[%s7270_s22 + $0xd4] sm:$0x1] }
 0x193   : > { %v2072_v26 = vor.u32 %v2071_v20, %v2067_v4  ;;  %7026 = vrot.lane.b32.xlu1 %v7025_v24, %s7214_s25  ;;  %2288 = vst.msk [vmem:[#allocation2 + $0x80] sm:$0xff] %vm2271_vm10, %v6753_v21  ;;  %v2803_v56 = vunpack.c.l.bf16 %v5783_v23  ;;  %v2804_v48 = vunpack.c.h.bf16 %v5783_v23  ;;  %v6764_v38 = vunpack.i.h.bf16 %v8432_v10  ;;  %v8653_v7 = vpop.permute.xlu0 %6851 }
 0x194   : > { %v2063_v50 = vrot.slane %v2062_v47, 4  ;;  %v2508_v40 = vsel %vm7272_vm2, %v5752_v33, %v2507_v1  ;;  %v2509_v19 = vrot.slane %v2507_v1, 4  ;;  %v6763_v22 = vunpack.i.l.bf16 %v8432_v10 }
 0x195   : > { %v2073_v52 = vrot.slane %v2072_v26, 4  ;;  %v4071_v14 = vld [vmem:[#allocation2 + $0x78] sm:$0xff]  ;;  %v2574_v41 = vunpack.c.l.bf16 %v2508_v40  ;;  %v7045_v12 = vpack.i.bf16 %v2804_v48, %v2803_v56  ;;  %2722 = vst.msk [vmem:[#allocation2 + $0x88] sm:$0xff] %vm2704_vm11, %v6764_v38  ;;  %v6769_v63 = vunpack.i.h.bf16 %v8448_v53  ;;  %v4070_v29 = vld [vmem:[#allocation2 + $0x70] sm:$0xff] }
 0x196   : > { %v2068_v61 = vsel %vm7315_vm5, %v2063_v50, %v2067_v4  ;;  %7031 = vrot.lane.b32.xlu0 %v8552_v51, %s7212_s23  ;;  %v2511_v42 = vsel %vm7272_vm2, %v2509_v19, %v2510_v8  ;;  %2721 = vst.msk [vmem:[#allocation2 + $0x80] sm:$0xff] %vm2704_vm11, %v6763_v22  ;;  %v6768_v55 = vunpack.i.l.bf16 %v8448_v53  ;;  %6253 = vmatprep.mubr.msk.f32.mxu0 %vm4093_vm0, %v4070_v29  ;;  %v3375_v46 = vshrl.u32 %v5830_v43, 16  ;;  %v243_v50 = vld [vmem:[%s7270_s22 + $0x6c] sm:$0xff]  }
 0x197   : > { %v2078_v10 = vsel %vm7315_vm5, %v2073_v52, %v2077_v36  ;;  %v2141_v27 = vunpack.c.l.bf16 %v2068_v61  ;;  %v2575_v11 = vunpack.c.l.bf16 %v2511_v42  ;;  %2951 = vst.msk [vmem:[#allocation2 + $0x88] sm:$0xff] %vm2933_vm12, %v6769_v63  ;;  %v3378_v51 = vshll.u32 %v5830_v43, 16  ;;  %6254 = vmatmul.mubr.msk.f32.gmra.mrb[14].mxu0 %vm4093_vm0, %v4071_v14 }
 0x198   : > { %v2142_v30 = vunpack.c.l.bf16 %v2078_v10  ;;  %2950 = vst.msk [vmem:[#allocation2 + $0x80] sm:$0xff] %vm2933_vm12, %v6768_v55  ;;  %v3384_v57 = vshll.u32 %v5831_v59, 16  ;;  %v3388_v15 = vshrl.u32 %v5831_v59, 16  ;;  %v3394_v39 = vshll.u32 %v5832_v13, 16 }
 0x199   : > { %v5896_v53 = vrot.slane %v5878_v17, 9  ;;  %v7040_v20 = vpack.i.bf16 %v2575_v11, %v2574_v41  ;;  %v3377_v16 = vrot.slane %v3375_v46, 4  ;;  %v3380_v23 = vrot.slane %v3378_v51, 5 }
 0x19a   : > { %v7035_v4 = vpack.i.bf16 %v2142_v30, %v2141_v27  ;;  %v3386_v24 = vrot.slane %v3384_v57, 5  ;;  %v3390_v47 = vrot.slane %v3388_v15, 4  ;;  %v3396_v36 = vrot.slane %v3394_v39, 5  ;;  %v8676_v56 = vpop.permute.xlu0 %6861 }
 0x19b   : > { %v3826_v21 = vrot.slane %v5879_v5, 5  ;;  %7041 = vrot.lane.b32.xlu0 %v7040_v20, %s7215_s26  ;;  %v3381_v26 = vor.u32 %v3380_v23, %v3377_v16  ;;  %v3829_v33 = vrot.slane %v5880_v3, 5  ;;  %v6774_v1 = vunpack.i.h.bf16 %v8459_v44  ;;  %v8685_v59 = vpop.permute.xlu1 %6866  ;;  %v6099_v5 = vld [vmem:[%s7270_s22 + $0x78] sm:$0xff]  }
 0x19c   : > { %7036 = vrot.lane.b32.xlu1 %v7035_v4, %s7216_s27  ;;  %v6773_v8 = vunpack.i.l.bf16 %v8459_v44  ;;  %v3391_v48 = vor.u32 %v3390_v47, %v3386_v24  ;;  %v6779_v52 = vunpack.i.h.bf16 %v8468_v28  ;;  %v6778_v22 = vunpack.i.l.bf16 %v8468_v28  ;;  %v247_v47 = vld [vmem:[%s7270_s22 + $0x84] sm:$0xff]  }
 0x19d   : > { %v3827_v38 = vsel %vm7272_vm2, %v5896_v53, %v3826_v21  ;;  %v3828_v43 = vrot.slane %v3826_v21, 4  ;;  %v3382_v40 = vrot.slane %v3381_v26, 4  ;;  %3608 = vst.msk [vmem:[#allocation2 + $0x88] sm:$0xff] %vm3590_vm13, %v6774_v1  ;;  %v6784_v44 = vunpack.i.h.bf16 %v8484_v35 }
 0x19e   : > { %v3893_v19 = vunpack.c.l.bf16 %v3827_v38  ;;  %3607 = vst.msk [vmem:[#allocation2 + $0x80] sm:$0xff] %vm3590_vm13, %v6773_v8  ;;  %v3392_v14 = vrot.slane %v3391_v48, 4  ;;  %v6783_v41 = vunpack.i.l.bf16 %v8484_v35  ;;  %v275_v63 = vunpack.c.l.bf16 %v243_v50  ;;  %v8705_v62 = vpop.permute.xlu0 %6871 }
 0x19f   : > { %v3830_v61 = vsel %vm7272_vm2, %v3828_v43, %v3829_v33  ;;  %4041 = vst.msk [vmem:[#allocation2 + $0x88] sm:$0xff] %vm4023_vm14, %v6779_v52  ;;  %v3387_v13 = vsel %vm7315_vm5, %v3382_v40, %v3386_v24  ;;  %4040 = vst.msk [vmem:[#allocation2 + $0x80] sm:$0xff] %vm4023_vm14, %v6778_v22  ;;  %v276_v28 = vunpack.c.h.bf16 %v243_v50  ;;  %v6789_v29 = vunpack.i.h.bf16 %v8491_v32  ;;  %v6100_v52 = vld [vmem:[%s7270_s22 + $0x90] sm:$0xff]   ;;  %v251_v22 = vld [vmem:[%s7270_s22 + $0x9c] sm:$0xff]  }
 0x1a0   : > { %7046 = vrot.lane.b32.xlu1 %v7045_v12, %s7213_s24  ;;  %v3894_v17 = vunpack.c.l.bf16 %v3830_v61  ;;  %v3397_v0 = vsel %vm7315_vm5, %v3392_v14, %v3396_v36  ;;  %v3460_v10 = vunpack.c.l.bf16 %v3387_v13  ;;  %308 = vst.msk [vmem:[#allocation2 + $0x90] sm:$0xff] %vm289_vm6, %v275_v63  ;;  %v6788_v35 = vunpack.i.l.bf16 %v8491_v32  ;;  %v6101_v61 = vld [vmem:[%s7270_s22 + $0xa8] sm:$0xff]   ;;  %vm9378_vm2 = vmpackc.low %vm5321_vm1, %vm5321_vm1  ;;  %s5998_s24 = sshll.u32 %s9510_s15, 4 }
 0x1a1   : > { %v6794_v12 = vunpack.i.h.bf16 %v8506_v58  ;;  %v3461_v27 = vunpack.c.l.bf16 %v3397_v0  ;;  %309 = vst.msk [vmem:[#allocation2 + $0x98] sm:$0xff] %vm289_vm6, %v276_v28  ;;  %v6793_v55 = vunpack.i.l.bf16 %v8506_v58  ;;  %v6799_v30 = vunpack.i.h.bf16 %v8517_v6  ;;  %v255_v28 = vld [vmem:[%s7270_s22 + $0xb4] sm:$0xff]   ;;  %s219_s27 = scalar_lea.vmem %s9450_s4, %s5998_s24 }
 0x1a2   : > { %v7055_v42 = vpack.i.bf16 %v3894_v17, %v3893_v19  ;;  %968 = vst.msk [vmem:[#allocation2 + $0x90] sm:$0xff] %vm949_vm7, %v6783_v41  ;;  %969 = vst.msk [vmem:[#allocation2 + $0x98] sm:$0xff] %vm949_vm7, %v6784_v44  ;;  %v6798_v32 = vunpack.i.l.bf16 %v8517_v6  ;;  %v6804_v11 = vunpack.i.h.bf16 %v8528_v34  ;;  %v6803_v46 = vunpack.i.l.bf16 %v8528_v34 }
 0x1a3   : > { %1404 = vst.msk [vmem:[#allocation2 + $0x90] sm:$0xff] %vm1385_vm8, %v6788_v35  ;;  %v6809_v51 = vunpack.i.h.bf16 %v8537_v37  ;;  %v7050_v57 = vpack.i.bf16 %v3461_v27, %v3460_v10  ;;  %1405 = vst.msk [vmem:[#allocation2 + $0x98] sm:$0xff] %vm1385_vm8, %v6789_v29  ;;  %v6808_v58 = vunpack.i.l.bf16 %v8537_v37  ;;  %v6814_v15 = vunpack.i.h.bf16 %v8560_v2  ;;  %v8720_v39 = vpop.permute.xlu1 %6876 }
 0x1a4   : > { %7056 = vrot.lane.b32.xlu1 %v7055_v42, %s7219_s30  ;;  %1633 = vst.msk [vmem:[#allocation2 + $0x90] sm:$0xff] %vm1614_vm9, %v6793_v55  ;;  %v6813_v6 = vunpack.i.l.bf16 %v8560_v2  ;;  %1634 = vst.msk [vmem:[#allocation2 + $0x98] sm:$0xff] %vm1614_vm9, %v6794_v12  ;;  %v6819_v34 = vunpack.i.h.bf16 %v8566_v49  ;;  %v6818_v3 = vunpack.i.l.bf16 %v8566_v49  ;;  %v6824_v53 = vunpack.i.h.bf16 %v8580_v25 }
 0x1a5   : > { %2290 = vst.msk [vmem:[#allocation2 + $0x90] sm:$0xff] %vm2271_vm10, %v6798_v32  ;;  %v6823_v4 = vunpack.i.l.bf16 %v8580_v25  ;;  %7051 = vrot.lane.b32.xlu0 %v7050_v57, %s7218_s29  ;;  %2291 = vst.msk [vmem:[#allocation2 + $0x98] sm:$0xff] %vm2271_vm10, %v6799_v30  ;;  %v6021_v2 = vunpack.c.l.bf16 %v6099_v5  ;;  %v6022_v20 = vunpack.c.h.bf16 %v6099_v5  ;;  %v6829_v16 = vunpack.i.h.bf16 %v8589_v60 }
 0x1a6   : > { %2723 = vst.msk [vmem:[#allocation2 + $0x90] sm:$0xff] %vm2704_vm11, %v6803_v46  ;;  %v4073_v37 = vld [vmem:[#allocation2 + $0x88] sm:$0xff]  ;;  %v6828_v23 = vunpack.i.l.bf16 %v8589_v60  ;;  %2724 = vst.msk [vmem:[#allocation2 + $0x98] sm:$0xff] %vm2704_vm11, %v6804_v11  ;;  %v4072_v49 = vld [vmem:[#allocation2 + $0x80] sm:$0xff]  ;;  %v6834_v25 = vunpack.i.h.bf16 %v8600_v45  ;;  %v6833_v24 = vunpack.i.l.bf16 %v8600_v45  ;;  %v6839_v60 = vunpack.i.h.bf16 %v8613_v31  ;;  %v8747_v45 = vpop.permute.xlu0 %6881 }
 0x1a7   : > { %2952 = vst.msk [vmem:[#allocation2 + $0x90] sm:$0xff] %vm2933_vm12, %v6808_v58  ;;  %6256 = vmatprep.mubr.msk.f32.mxu0 %vm4093_vm0, %v4072_v49  ;;  %2953 = vst.msk [vmem:[#allocation2 + $0x98] sm:$0xff] %vm2933_vm12, %v6809_v51  ;;  %v6838_v36 = vunpack.i.l.bf16 %v8613_v31  ;;  %v6844_v21 = vunpack.i.h.bf16 %v8630_v54  ;;  %v6843_v26 = vunpack.i.l.bf16 %v8630_v54  ;;  %v8749_v33 = vpop.permute.xlu1 %6886  ;;  %v6849_v31 = vunpack.i.h.bf16 %v8635_v18 }
 0x1a8   : > { %3609 = vst.msk [vmem:[#allocation2 + $0x90] sm:$0xff] %vm3590_vm13, %v6813_v6  ;;  %6257 = vmatmul.mubr.msk.f32.gmra.mrb[16].mxu0 %vm4093_vm0, %v4073_v37  ;;  %3610 = vst.msk [vmem:[#allocation2 + $0x98] sm:$0xff] %vm3590_vm13, %v6814_v15  ;;  %v6848_v1 = vunpack.i.l.bf16 %v8635_v18  ;;  %v6854_v54 = vunpack.i.h.bf16 %v8653_v7  ;;  %v6853_v8 = vunpack.i.l.bf16 %v8653_v7  ;;  %v6864_v50 = vunpack.i.h.bf16 %v8676_v56 }
 0x1a9   : > { %310 = vst.msk [vmem:[#allocation2 + $0xa0] sm:$0xff] %vm289_vm6, %v6021_v2  ;;  %311 = vst.msk [vmem:[#allocation2 + $0xa8] sm:$0xff] %vm289_vm6, %v6022_v20  ;;  %v6863_v48 = vunpack.i.l.bf16 %v8676_v56  ;;  %v279_v38 = vunpack.c.l.bf16 %v247_v47  ;;  %v280_v43 = vunpack.c.h.bf16 %v247_v47  ;;  %v6869_v18 = vunpack.i.h.bf16 %v8685_v59 }
 0x1aa   : > { %4042 = vst.msk [vmem:[#allocation2 + $0x90] sm:$0xff] %vm4023_vm14, %v6818_v3  ;;  %4043 = vst.msk [vmem:[#allocation2 + $0x98] sm:$0xff] %vm4023_vm14, %v6819_v34  ;;  %v6868_v7 = vunpack.i.l.bf16 %v8685_v59  ;;  %v6874_v40 = vunpack.i.h.bf16 %v8705_v62  ;;  %v6873_v19 = vunpack.i.l.bf16 %v8705_v62  ;;  %v6859_v56 = vunpack.i.h.bf16 %v8667_v9 }
 0x1ab   : > { %970 = vst.msk [vmem:[#allocation2 + $0xa0] sm:$0xff] %vm949_vm7, %v6823_v4  ;;  %971 = vst.msk [vmem:[#allocation2 + $0xa8] sm:$0xff] %vm949_vm7, %v6824_v53  ;;  %v6858_v44 = vunpack.i.l.bf16 %v8667_v9  ;;  %v6879_v59 = vunpack.i.h.bf16 %v8720_v39  ;;  %v6878_v14 = vunpack.i.l.bf16 %v8720_v39  ;;  %v6884_v41 = vunpack.i.h.bf16 %v8747_v45 }
 0x1ac   : > { %1406 = vst.msk [vmem:[#allocation2 + $0xa0] sm:$0xff] %vm1385_vm8, %v6828_v23  ;;  %1407 = vst.msk [vmem:[#allocation2 + $0xa8] sm:$0xff] %vm1385_vm8, %v6829_v16  ;;  %v6883_v9 = vunpack.i.l.bf16 %v8747_v45  ;;  %v6897_v63 = vpop.permute.xlu1 %6896  ;;  %v6025_v13 = vunpack.c.l.bf16 %v6100_v52  ;;  %v6026_v17 = vunpack.c.h.bf16 %v6100_v52  ;;  %v6889_v29 = vunpack.i.h.bf16 %v8749_v33 }
 0x1ad   : > { %1635 = vst.msk [vmem:[#allocation2 + $0xa0] sm:$0xff] %vm1614_vm9, %v6833_v24  ;;  %1636 = vst.msk [vmem:[#allocation2 + $0xa8] sm:$0xff] %vm1614_vm9, %v6834_v25  ;;  %v6888_v0 = vunpack.i.l.bf16 %v8749_v33  ;;  %v6892_v10 = vpop.permute.xlu0 %6891  ;;  %v283_v35 = vunpack.c.l.bf16 %v251_v22  ;;  %v284_v12 = vunpack.c.h.bf16 %v251_v22  ;;  %v6029_v55 = vunpack.c.l.bf16 %v6101_v61 }
 0x1ae   : > { %2292 = vst.msk [vmem:[#allocation2 + $0xa0] sm:$0xff] %vm2271_vm10, %v6838_v36  ;;  %2293 = vst.msk [vmem:[#allocation2 + $0xa8] sm:$0xff] %vm2271_vm10, %v6839_v60  ;;  %v6894_v27 = vunpack.i.h.bf16 %v6892_v10  ;;  %v6893_v42 = vunpack.i.l.bf16 %v6892_v10  ;;  %v6030_v30 = vunpack.c.h.bf16 %v6101_v61  ;;  %v6899_v32 = vunpack.i.h.bf16 %v6897_v63 }
 0x1af   : > { %312 = vst.msk [vmem:[#allocation2 + $0xb0] sm:$0xff] %vm289_vm6, %v279_v38  ;;  %313 = vst.msk [vmem:[#allocation2 + $0xb8] sm:$0xff] %vm289_vm6, %v280_v43  ;;  %v6898_v11 = vunpack.i.l.bf16 %v6897_v63  ;;  %v287_v46 = vunpack.c.l.bf16 %v255_v28  ;;  %v288_v51 = vunpack.c.h.bf16 %v255_v28 }
 0x1b0   : > { %2725 = vst.msk [vmem:[#allocation2 + $0xa0] sm:$0xff] %vm2704_vm11, %v6843_v26  ;;  %2726 = vst.msk [vmem:[#allocation2 + $0xa8] sm:$0xff] %vm2704_vm11, %v6844_v21 }
 0x1b1   : > { %972 = vst.msk [vmem:[#allocation2 + $0xb0] sm:$0xff] %vm949_vm7, %v6863_v48  ;;  %973 = vst.msk [vmem:[#allocation2 + $0xb8] sm:$0xff] %vm949_vm7, %v6864_v50  ;;  %v4074_v62 = vld [vmem:[#allocation2 + $0x90] sm:$0xff]  ;;  %v4075_v5 = vld [vmem:[#allocation2 + $0x98] sm:$0xff] }
 0x1b2   : > { %2954 = vst.msk [vmem:[#allocation2 + $0xa0] sm:$0xff] %vm2933_vm12, %v6848_v1  ;;  %2955 = vst.msk [vmem:[#allocation2 + $0xa8] sm:$0xff] %vm2933_vm12, %v6849_v31  ;;  %6259 = vmatprep.mubr.msk.f32.mxu0 %vm4093_vm0, %v4074_v62 }
 0x1b3   : > { %1408 = vst.msk [vmem:[#allocation2 + $0xb0] sm:$0xff] %vm1385_vm8, %v6868_v7  ;;  %1409 = vst.msk [vmem:[#allocation2 + $0xb8] sm:$0xff] %vm1385_vm8, %v6869_v18  ;;  %6260 = vmatmul.mubr.msk.f32.gmra.mrb[18].mxu0 %vm4093_vm0, %v4075_v5 }
 0x1b4   : > { %3611 = vst.msk [vmem:[#allocation2 + $0xa0] sm:$0xff] %vm3590_vm13, %v6853_v8  ;;  %3612 = vst.msk [vmem:[#allocation2 + $0xa8] sm:$0xff] %vm3590_vm13, %v6854_v54  ;;  %v6902_v57 = vpop.permute.xlu0 %6901 }
 0x1b5   : > { %1637 = vst.msk [vmem:[#allocation2 + $0xb0] sm:$0xff] %vm1614_vm9, %v6873_v19  ;;  %1638 = vst.msk [vmem:[#allocation2 + $0xb8] sm:$0xff] %vm1614_vm9, %v6874_v40  ;;  %v6904_v58 = vunpack.i.h.bf16 %v6902_v57  ;;  %v6903_v15 = vunpack.i.l.bf16 %v6902_v57  ;;  %v6907_v6 = vpop.permute.xlu1 %6906 }
 0x1b6   : > { %314 = vst.msk [vmem:[#allocation2 + $0xc0] sm:$0xff] %vm289_vm6, %v6025_v13  ;;  %315 = vst.msk [vmem:[#allocation2 + $0xc8] sm:$0xff] %vm289_vm6, %v6026_v17  ;;  %v6909_v3 = vunpack.i.h.bf16 %v6907_v6  ;;  %v6908_v53 = vunpack.i.l.bf16 %v6907_v6 }
 0x1b7   : > { %4044 = vst.msk [vmem:[#allocation2 + $0xa0] sm:$0xff] %vm4023_vm14, %v6858_v44  ;;  %4045 = vst.msk [vmem:[#allocation2 + $0xa8] sm:$0xff] %vm4023_vm14, %v6859_v56 }
 0x1b8   : > { %2294 = vst.msk [vmem:[#allocation2 + $0xb0] sm:$0xff] %vm2271_vm10, %v6878_v14  ;;  %2295 = vst.msk [vmem:[#allocation2 + $0xb8] sm:$0xff] %vm2271_vm10, %v6879_v59  ;;  %v6912_v4 = vpop.permute.xlu0 %6911 }
 0x1b9   : > { %316 = vst.msk [vmem:[#allocation2 + $0xd0] sm:$0xff] %vm289_vm6, %v283_v35  ;;  %317 = vst.msk [vmem:[#allocation2 + $0xd8] sm:$0xff] %vm289_vm6, %v284_v12  ;;  %v6914_v37 = vunpack.i.h.bf16 %v6912_v4  ;;  %v6913_v2 = vunpack.i.l.bf16 %v6912_v4  ;;  %v8831_v49 = vpop.f32.mrb[0].mxu0 }
 0x1ba   : > { %2727 = vst.msk [vmem:[#allocation2 + $0xb0] sm:$0xff] %vm2704_vm11, %v6883_v9  ;;  %2728 = vst.msk [vmem:[#allocation2 + $0xb8] sm:$0xff] %vm2704_vm11, %v6884_v41  ;;  %v8833_v60 = vpop.f32.mrb[1].mxu0  ;;  %v4422_v1 = vsel %vm4023_vm14, %v8831_v49, -inf }
 0x1bb   : > { %318 = vst.msk [vmem:[#allocation2 + $0xe0] sm:$0xff] %vm289_vm6, %v6029_v55  ;;  %319 = vst.msk [vmem:[#allocation2 + $0xe8] sm:$0xff] %vm289_vm6, %v6030_v30  ;;  %v4419_v26 = vsel %vm4023_vm14, %v8833_v60, -inf }
 0x1bc   : > { %2956 = vst.msk [vmem:[#allocation2 + $0xb0] sm:$0xff] %vm2933_vm12, %v6888_v0  ;;  %2957 = vst.msk [vmem:[#allocation2 + $0xb8] sm:$0xff] %vm2933_vm12, %v6889_v29 }
 0x1bd   : > { %320 = vst.msk [vmem:[#allocation2 + $0xf0] sm:$0xff] %vm289_vm6, %v287_v46  ;;  %321 = vst.msk [vmem:[#allocation2 + $0xf8] sm:$0xff] %vm289_vm6, %v288_v51  ;;  %v6922_v23 = vpop.permute.xlu0 %6921 }
 0x1be   : > { %3613 = vst.msk [vmem:[#allocation2 + $0xb0] sm:$0xff] %vm3590_vm13, %v6893_v42  ;;  %3614 = vst.msk [vmem:[#allocation2 + $0xb8] sm:$0xff] %vm3590_vm13, %v6894_v27  ;;  %v4076_v39 = vld [vmem:[#allocation2 + $0xa0] sm:$0xff]  ;;  %v4077_v34 = vld [vmem:[#allocation2 + $0xa8] sm:$0xff]  ;;  %v6917_v25 = vpop.permute.xlu1 %6916  ;;  %v6924_v24 = vunpack.i.h.bf16 %v6922_v23  ;;  %v6923_v47 = vunpack.i.l.bf16 %v6922_v23 }
 0x1bf   : > { %4046 = vst.msk [vmem:[#allocation2 + $0xb0] sm:$0xff] %vm4023_vm14, %v6898_v11  ;;  %4047 = vst.msk [vmem:[#allocation2 + $0xb8] sm:$0xff] %vm4023_vm14, %v6899_v32  ;;  %6262 = vmatprep.mubr.msk.f32.mxu0 %vm4093_vm0, %v4076_v39  ;;  %v6919_v36 = vunpack.i.h.bf16 %v6917_v25  ;;  %v6918_v21 = vunpack.i.l.bf16 %v6917_v25 }
 0x1c0   : > { %974 = vst.msk [vmem:[#allocation2 + $0xc0] sm:$0xff] %vm949_vm7, %v6903_v15  ;;  %975 = vst.msk [vmem:[#allocation2 + $0xc8] sm:$0xff] %vm949_vm7, %v6904_v58  ;;  %6263 = vmatmul.mubr.msk.f32.gmra.mrb[20].mxu0 %vm4093_vm0, %v4077_v34 }
 0x1c1   : > { %1410 = vst.msk [vmem:[#allocation2 + $0xc0] sm:$0xff] %vm1385_vm8, %v6908_v53  ;;  %1411 = vst.msk [vmem:[#allocation2 + $0xc8] sm:$0xff] %vm1385_vm8, %v6909_v3 }
 0x1c2   : > { %1639 = vst.msk [vmem:[#allocation2 + $0xc0] sm:$0xff] %vm1614_vm9, %v6913_v2  ;;  %1640 = vst.msk [vmem:[#allocation2 + $0xc8] sm:$0xff] %vm1614_vm9, %v6914_v37  ;;  %v6927_v45 = vpop.permute.xlu1 %6926 }
 0x1c3   : > { %2296 = vst.msk [vmem:[#allocation2 + $0xc0] sm:$0xff] %vm2271_vm10, %v6918_v21  ;;  %2297 = vst.msk [vmem:[#allocation2 + $0xc8] sm:$0xff] %vm2271_vm10, %v6919_v36  ;;  %v6929_v33 = vunpack.i.h.bf16 %v6927_v45  ;;  %v6928_v31 = vunpack.i.l.bf16 %v6927_v45 }
 0x1c4   : > { %2729 = vst.msk [vmem:[#allocation2 + $0xc0] sm:$0xff] %vm2704_vm11, %v6923_v47  ;;  %2730 = vst.msk [vmem:[#allocation2 + $0xc8] sm:$0xff] %vm2704_vm11, %v6924_v24  ;;  %4420 = vmax.xlane.f32.xlu0 %v4419_v26 }
 0x1c5   : > { %2958 = vst.msk [vmem:[#allocation2 + $0xc0] sm:$0xff] %vm2933_vm12, %v6928_v31  ;;  %2959 = vst.msk [vmem:[#allocation2 + $0xc8] sm:$0xff] %vm2933_vm12, %v6929_v33 }
 0x1c6   : > { %v4078_v20 = vld [vmem:[#allocation2 + $0xb0] sm:$0xff]  ;;  %v4079_v16 = vld [vmem:[#allocation2 + $0xb8] sm:$0xff] }
 0x1c7   : > { %6265 = vmatprep.mubr.msk.f32.mxu0 %vm4093_vm0, %v4078_v20  ;;  %v6937_v54 = vpop.permute.xlu1 %6936 }
 0x1c8   : > { %6266 = vmatmul.mubr.msk.f32.gmra.mrb[22].mxu0 %vm4093_vm0, %v4079_v16  ;;  %4423 = vmax.xlane.f32.xlu1 %v4422_v1  ;;  %v6932_v8 = vpop.permute.xlu0 %6931  ;;  %v6939_v50 = vunpack.i.h.bf16 %v6937_v54  ;;  %v6938_v48 = vunpack.i.l.bf16 %v6937_v54 }
 0x1c9   : > { %v6934_v38 = vunpack.i.h.bf16 %v6932_v8  ;;  %v6933_v43 = vunpack.i.l.bf16 %v6932_v8 }
 0x1cb   : > { %v8845_v52 = vpop.f32.mrb[2].mxu0  ;;  %3615 = vst.msk [vmem:[#allocation2 + $0xc0] sm:$0xff] %vm3590_vm13, %v6933_v43  ;;  %3616 = vst.msk [vmem:[#allocation2 + $0xc8] sm:$0xff] %vm3590_vm13, %v6934_v38 }
 0x1cc   : > { %v8849_v18 = vpop.f32.mrb[3].mxu0  ;;  %v4428_v7 = vsel %vm4023_vm14, %v8845_v52, -inf  ;;  %4048 = vst.msk [vmem:[#allocation2 + $0xc0] sm:$0xff] %vm4023_vm14, %v6938_v48  ;;  %4049 = vst.msk [vmem:[#allocation2 + $0xc8] sm:$0xff] %vm4023_vm14, %v6939_v50 }
 0x1cd   : > { %4429 = vmax.xlane.f32.xlu0 %v4428_v7  ;;  %v4425_v19 = vsel %vm4023_vm14, %v8849_v18, -inf }
 0x1cf   : > { %v6942_v40 = vpop.permute.xlu0 %6941 }
 0x1d0   : > { %v6944_v22 = vunpack.i.h.bf16 %v6942_v40  ;;  %v6943_v56 = vunpack.i.l.bf16 %v6942_v40  ;;  %v6947_v44 = vpop.permute.xlu1 %6946 }
 0x1d1   : > { %4426 = vmax.xlane.f32.xlu0 %v4425_v19  ;;  %v6949_v59 = vunpack.i.h.bf16 %v6947_v44  ;;  %v6948_v14 = vunpack.i.l.bf16 %v6947_v44 }
 0x1d2   : > { %976 = vst.msk [vmem:[#allocation2 + $0xd0] sm:$0xff] %vm949_vm7, %v6943_v56  ;;  %977 = vst.msk [vmem:[#allocation2 + $0xd8] sm:$0xff] %vm949_vm7, %v6944_v22 }
 0x1d3   : > { %1412 = vst.msk [vmem:[#allocation2 + $0xd0] sm:$0xff] %vm1385_vm8, %v6948_v14  ;;  %1413 = vst.msk [vmem:[#allocation2 + $0xd8] sm:$0xff] %vm1385_vm8, %v6949_v59  ;;  %v6952_v61 = vpop.permute.xlu0 %6951  ;;  %v4080_v41 = vld [vmem:[#allocation2 + $0xc0] sm:$0xff]  ;;  %v4081_v9 = vld [vmem:[#allocation2 + $0xc8] sm:$0xff] }
 0x1d4   : > { %v6954_v63 = vunpack.i.h.bf16 %v6952_v61  ;;  %v6953_v13 = vunpack.i.l.bf16 %v6952_v61  ;;  %6268 = vmatprep.mubr.msk.f32.mxu0 %vm4093_vm0, %v4080_v41 }
 0x1d5   : > { %6269 = vmatmul.mubr.msk.f32.gmra.mrb[24].mxu0 %vm4093_vm0, %v4081_v9 }
 0x1d6   : > { %1641 = vst.msk [vmem:[#allocation2 + $0xd0] sm:$0xff] %vm1614_vm9, %v6953_v13  ;;  %1642 = vst.msk [vmem:[#allocation2 + $0xd8] sm:$0xff] %vm1614_vm9, %v6954_v63 }
 0x1d8   : > { %v6957_v17 = vpop.permute.xlu1 %6956  ;;  %v6962_v28 = vpop.permute.xlu0 %6961 }
 0x1d9   : > { %v6959_v29 = vunpack.i.h.bf16 %v6957_v17  ;;  %v6958_v0 = vunpack.i.l.bf16 %v6957_v17  ;;  %v6964_v10 = vunpack.i.h.bf16 %v6962_v28  ;;  %v6963_v35 = vunpack.i.l.bf16 %v6962_v28 }
 0x1db   : > { %2298 = vst.msk [vmem:[#allocation2 + $0xd0] sm:$0xff] %vm2271_vm10, %v6958_v0  ;;  %2299 = vst.msk [vmem:[#allocation2 + $0xd8] sm:$0xff] %vm2271_vm10, %v6959_v29 }
 0x1dc   : > { %2731 = vst.msk [vmem:[#allocation2 + $0xd0] sm:$0xff] %vm2704_vm11, %v6963_v35  ;;  %2732 = vst.msk [vmem:[#allocation2 + $0xd8] sm:$0xff] %vm2704_vm11, %v6964_v10  ;;  %v6967_v12 = vpop.permute.xlu1 %6966 }
 0x1dd   : > { %v6969_v27 = vunpack.i.h.bf16 %v6967_v12  ;;  %v6968_v42 = vunpack.i.l.bf16 %v6967_v12 }
 0x1df   : > { %2960 = vst.msk [vmem:[#allocation2 + $0xd0] sm:$0xff] %vm2933_vm12, %v6968_v42  ;;  %2961 = vst.msk [vmem:[#allocation2 + $0xd8] sm:$0xff] %vm2933_vm12, %v6969_v27 }
 0x1e1   : > { %v6977_v55 = vpop.permute.xlu1 %6976 }
 0x1e2   : > { %v6972_v30 = vpop.permute.xlu0 %6971  ;;  %v6979_v62 = vunpack.i.h.bf16 %v6977_v55  ;;  %v6978_v32 = vunpack.i.l.bf16 %v6977_v55 }
 0x1e3   : > { %v6974_v11 = vunpack.i.h.bf16 %v6972_v30  ;;  %v6973_v46 = vunpack.i.l.bf16 %v6972_v30 }
 0x1e5   : > { %3617 = vst.msk [vmem:[#allocation2 + $0xd0] sm:$0xff] %vm3590_vm13, %v6973_v46  ;;  %3618 = vst.msk [vmem:[#allocation2 + $0xd8] sm:$0xff] %vm3590_vm13, %v6974_v11 }
 0x1e6   : > { %4050 = vst.msk [vmem:[#allocation2 + $0xd0] sm:$0xff] %vm4023_vm14, %v6978_v32  ;;  %4051 = vst.msk [vmem:[#allocation2 + $0xd8] sm:$0xff] %vm4023_vm14, %v6979_v62  ;;  %v8875_v51 = vpop.f32.mrb[4].mxu0 }
 0x1e7   : > { %v8877_v5 = vpop.f32.mrb[5].mxu0  ;;  %v4434_v57 = vsel %vm4023_vm14, %v8875_v51, -inf }
 0x1e8   : > { %4435 = vmax.xlane.f32.xlu0 %v4434_v57  ;;  %v4431_v58 = vsel %vm4023_vm14, %v8877_v5, -inf }
 0x1e9   : > { %v6982_v15 = vpop.permute.xlu0 %6981  ;;  %4432 = vmax.xlane.f32.xlu1 %v4431_v58 }
 0x1ea   : > { %v6984_v6 = vunpack.i.h.bf16 %v6982_v15  ;;  %v6983_v39 = vunpack.i.l.bf16 %v6982_v15  ;;  %v6987_v34 = vpop.permute.xlu1 %6986 }
 0x1eb   : > { %v6989_v3 = vunpack.i.h.bf16 %v6987_v34  ;;  %v6988_v53 = vunpack.i.l.bf16 %v6987_v34 }
 0x1ec   : > { %978 = vst.msk [vmem:[#allocation2 + $0xe0] sm:$0xff] %vm949_vm7, %v6983_v39  ;;  %979 = vst.msk [vmem:[#allocation2 + $0xe8] sm:$0xff] %vm949_vm7, %v6984_v6 }
 0x1ed   : > { %1414 = vst.msk [vmem:[#allocation2 + $0xe0] sm:$0xff] %vm1385_vm8, %v6988_v53  ;;  %1415 = vst.msk [vmem:[#allocation2 + $0xe8] sm:$0xff] %vm1385_vm8, %v6989_v3  ;;  %v6992_v4 = vpop.permute.xlu0 %6991  ;;  %v4082_v37 = vld [vmem:[#allocation2 + $0xd0] sm:$0xff]  ;;  %v4083_v2 = vld [vmem:[#allocation2 + $0xd8] sm:$0xff] }
 0x1ee   : > { %v6994_v20 = vunpack.i.h.bf16 %v6992_v4  ;;  %v6993_v16 = vunpack.i.l.bf16 %v6992_v4  ;;  %6271 = vmatprep.mubr.msk.f32.mxu0 %vm4093_vm0, %v4082_v37 }
 0x1ef   : > { %6272 = vmatmul.mubr.msk.f32.gmra.mrb[26].mxu0 %vm4093_vm0, %v4083_v2 }
 0x1f0   : > { %1643 = vst.msk [vmem:[#allocation2 + $0xe0] sm:$0xff] %vm1614_vm9, %v6993_v16  ;;  %1644 = vst.msk [vmem:[#allocation2 + $0xe8] sm:$0xff] %vm1614_vm9, %v6994_v20 }
 0x1f3   : > { %v7002_v23 = vpop.permute.xlu0 %7001 }
 0x1f4   : > { %v6997_v25 = vpop.permute.xlu1 %6996  ;;  %v7004_v24 = vunpack.i.h.bf16 %v7002_v23  ;;  %v7003_v47 = vunpack.i.l.bf16 %v7002_v23 }
 0x1f5   : > { %v6999_v36 = vunpack.i.h.bf16 %v6997_v25  ;;  %v6998_v21 = vunpack.i.l.bf16 %v6997_v25 }
 0x1f7   : > { %2300 = vst.msk [vmem:[#allocation2 + $0xe0] sm:$0xff] %vm2271_vm10, %v6998_v21  ;;  %2301 = vst.msk [vmem:[#allocation2 + $0xe8] sm:$0xff] %vm2271_vm10, %v6999_v36 }
 0x1f8   : > { %2733 = vst.msk [vmem:[#allocation2 + $0xe0] sm:$0xff] %vm2704_vm11, %v7003_v47  ;;  %2734 = vst.msk [vmem:[#allocation2 + $0xe8] sm:$0xff] %vm2704_vm11, %v7004_v24  ;;  %v7007_v26 = vpop.permute.xlu1 %7006 }
 0x1f9   : > { %v7009_v45 = vunpack.i.h.bf16 %v7007_v26  ;;  %v7008_v33 = vunpack.i.l.bf16 %v7007_v26 }
 0x1fb   : > { %2962 = vst.msk [vmem:[#allocation2 + $0xe0] sm:$0xff] %vm2933_vm12, %v7008_v33  ;;  %2963 = vst.msk [vmem:[#allocation2 + $0xe8] sm:$0xff] %vm2933_vm12, %v7009_v45 }
 0x1fc   : > { %v7017_v31 = vpop.permute.xlu1 %7016 }
 0x1fd   : > { %v7012_v1 = vpop.permute.xlu0 %7011  ;;  %v7019_v54 = vunpack.i.h.bf16 %v7017_v31  ;;  %v7018_v8 = vunpack.i.l.bf16 %v7017_v31 }
 0x1fe   : > { %v7014_v50 = vunpack.i.h.bf16 %v7012_v1  ;;  %v7013_v48 = vunpack.i.l.bf16 %v7012_v1 }
 0x1ff   : > { %v8899_v38 = vpop.f32.mrb[6].mxu0 }
 0x200   : > { %3619 = vst.msk [vmem:[#allocation2 + $0xe0] sm:$0xff] %vm3590_vm13, %v7013_v48  ;;  %3620 = vst.msk [vmem:[#allocation2 + $0xe8] sm:$0xff] %vm3590_vm13, %v7014_v50  ;;  %v8903_v43 = vpop.f32.mrb[7].mxu0  ;;  %v4440_v7 = vsel %vm4023_vm14, %v8899_v38, -inf }
 0x201   : > { %4052 = vst.msk [vmem:[#allocation2 + $0xe0] sm:$0xff] %vm4023_vm14, %v7018_v8  ;;  %4053 = vst.msk [vmem:[#allocation2 + $0xe8] sm:$0xff] %vm4023_vm14, %v7019_v54  ;;  %4441 = vmax.xlane.f32.xlu0 %v4440_v7  ;;  %v4437_v40 = vsel %vm4023_vm14, %v8903_v43, -inf }
 0x202   : > { %4438 = vmax.xlane.f32.xlu1 %v4437_v40 }
 0x204   : > { %v7022_v19 = vpop.permute.xlu0 %7021 }
 0x205   : > { %v7024_v22 = vunpack.i.h.bf16 %v7022_v19  ;;  %v7023_v56 = vunpack.i.l.bf16 %v7022_v19  ;;  %v7027_v44 = vpop.permute.xlu1 %7026 }
 0x206   : > { %v7029_v59 = vunpack.i.h.bf16 %v7027_v44  ;;  %v7028_v14 = vunpack.i.l.bf16 %v7027_v44 }
 0x207   : > { %980 = vst.msk [vmem:[#allocation2 + $0xf0] sm:$0xff] %vm949_vm7, %v7023_v56  ;;  %981 = vst.msk [vmem:[#allocation2 + $0xf8] sm:$0xff] %vm949_vm7, %v7024_v22 }
 0x208   : > { %1416 = vst.msk [vmem:[#allocation2 + $0xf0] sm:$0xff] %vm1385_vm8, %v7028_v14  ;;  %1417 = vst.msk [vmem:[#allocation2 + $0xf8] sm:$0xff] %vm1385_vm8, %v7029_v59  ;;  %v7032_v61 = vpop.permute.xlu0 %7031  ;;  %v4084_v41 = vld [vmem:[#allocation2 + $0xe0] sm:$0xff]  ;;  %v4085_v9 = vld [vmem:[#allocation2 + $0xe8] sm:$0xff] }
 0x209   : > { %v7034_v63 = vunpack.i.h.bf16 %v7032_v61  ;;  %v7033_v13 = vunpack.i.l.bf16 %v7032_v61  ;;  %6274 = vmatprep.mubr.msk.f32.mxu0 %vm4093_vm0, %v4084_v41 }
 0x20a   : > { %6275 = vmatmul.mubr.msk.f32.gmra.mrb[28].mxu0 %vm4093_vm0, %v4085_v9 }
 0x20b   : > { %1645 = vst.msk [vmem:[#allocation2 + $0xf0] sm:$0xff] %vm1614_vm9, %v7033_v13  ;;  %1646 = vst.msk [vmem:[#allocation2 + $0xf8] sm:$0xff] %vm1614_vm9, %v7034_v63 }
 0x20d   : > { %v7042_v28 = vpop.permute.xlu0 %7041 }
 0x20e   : > { %v7037_v17 = vpop.permute.xlu1 %7036  ;;  %v7044_v10 = vunpack.i.h.bf16 %v7042_v28  ;;  %v7043_v35 = vunpack.i.l.bf16 %v7042_v28 }
 0x20f   : > { %v7039_v29 = vunpack.i.h.bf16 %v7037_v17  ;;  %v7038_v0 = vunpack.i.l.bf16 %v7037_v17 }
 0x211   : > { %2302 = vst.msk [vmem:[#allocation2 + $0xf0] sm:$0xff] %vm2271_vm10, %v7038_v0  ;;  %2303 = vst.msk [vmem:[#allocation2 + $0xf8] sm:$0xff] %vm2271_vm10, %v7039_v29 }
 0x212   : > { %2735 = vst.msk [vmem:[#allocation2 + $0xf0] sm:$0xff] %vm2704_vm11, %v7043_v35  ;;  %2736 = vst.msk [vmem:[#allocation2 + $0xf8] sm:$0xff] %vm2704_vm11, %v7044_v10  ;;  %v7047_v12 = vpop.permute.xlu1 %7046 }
 0x213   : > { %v7049_v27 = vunpack.i.h.bf16 %v7047_v12  ;;  %v7048_v42 = vunpack.i.l.bf16 %v7047_v12 }
 0x215   : > { %2964 = vst.msk [vmem:[#allocation2 + $0xf0] sm:$0xff] %vm2933_vm12, %v7048_v42  ;;  %2965 = vst.msk [vmem:[#allocation2 + $0xf8] sm:$0xff] %vm2933_vm12, %v7049_v27 }
 0x216   : > { %v7057_v55 = vpop.permute.xlu1 %7056 }
 0x217   : > { %v7052_v30 = vpop.permute.xlu0 %7051  ;;  %v7059_v62 = vunpack.i.h.bf16 %v7057_v55  ;;  %v7058_v32 = vunpack.i.l.bf16 %v7057_v55 }
 0x218   : > { %v7054_v11 = vunpack.i.h.bf16 %v7052_v30  ;;  %v7053_v46 = vunpack.i.l.bf16 %v7052_v30 }
 0x21a   : > { %3621 = vst.msk [vmem:[#allocation2 + $0xf0] sm:$0xff] %vm3590_vm13, %v7053_v46  ;;  %3622 = vst.msk [vmem:[#allocation2 + $0xf8] sm:$0xff] %vm3590_vm13, %v7054_v11 }
 0x21b   : > { %4054 = vst.msk [vmem:[#allocation2 + $0xf0] sm:$0xff] %vm4023_vm14, %v7058_v32  ;;  %4055 = vst.msk [vmem:[#allocation2 + $0xf8] sm:$0xff] %vm4023_vm14, %v7059_v62  ;;  %v8927_v57 = vpop.f32.mrb[8].mxu0 }
 0x21c   : > { %v8929_v58 = vpop.f32.mrb[9].mxu0  ;;  %v4446_v15 = vsel %vm4023_vm14, %v8927_v57, -inf }
 0x21d   : > { %4447 = vmax.xlane.f32.xlu0 %v4446_v15  ;;  %v4443_v6 = vsel %vm4023_vm14, %v8929_v58, -inf }
 0x21e   : > { %4444 = vmax.xlane.f32.xlu1 %v4443_v6 }
 0x222   : > { %v4086_v39 = vld [vmem:[#allocation2 + $0xf0] sm:$0xff]  ;;  %v4087_v34 = vld [vmem:[#allocation2 + $0xf8] sm:$0xff] }
 0x223   : > { %6277 = vmatprep.mubr.msk.f32.mxu0 %vm4093_vm0, %v4086_v39 }
 0x224   : > { %6278 = vmatmul.mubr.msk.f32.gmra.mrb[30].mxu0 %vm4093_vm0, %v4087_v34 }
 0x235   : > { %v8937_v3 = vpop.f32.mrb[10].mxu0 }
 0x236   : > { %v8939_v53 = vpop.f32.mrb[11].mxu0  ;;  %v4452_v4 = vsel %vm4023_vm14, %v8937_v3, -inf }
 0x237   : > { %4453 = vmax.xlane.f32.xlu0 %v4452_v4  ;;  %v4449_v37 = vsel %vm4023_vm14, %v8939_v53, -inf }
 0x238   : > { %4450 = vmax.xlane.f32.xlu1 %v4449_v37 }
 0x251   : > { %v8945_v2 = vpop.f32.mrb[12].mxu0  ;;  %v4421_v12 = vpop.xlane.xlu0 %4420 }
 0x252   : > { %v8947_v20 = vpop.f32.mrb[13].mxu0  ;;  %v4458_v16 = vsel %vm4023_vm14, %v8945_v2, -inf  ;;  %v4515_v6 = vsub.f32 %v8833_v60, %v4421_v12 }
 0x253   : > { %4459 = vmax.xlane.f32.xlu0 %v4458_v16  ;;  %v4455_v23 = vsel %vm4023_vm14, %v8947_v20, -inf }
 0x254   : > { %4456 = vmax.xlane.f32.xlu1 %v4455_v23 }
 0x255   : > { %v4424_v35 = vpop.xlane.xlu1 %4423 }
 0x25a   : > { %v4430_v27 = vpop.xlane.xlu0 %4429 }
 0x25e   : > { %v4427_v30 = vpop.xlane.xlu0 %4426 }
 0x26a   : > { %v8953_v25 = vpop.f32.mrb[14].mxu0 }
 0x26b   : > { %v8955_v24 = vpop.f32.mrb[15].mxu0  ;;  %v4464_v47 = vsel %vm4023_vm14, %v8953_v25, -inf }
 0x26c   : > { %9471 = vst [vmem:[#allocation3_spill] sm:$0xff] %v8955_v24  ;;  %4465 = vmax.xlane.f32.xlu0 %v4464_v47  ;;  %v4461_v36 = vsel %vm4023_vm14, %v8955_v24, -inf  ;;  %v4547_v47 = vmul.f32 1.442695, %v4515_v6 }
 0x26d   : > { %4462 = vmax.xlane.f32.xlu1 %v4461_v36 }
 0x26e   : > { %7060 = vpow2.f32 %v4547_v47 }
 0x275   : > { %v4436_v32 = vpop.xlane.xlu0 %4435 }
 0x276   : > { %v4433_v42 = vpop.xlane.xlu1 %4432 }
 0x277   : > { %v4519_v12 = vsub.f32 %v8877_v5, %v4433_v42 }
 0x27b   : > { %v8961_v21 = vpop.f32.mrb[16].mxu0 }
 0x27c   : > { %9472 = vst [vmem:[#allocation4_spill] sm:$0xff] %v8961_v21  ;;  %v8963_v26 = vpop.f32.mrb[17].mxu0  ;;  %v4470_v45 = vsel %vm4023_vm14, %v8961_v21, -inf }
 0x27d   : > { %9473 = vst [vmem:[#allocation5_spill] sm:$0xff] %v8963_v26  ;;  %4471 = vmax.xlane.f32.xlu0 %v4470_v45  ;;  %v4467_v33 = vsel %vm4023_vm14, %v8963_v26, -inf  ;;  %v4516_v45 = vsub.f32 %v8831_v49, %v4424_v35 }
 0x27e   : > { %4468 = vmax.xlane.f32.xlu1 %v4467_v33 }
 0x286   : > { %v8969_v31 = vpop.f32.mrb[18].mxu0 }
 0x287   : > { %9474 = vst [vmem:[#allocation6_spill] sm:$0xff] %v8969_v31  ;;  %v8971_v1 = vpop.f32.mrb[19].mxu0  ;;  %v4476_v54 = vsel %vm4023_vm14, %v8969_v31, -inf }
 0x288   : > { %9475 = vst [vmem:[#allocation7_spill] sm:$0xff] %v8971_v1  ;;  %4477 = vmax.xlane.f32.xlu0 %v4476_v54  ;;  %v4473_v8 = vsel %vm4023_vm14, %v8971_v1, -inf }
 0x289   : > { %4474 = vmax.xlane.f32.xlu1 %v4473_v8  ;;  %v4549_v8 = vmul.f32 1.442695, %v4516_v45 }
 0x28e   : > { %v4442_v46 = vpop.xlane.xlu0 %4441 }
 0x28f   : > { %v9017_v55 = vpop.xlane.xlu1 %4438  ;;  %v4522_v6 = vsub.f32 %v8899_v38, %v4442_v46 }
 0x290   : > { %v4521_v46 = vsub.f32 %v8903_v43, %v9017_v55 }
 0x292   : > { %v4559_v45 = vmul.f32 1.442695, %v4521_v46 }
 0x293   : > { %v8977_v50 = vpop.f32.mrb[20].mxu0 }
 0x294   : > { %9476 = vst [vmem:[#allocation8_spill] sm:$0xff] %v8977_v50  ;;  %v8979_v48 = vpop.f32.mrb[21].mxu0  ;;  %v4482_v7 = vsel %vm4023_vm14, %v8977_v50, -inf }
 0x295   : > { %9477 = vst [vmem:[#allocation9_spill] sm:$0xff] %v8979_v48  ;;  %4483 = vmax.xlane.f32.xlu0 %v4482_v7  ;;  %v4479_v40 = vsel %vm4023_vm14, %v8979_v48, -inf  ;;  %v4518_v7 = vsub.f32 %v8845_v52, %v4430_v27 }
 0x296   : > { %4480 = vmax.xlane.f32.xlu1 %v4479_v40 }
 0x29b   : > { %v8985_v19 = vpop.f32.mrb[22].mxu0 }
 0x29c   : > { %9478 = vst [vmem:[#allocation10_spill] sm:$0xff] %v8985_v19  ;;  %v8987_v22 = vpop.f32.mrb[23].mxu0  ;;  %v4488_v56 = vsel %vm4023_vm14, %v8985_v19, -inf }
 0x29d   : > { %9479 = vst [vmem:[#allocation11_spill] sm:$0xff] %v8987_v22  ;;  %4489 = vmax.xlane.f32.xlu0 %v4488_v56  ;;  %v4485_v44 = vsel %vm4023_vm14, %v8987_v22, -inf  ;;  %v4553_v56 = vmul.f32 1.442695, %v4518_v7 }
 0x29e   : > { %4486 = vmax.xlane.f32.xlu1 %v4485_v44  ;;  %v4517_v44 = vsub.f32 %v8849_v18, %v4427_v30 }
 0x2a8   : > { %v8993_v59 = vpop.f32.mrb[24].mxu0 }
 0x2a9   : > { %9480 = vst [vmem:[#allocation12_spill] sm:$0xff] %v8993_v59  ;;  %v8995_v14 = vpop.f32.mrb[25].mxu0  ;;  %v4494_v61 = vsel %vm4023_vm14, %v8993_v59, -inf }
 0x2aa   : > { %9481 = vst [vmem:[#allocation13_spill] sm:$0xff] %v8995_v14  ;;  %4495 = vmax.xlane.f32.xlu0 %v4494_v61  ;;  %v4491_v41 = vsel %vm4023_vm14, %v8995_v14, -inf  ;;  %v4448_v34 = vpop.xlane.xlu0 %4447  ;;  %v9039_v61 = vpop.eup %7060 }
 0x2ab   : > { %4492 = vmax.xlane.f32.xlu1 %v4491_v41  ;;  %v9019_v62 = vpop.xlane.xlu1 %4444  ;;  %v4524_v36 = vsub.f32 %v8927_v57, %v4448_v34  ;;  %v4551_v41 = vmul.f32 1.442695, %v4517_v44  ;;  %v4555_v34 = vmul.f32 1.442695, %v4519_v12 }
 0x2ad   : > { %v4565_v54 = vmul.f32 1.442695, %v4524_v36 }
 0x2af   : > { %7062 = vpow2.f32 %v4565_v54 }
 0x2b0   : > { %7064 = vpow2.f32 %v4549_v8 }
 0x2c2   : > { %v9001_v9 = vpop.f32.mrb[26].mxu0 }
 0x2c3   : > { %9482 = vst [vmem:[#allocation14_spill] sm:$0xff] %v9001_v9  ;;  %v9003_v63 = vpop.f32.mrb[27].mxu0  ;;  %v4500_v13 = vsel %vm4023_vm14, %v9001_v9, -inf }
 0x2c4   : > { %9483 = vst [vmem:[#allocation15_spill] sm:$0xff] %v9003_v63  ;;  %4501 = vmax.xlane.f32.xlu0 %v4500_v13  ;;  %v4497_v17 = vsel %vm4023_vm14, %v9003_v63, -inf  ;;  %v4520_v13 = vsub.f32 %v8875_v51, %v4436_v32  ;;  %v4454_v8 = vpop.xlane.xlu0 %4453 }
 0x2c5   : > { %4498 = vmax.xlane.f32.xlu1 %v4497_v17  ;;  %v9021_v11 = vpop.xlane.xlu1 %4450  ;;  %v4526_v44 = vsub.f32 %v8937_v3, %v4454_v8 }
 0x2c6   : > { %v4557_v35 = vmul.f32 1.442695, %v4520_v13 }
 0x2dd   : > { %v9009_v28 = vpop.f32.mrb[28].mxu0 }
 0x2de   : > { %9484 = vst [vmem:[#allocation16_spill] sm:$0xff] %v9009_v28  ;;  %v9011_v29 = vpop.f32.mrb[29].mxu0  ;;  %v4506_v0 = vsel %vm4023_vm14, %v9009_v28, -inf }
 0x2df   : > { %9485 = vst [vmem:[#allocation17_spill] sm:$0xff] %v9011_v29  ;;  %4507 = vmax.xlane.f32.xlu0 %v4506_v0  ;;  %v4503_v10 = vsel %vm4023_vm14, %v9011_v29, -inf }
 0x2e0   : > { %4504 = vmax.xlane.f32.xlu1 %v4503_v10  ;;  %v9045_v10 = vpop.eup %7062 }
 0x2e1   : > { %v9023_v15 = vpop.xlane.xlu1 %4456  ;;  %v9048_v27 = vpop.eup %7064 }
 0x2f7   : > { %v9026_v39 = vpop.f32.mrb[30].mxu0 }
 0x2f8   : > { %v9028_v4 = vpop.f32.mrb[31].mxu0  ;;  %v4512_v37 = vsel %vm4023_vm14, %v9026_v39, -inf }
 0x2f9   : > { %9486 = vst [vmem:[#allocation18_spill] sm:$0xff] %v9028_v4  ;;  %4513 = vmax.xlane.f32.xlu1 %v4512_v37  ;;  %v4509_v16 = vsel %vm4023_vm14, %v9028_v4, -inf  ;;  %v4561_v37 = vmul.f32 1.442695, %v4522_v6 }
 0x2fa   : > { %4510 = vmax.xlane.f32.xlu0 %v4509_v16  ;;  %v4463_v23 = vpop.xlane.xlu1 %4462 }
 0x2fb   : > { %v4529_v33 = vsub.f32 %v8955_v24, %v4463_v23 }
 0x2fd   : > { %v4575_v40 = vmul.f32 1.442695, %v4529_v33  ;;  %v4523_v33 = vsub.f32 %v8929_v58, %v9019_v62 }
 0x2ff   : > { %7066 = vpow2.f32 %v4575_v40 }
 0x300   : > { %7068 = vpow2.f32 %v4553_v56  ;;  %v4563_v56 = vmul.f32 1.442695, %v4523_v33 }
 0x301   : > { %7070 = vpow2.f32 %v4551_v41 }
 0x309   : > { %v9052_v32 = vpop.eup %7066 }
 0x30a   : > { %4643 = vrot.lane.b32.xlu1 %v9039_v61, %s7220_s19  ;;  %v9059_v42 = vpop.eup %7068 }
 0x30b   : > { %v4469_v17 = vpop.xlane.xlu1 %4468  ;;  %v9066_v47 = vpop.eup %7070 }
 0x30c   : > { %v4531_v0 = vsub.f32 %v8963_v26, %v4469_v17 }
 0x30e   : > { %4661 = vrot.lane.b32.xlu1 %v9045_v10, %s7220_s19  ;;  %v4579_v30 = vmul.f32 1.442695, %v4531_v0  ;;  %v4569_v0 = vmul.f32 1.442695, %v4526_v44 }
 0x310   : > { %4645 = vrot.lane.b32.xlu0 %v9048_v27, %s7220_s19  ;;  %7072 = vpow2.f32 %v4579_v30  ;;  %v4460_v30 = vpop.xlane.xlu0 %4459 }
 0x311   : > { %7074 = vpow2.f32 %v4557_v35  ;;  %v4525_v35 = vsub.f32 %v8939_v53, %v9021_v11 }
 0x312   : > { %4671 = vrot.lane.b32.xlu1 %v9052_v32, %s7220_s19  ;;  %7076 = vpow2.f32 %v4555_v34 }
 0x313   : > { %7078 = vpow2.f32 %v4561_v37  ;;  %v4567_v37 = vmul.f32 1.442695, %v4525_v35 }
 0x314   : > { %4649 = vrot.lane.b32.xlu0 %v9059_v42, %s7220_s19  ;;  %v4466_v11 = vpop.xlane.xlu0 %4465 }
 0x316   : > { %v4475_v16 = vpop.xlane.xlu1 %4474 }
 0x317   : > { %v4533_v23 = vsub.f32 %v8971_v1, %v4475_v16  ;;  %v4528_v16 = vsub.f32 %v8945_v2, %v4460_v30 }
 0x318   : > { %4647 = vrot.lane.b32.xlu0 %v9066_v47, %s7220_s19  ;;  %v4472_v8 = vpop.xlane.xlu0 %4471 }
 0x319   : > { %v4583_v36 = vmul.f32 1.442695, %v4533_v23  ;;  %v4573_v23 = vmul.f32 1.442695, %v4528_v16 }
 0x31a   : > { %v9072_v54 = vpop.eup %7072 }
 0x31b   : > { %7080 = vpow2.f32 %v4583_v36  ;;  %v9074_v7 = vpop.eup %7074  ;;  %4675 = vrot.lane.b32.xlu1 %v9072_v54, %s7220_s19  ;;  %v4527_v36 = vsub.f32 %v8947_v20, %v9023_v15 }
 0x31c   : > { %4653 = vrot.lane.b32.xlu0 %v9074_v7, %s7220_s19  ;;  %7082 = vpow2.f32 %v4559_v45  ;;  %v9082_v41 = vpop.eup %7076  ;;  %v4478_v15 = vpop.xlane.xlu0 %4477 }
 0x31d   : > { %v9089_v12 = vpop.eup %7078 }
 0x320   : > { %4651 = vrot.lane.b32.xlu0 %v9082_v41, %s7220_s19 }
 0x322   : > { %v4484_v35 = vpop.xlane.xlu0 %4483 }
 0x323   : > { %v4481_v55 = vpop.xlane.xlu1 %4480 }
 0x324   : > { %v4535_v40 = vsub.f32 %v8979_v48, %v4481_v55  ;;  %4657 = vrot.lane.b32.xlu0 %v9089_v12, %s7220_s19  ;;  %v4571_v55 = vmul.f32 1.442695, %v4527_v36 }
 0x325   : > { %v9091_v34 = vpop.eup %7080 }
 0x326   : > { %v4587_v62 = vmul.f32 1.442695, %v4535_v40  ;;  %4679 = vrot.lane.b32.xlu1 %v9091_v34, %s7220_s19  ;;  %v9098_v46 = vpop.eup %7082  ;;  %v4530_v40 = vsub.f32 %v8953_v25, %v4466_v11 }
 0x328   : > { %7084 = vpow2.f32 %v4587_v62  ;;  %4655 = vrot.lane.b32.xlu0 %v9098_v46, %s7220_s19  ;;  %v4577_v62 = vmul.f32 1.442695, %v4530_v40 }
 0x329   : > { %7086 = vpow2.f32 %v4563_v56 }
 0x32a   : > { %v4490_v16 = vpop.xlane.xlu0 %4489 }
 0x32b   : > { %v4487_v13 = vpop.xlane.xlu1 %4486 }
 0x32c   : > { %v4537_v17 = vsub.f32 %v8987_v22, %v4487_v13  ;;  %v4532_v13 = vsub.f32 %v8961_v21, %v4472_v8 }
 0x32e   : > { %v4591_v6 = vmul.f32 1.442695, %v4537_v17  ;;  %v4581_v30 = vmul.f32 1.442695, %v4532_v13 }
 0x330   : > { %7088 = vpow2.f32 %v4591_v6 }
 0x331   : > { %7090 = vpow2.f32 %v4569_v0  ;;  %v4534_v0 = vsub.f32 %v8969_v31, %v4478_v15 }
 0x332   : > { %7092 = vpow2.f32 %v4567_v37  ;;  %v9104_v45 = vpop.eup %7084 }
 0x333   : > { %v9106_v33 = vpop.eup %7086  ;;  %4683 = vrot.lane.b32.xlu1 %v9104_v45, %s7220_s19  ;;  %7094 = vpow2.f32 %v4573_v23  ;;  %v4585_v37 = vmul.f32 1.442695, %v4534_v0  ;;  %v4536_v23 = vsub.f32 %v8977_v50, %v4484_v35 }
 0x334   : > { %4659 = vrot.lane.b32.xlu0 %v9106_v33, %s7220_s19  ;;  %7096 = vpow2.f32 %v4571_v55  ;;  %v4538_v55 = vsub.f32 %v8985_v19, %v4490_v16 }
 0x335   : > { %7098 = vpow2.f32 %v4577_v62  ;;  %v4589_v62 = vmul.f32 1.442695, %v4536_v23 }
 0x336   : > { %7100 = vpow2.f32 %v4581_v30  ;;  %v4593_v0 = vmul.f32 1.442695, %v4538_v55 }
 0x337   : > { %7102 = vpow2.f32 %v4585_v37  ;;  %v4496_v15 = vpop.xlane.xlu0 %4495 }
 0x338   : > { %v4493_v11 = vpop.xlane.xlu1 %4492  ;;  %v4540_v30 = vsub.f32 %v8993_v59, %v4496_v15 }
 0x339   : > { %v4539_v36 = vsub.f32 %v8995_v14, %v4493_v11 }
 0x33a   : > { %v9113_v56 = vpop.eup %7088  ;;  %v4597_v16 = vmul.f32 1.442695, %v4540_v30 }
 0x33b   : > { %v9115_v44 = vpop.eup %7090  ;;  %4687 = vrot.lane.b32.xlu1 %v9113_v56, %s7220_s19  ;;  %v4595_v40 = vmul.f32 1.442695, %v4539_v36 }
 0x33c   : > { %4665 = vrot.lane.b32.xlu0 %v9115_v44, %s7220_s19  ;;  %v9122_v17 = vpop.eup %7092 }
 0x33d   : > { %v9127_v6 = vpop.eup %7094  ;;  %7104 = vpow2.f32 %v4595_v40 }
 0x33e   : > { %v9133_v8 = vpop.eup %7096  ;;  %7106 = vpow2.f32 %v4589_v62 }
 0x33f   : > { %v9138_v13 = vpop.eup %7098  ;;  %7108 = vpow2.f32 %v4593_v0 }
 0x340   : > { %4663 = vrot.lane.b32.xlu0 %v9122_v17, %s7220_s19  ;;  %v9143_v35 = vpop.eup %7100  ;;  %7110 = vpow2.f32 %v4597_v16 }
 0x341   : > { %v9147_v37 = vpop.eup %7102 }
 0x344   : > { %4669 = vrot.lane.b32.xlu0 %v9127_v6, %s7220_s19 }
 0x347   : > { %v9149_v11 = vpop.eup %7104 }
 0x348   : > { %4667 = vrot.lane.b32.xlu0 %v9133_v8, %s7220_s19  ;;  %4691 = vrot.lane.b32.xlu1 %v9149_v11, %s7220_s19  ;;  %v9155_v23 = vpop.eup %7106 }
 0x349   : > { %v9159_v36 = vpop.eup %7108 }
 0x34a   : > { %v9163_v55 = vpop.eup %7110 }
 0x34c   : > { %4673 = vrot.lane.b32.xlu0 %v9138_v13, %s7220_s19 }
 0x350   : > { %4677 = vrot.lane.b32.xlu0 %v9143_v35, %s7220_s19 }
 0x351   : > { %v4502_v40 = vpop.xlane.xlu0 %4501 }
 0x352   : > { %v4542_v15 = vsub.f32 %v9001_v9, %v4502_v40  ;;  %v4499_v62 = vpop.xlane.xlu1 %4498 }
 0x353   : > { %v4541_v0 = vsub.f32 %v9003_v63, %v4499_v62 }
 0x354   : > { %4681 = vrot.lane.b32.xlu0 %v9147_v37, %s7220_s19  ;;  %v4601_v30 = vmul.f32 1.442695, %v4542_v15 }
 0x355   : > { %v4599_v16 = vmul.f32 1.442695, %v4541_v0 }
 0x356   : > { %7112 = vpow2.f32 %v4601_v30 }
 0x357   : > { %7114 = vpow2.f32 %v4599_v16 }
 0x358   : > { %4685 = vrot.lane.b32.xlu0 %v9155_v23, %s7220_s19 }
 0x35c   : > { %4689 = vrot.lane.b32.xlu0 %v9159_v36, %s7220_s19 }
 0x360   : > { %4693 = vrot.lane.b32.xlu0 %v9163_v55, %s7220_s19  ;;  %v9169_v14 = vpop.eup %7112 }
 0x361   : > { %v9171_v59 = vpop.eup %7114 }
 0x362   : > { %4695 = vrot.lane.b32.xlu1 %v9171_v59, %s7220_s19 }
 0x364   : > { %4697 = vrot.lane.b32.xlu0 %v9169_v14, %s7220_s19 }
 0x36c   : > { %v4508_v40 = vpop.xlane.xlu0 %4507 }
 0x36d   : > { %v4544_v62 = vsub.f32 %v9009_v28, %v4508_v40  ;;  %v4505_v15 = vpop.xlane.xlu1 %4504 }
 0x36e   : > { %v4543_v63 = vsub.f32 %v9011_v29, %v4505_v15 }
 0x36f   : > { %v4605_v9 = vmul.f32 1.442695, %v4544_v62 }
 0x370   : > { %v4603_v0 = vmul.f32 1.442695, %v4543_v63 }
 0x371   : > { %7116 = vpow2.f32 %v4605_v9 }
 0x372   : > { %7118 = vpow2.f32 %v4603_v0 }
 0x37b   : > { %v9179_v30 = vpop.eup %7116 }
 0x37c   : > { %v9181_v16 = vpop.eup %7118  ;;  %4701 = vrot.lane.b32.xlu0 %v9179_v30, %s7220_s19 }
 0x37d   : > { %4699 = vrot.lane.b32.xlu1 %v9181_v16, %s7220_s19 }
 0x386   : > { %v4514_v50 = vpop.xlane.xlu1 %4513 }
 0x387   : > { %v4511_v22 = vpop.xlane.xlu0 %4510 }
 0x388   : > { %v4545_v40 = vsub.f32 %v9028_v4, %v4511_v22 }
 0x38a   : > { %v4607_v28 = vmul.f32 1.442695, %v4545_v40  ;;  %v4644_v40 = vpop.permute.xlu1 %4643 }
 0x38b   : > { %v4646_v19 = vpop.permute.xlu0 %4645 }
 0x38c   : > { %7120 = vpow2.f32 %v4607_v28  ;;  %v4742_v0 = vsel %vm289_vm6, %v4646_v19, 0.0 }
 0x38e   : > { %v4662_v21 = vpop.permute.xlu1 %4661 }
 0x38f   : > { %v4650_v62 = vpop.permute.xlu0 %4649 }
 0x390   : > { %v4748_v48 = vsel %vm289_vm6, %v4650_v62, 0.0 }
 0x393   : > { %v4648_v63 = vpop.permute.xlu0 %4647 }
 0x394   : > { %v4745_v22 = vsel %vm289_vm6, %v4648_v63, 0.0 }
 0x396   : > { %v9188_v9 = vpop.eup %7120 }
 0x397   : > { %4703 = vrot.lane.b32.xlu1 %v9188_v9, %s7220_s19  ;;  %v4654_v15 = vpop.permute.xlu0 %4653 }
 0x398   : > { %v4754_v4 = vsel %vm289_vm6, %v4654_v15, 0.0  ;;  %v4739_v15 = vsel %vm289_vm6, %v4644_v40, 0.0 }
 0x39b   : > { %v4652_v29 = vpop.permute.xlu0 %4651  ;;  %4743 = vadd.xlane.f32.xlu0 %v4742_v0  ;;  %v4766_v0 = vsel %vm289_vm6, %v4662_v21, 0.0  ;;  %v4546_v21 = vsub.f32 %v9026_v39, %v4514_v50 }
 0x39f   : > { %v4658_v1 = vpop.permute.xlu0 %4657  ;;  %4749 = vadd.xlane.f32.xlu0 %v4748_v48 }
 0x3a0   : > { %v4760_v26 = vsel %vm289_vm6, %v4658_v1, 0.0 }
 0x3a3   : > { %v4656_v28 = vpop.permute.xlu0 %4655  ;;  %4746 = vadd.xlane.f32.xlu0 %v4745_v22 }
 0x3a7   : > { %v4660_v31 = vpop.permute.xlu0 %4659  ;;  %4755 = vadd.xlane.f32.xlu0 %v4754_v4 }
 0x3ab   : > { %4761 = vadd.xlane.f32.xlu0 %v4760_v26  ;;  %v4751_v26 = vsel %vm289_vm6, %v4652_v29, 0.0 }
 0x3ae   : > { %v4666_v19 = vpop.permute.xlu0 %4665 }
 0x3af   : > { %4767 = vadd.xlane.f32.xlu0 %v4766_v0  ;;  %v4772_v48 = vsel %vm289_vm6, %v4666_v19, 0.0  ;;  %v4757_v19 = vsel %vm289_vm6, %v4656_v28, 0.0  ;;  %v4609_v0 = vmul.f32 1.442695, %v4546_v21 }
 0x3b1   : > { %7122 = vpow2.f32 %v4609_v0 }
 0x3b2   : > { %v4664_v62 = vpop.permute.xlu0 %4663 }
 0x3b3   : > { %4773 = vadd.xlane.f32.xlu0 %v4772_v48  ;;  %v4769_v40 = vsel %vm289_vm6, %v4664_v62, 0.0 }
 0x3b6   : > { %v4670_v24 = vpop.permute.xlu0 %4669 }
 0x3b7   : > { %v4778_v63 = vsel %vm289_vm6, %v4670_v24, 0.0  ;;  %v4763_v24 = vsel %vm289_vm6, %v4660_v31, 0.0 }
 0x3b8   : > { %4779 = vadd.xlane.f32.xlu0 %v4778_v63  ;;  %v4672_v63 = vpop.permute.xlu1 %4671 }
 0x3b9   : > { %v4781_v50 = vsel %vm289_vm6, %v4672_v63, 0.0 }
 0x3ba   : > { %v4668_v22 = vpop.permute.xlu0 %4667 }
 0x3bb   : > { %4740 = vadd.xlane.f32.xlu1 %v4739_v15  ;;  %v4775_v48 = vsel %vm289_vm6, %v4668_v22, 0.0  ;;  %v9208_v29 = vpop.eup %7122 }
 0x3be   : > { %v4674_v4 = vpop.permute.xlu0 %4673 }
 0x3bf   : > { %v4784_v1 = vsel %vm289_vm6, %v4674_v4, 0.0  ;;  %4752 = vadd.xlane.f32.xlu1 %v4751_v26  ;;  %v4676_v4 = vpop.permute.xlu1 %4675 }
 0x3c0   : > { %4785 = vadd.xlane.f32.xlu0 %v4784_v1  ;;  %v4787_v31 = vsel %vm289_vm6, %v4676_v4, 0.0 }
 0x3c2   : > { %v4678_v15 = vpop.permute.xlu0 %4677 }
 0x3c3   : > { %4758 = vadd.xlane.f32.xlu1 %v4757_v19  ;;  %v4680_v1 = vpop.permute.xlu1 %4679 }
 0x3c4   : > { %v4793_v62 = vsel %vm289_vm6, %v4680_v1, 0.0 }
 0x3c6   : > { %v4682_v28 = vpop.permute.xlu0 %4681 }
 0x3c7   : > { %4764 = vadd.xlane.f32.xlu1 %v4763_v24  ;;  %v4796_v26 = vsel %vm289_vm6, %v4682_v28, 0.0  ;;  %v4684_v28 = vpop.permute.xlu1 %4683 }
 0x3c8   : > { %v4799_v1 = vsel %vm289_vm6, %v4684_v28, 0.0 }
 0x3ca   : > { %v4686_v22 = vpop.permute.xlu0 %4685 }
 0x3cb   : > { %4770 = vadd.xlane.f32.xlu1 %v4769_v40  ;;  %v4802_v21 = vsel %vm289_vm6, %v4686_v22, 0.0 }
 0x3ce   : > { %v4690_v19 = vpop.permute.xlu0 %4689 }
 0x3cf   : > { %4776 = vadd.xlane.f32.xlu1 %v4775_v48  ;;  %v4808_v0 = vsel %vm289_vm6, %v4690_v19, 0.0 }
 0x3d2   : > { %v4694_v24 = vpop.permute.xlu0 %4693 }
 0x3d3   : > { %4782 = vadd.xlane.f32.xlu1 %v4781_v50  ;;  %v4814_v40 = vsel %vm289_vm6, %v4694_v24, 0.0 }
 0x3d6   : > { %4705 = vrot.lane.b32.xlu0 %v9208_v29, %s7220_s19  ;;  %v4698_v48 = vpop.permute.xlu0 %4697 }
 0x3d7   : > { %4788 = vadd.xlane.f32.xlu1 %v4787_v31  ;;  %v4820_v63 = vsel %vm289_vm6, %v4698_v48, 0.0  ;;  %v4790_v31 = vsel %vm289_vm6, %v4678_v15, 0.0 }
 0x3db   : > { %4794 = vadd.xlane.f32.xlu1 %v4793_v62  ;;  %v4688_v62 = vpop.permute.xlu1 %4687 }
 0x3dc   : > { %v4805_v22 = vsel %vm289_vm6, %v4688_v62, 0.0 }
 0x3df   : > { %4797 = vadd.xlane.f32.xlu1 %v4796_v26  ;;  %v4692_v26 = vpop.permute.xlu1 %4691 }
 0x3e3   : > { %4803 = vadd.xlane.f32.xlu1 %v4802_v21  ;;  %v4811_v21 = vsel %vm289_vm6, %v4692_v26, 0.0  ;;  %v4696_v19 = vpop.permute.xlu1 %4695 }
 0x3e7   : > { %4809 = vadd.xlane.f32.xlu1 %v4808_v0  ;;  %v4817_v0 = vsel %vm289_vm6, %v4696_v19, 0.0 }
 0x3eb   : > { %4815 = vadd.xlane.f32.xlu1 %v4814_v40 }
 0x3ee   : > { %v4702_v50 = vpop.permute.xlu0 %4701 }
 0x3ef   : > { %4821 = vadd.xlane.f32.xlu1 %v4820_v63  ;;  %v4826_v4 = vsel %vm289_vm6, %v4702_v50, 0.0  ;;  %v4700_v24 = vpop.permute.xlu1 %4699 }
 0x3f0   : > { %v4823_v15 = vsel %vm289_vm6, %v4700_v24, 0.0 }
 0x3f3   : > { %4827 = vadd.xlane.f32.xlu1 %v4826_v4 }
 0x3f5   : > { %4791 = vadd.xlane.f32.xlu0 %v4790_v31 }
 0x3f9   : > { %4800 = vadd.xlane.f32.xlu0 %v4799_v1 }
 0x3fd   : > { %4806 = vadd.xlane.f32.xlu0 %v4805_v22 }
 0x401   : > { %4812 = vadd.xlane.f32.xlu0 %v4811_v21 }
 0x405   : > { %4818 = vadd.xlane.f32.xlu0 %v4817_v0 }
 0x409   : > { %4824 = vadd.xlane.f32.xlu0 %v4823_v15  ;;  %v4704_v40 = vpop.permute.xlu1 %4703 }
 0x40a   : > { %v4829_v48 = vsel %vm289_vm6, %v4704_v40, 0.0 }
 0x40b   : > { %4830 = vadd.xlane.f32.xlu1 %v4829_v48 }
 0x428   : > { %v4744_v63 = vpop.xlane.xlu0 %4743 }
 0x429   : > { %7124 = vrcp.f32 %v4744_v63 }
 0x42c   : > { %v4750_v50 = vpop.xlane.xlu0 %4749 }
 0x42d   : > { %7126 = vrcp.f32 %v4750_v50 }
 0x430   : > { %v4747_v4 = vpop.xlane.xlu0 %4746 }
 0x433   : > { %v7125_v31 = vpop.eup %7124 }
 0x434   : > { %v4756_v28 = vpop.xlane.xlu0 %4755  ;;  %v4838_v1 = vmul.f32 %v7125_v31, %v9048_v27 }
 0x436   : > { %4934 = vrot.lane.b32.xlu1 %v4838_v1, %s7220_s19 }
 0x437   : > { %v7127_v62 = vpop.eup %7126 }
 0x438   : > { %v4762_v22 = vpop.xlane.xlu0 %4761  ;;  %v4842_v26 = vmul.f32 %v7127_v62, %v9059_v42 }
 0x43a   : > { %4938 = vrot.lane.b32.xlu1 %v4842_v26, %s7220_s19 }
 0x43c   : > { %v4768_v21 = vpop.xlane.xlu0 %4767 }
 0x440   : > { %v4774_v19 = vpop.xlane.xlu0 %4773 }
 0x445   : > { %v4780_v0 = vpop.xlane.xlu0 %4779 }
 0x448   : > { %v4741_v24 = vpop.xlane.xlu1 %4740 }
 0x44c   : > { %v4753_v40 = vpop.xlane.xlu1 %4752 }
 0x44d   : > { %v9232_v15 = vpop.xlane.xlu0 %4785  ;;  %7128 = vrcp.f32 %v4753_v40 }
 0x450   : > { %v4759_v27 = vpop.xlane.xlu1 %4758 }
 0x451   : > { %v4706_v48 = vpop.permute.xlu0 %4705  ;;  %7130 = vrcp.f32 %v4759_v27 }
 0x452   : > { %v4832_v63 = vsel %vm289_vm6, %v4706_v48, 0.0 }
 0x453   : > { %4833 = vadd.xlane.f32.xlu0 %v4832_v63 }
 0x454   : > { %v4765_v50 = vpop.xlane.xlu1 %4764 }
 0x455   : > { %7132 = vrcp.f32 %v4765_v50 }
 0x456   : > { %7134 = vrcp.f32 %v4741_v24 }
 0x457   : > { %v7129_v31 = vpop.eup %7128 }
 0x458   : > { %v4771_v42 = vpop.xlane.xlu1 %4770  ;;  %v4844_v1 = vmul.f32 %v7129_v31, %v9082_v41 }
 0x459   : > { %7136 = vrcp.f32 %v4771_v42 }
 0x45a   : > { %4940 = vrot.lane.b32.xlu1 %v4844_v1, %s7220_s19  ;;  %7138 = vrcp.f32 %v4747_v4 }
 0x45b   : > { %v7131_v62 = vpop.eup %7130 }
 0x45c   : > { %v4777_v26 = vpop.xlane.xlu1 %4776  ;;  %v4848_v40 = vmul.f32 %v7131_v62, %v9098_v46 }
 0x45d   : > { %7140 = vrcp.f32 %v4777_v26 }
 0x45e   : > { %4944 = vrot.lane.b32.xlu1 %v4848_v40, %s7220_s19  ;;  %7142 = vrcp.f32 %v4756_v28 }
 0x45f   : > { %v7133_v48 = vpop.eup %7132 }
 0x460   : > { %v4783_v63 = vpop.xlane.xlu1 %4782  ;;  %v4852_v27 = vmul.f32 %v7133_v48, %v9106_v33  ;;  %v7135_v24 = vpop.eup %7134 }
 0x461   : > { %7144 = vrcp.f32 %v4783_v63  ;;  %v4836_v31 = vmul.f32 %v7135_v24, %v9039_v61 }
 0x462   : > { %4948 = vrot.lane.b32.xlu1 %v4852_v27, %s7220_s19  ;;  %7146 = vrcp.f32 %v4762_v22  ;;  %v4899_v22 = vld [vmem:[%s9448_s2] sm:$0xf] }
 0x463   : > { %v7137_v41 = vpop.eup %7136  ;;  %6280 = vmatprep.subr.msk.mxu1 %vm4190_vm15, %v4899_v22 }
 0x464   : > { %v4789_v50 = vpop.xlane.xlu1 %4788  ;;  %v4856_v4 = vmul.f32 %v7137_v41, %v9122_v17  ;;  %v7139_v46 = vpop.eup %7138  ;;  %6281 = vmatpush3.msk.msra.mxu1 %vm4190_vm15, %v4899_v22 }
 0x465   : > { %7148 = vrcp.f32 %v4789_v50  ;;  %v4840_v1 = vmul.f32 %v7139_v46, %v9066_v47 }
 0x466   : > { %4952 = vrot.lane.b32.xlu1 %v4856_v4, %s7220_s19  ;;  %7150 = vrcp.f32 %v4768_v21 }
 0x467   : > { %v7141_v28 = vpop.eup %7140 }
 0x468   : > { %v4795_v33 = vpop.xlane.xlu1 %4794  ;;  %v4860_v42 = vmul.f32 %v7141_v28, %v9133_v8  ;;  %v7143_v17 = vpop.eup %7142 }
 0x469   : > { %4932 = vrot.lane.b32.xlu0 %v4836_v31, %s7220_s19  ;;  %7152 = vrcp.f32 %v4795_v33  ;;  %v4846_v47 = vmul.f32 %v7143_v17, %v9074_v7 }
 0x46a   : > { %4956 = vrot.lane.b32.xlu1 %v4860_v42, %s7220_s19  ;;  %7154 = vrcp.f32 %v4774_v19 }
 0x46b   : > { %v7145_v61 = vpop.eup %7144  ;;  %7156 = vrcp.f32 %v4780_v0 }
 0x46c   : > { %v4864_v8 = vmul.f32 %v7145_v61, %v9052_v32  ;;  %v7147_v21 = vpop.eup %7146  ;;  %7158 = vrcp.f32 %v9232_v15 }
 0x46d   : > { %4936 = vrot.lane.b32.xlu0 %v4840_v1, %s7220_s19  ;;  %v4850_v40 = vmul.f32 %v7147_v21, %v9089_v12 }
 0x46e   : > { %4960 = vrot.lane.b32.xlu1 %v4864_v8, %s7220_s19 }
 0x46f   : > { %v7149_v62 = vpop.eup %7148 }
 0x470   : > { %v4868_v26 = vmul.f32 %v7149_v62, %v9072_v54  ;;  %v7151_v48 = vpop.eup %7150  ;;  %v4798_v54 = vpop.xlane.xlu1 %4797 }
 0x471   : > { %4942 = vrot.lane.b32.xlu0 %v4846_v47, %s7220_s19  ;;  %v4854_v7 = vmul.f32 %v7151_v48, %v9045_v10 }
 0x472   : > { %4964 = vrot.lane.b32.xlu1 %v4868_v26, %s7220_s19 }
 0x473   : > { %v7153_v19 = vpop.eup %7152 }
 0x474   : > { %v4872_v32 = vmul.f32 %v7153_v19, %v9091_v34  ;;  %v7155_v63 = vpop.eup %7154  ;;  %v4804_v41 = vpop.xlane.xlu1 %4803 }
 0x475   : > { %4946 = vrot.lane.b32.xlu0 %v4850_v40, %s7220_s19  ;;  %v4858_v12 = vmul.f32 %v7155_v63, %v9115_v44  ;;  %v7157_v0 = vpop.eup %7156 }
 0x476   : > { %4968 = vrot.lane.b32.xlu1 %v4872_v32, %s7220_s19  ;;  %v4862_v27 = vmul.f32 %v7157_v0, %v9127_v6  ;;  %v7159_v24 = vpop.eup %7158 }
 0x477   : > { %v4866_v10 = vmul.f32 %v7159_v24, %v9138_v13 }
 0x478   : > { %v4810_v15 = vpop.xlane.xlu1 %4809 }
 0x479   : > { %4950 = vrot.lane.b32.xlu0 %v4854_v7, %s7220_s19 }
 0x47c   : > { %v4816_v4 = vpop.xlane.xlu1 %4815 }
 0x47d   : > { %4954 = vrot.lane.b32.xlu0 %v4858_v12, %s7220_s19 }
 0x480   : > { %v4822_v33 = vpop.xlane.xlu1 %4821 }
 0x481   : > { %4958 = vrot.lane.b32.xlu0 %v4862_v27, %s7220_s19 }
 0x482   : > { %v4792_v34 = vpop.xlane.xlu0 %4791 }
 0x483   : > { %7160 = vrcp.f32 %v4792_v34 }
 0x484   : > { %7162 = vrcp.f32 %v4798_v54 }
 0x485   : > { %4962 = vrot.lane.b32.xlu0 %v4866_v10, %s7220_s19 }
 0x486   : > { %v4801_v50 = vpop.xlane.xlu0 %4800 }
 0x487   : > { %7164 = vrcp.f32 %v4801_v50 }
 0x488   : > { %7166 = vrcp.f32 %v4804_v41 }
 0x48a   : > { %v4807_v44 = vpop.xlane.xlu0 %4806 }
 0x48b   : > { %7168 = vrcp.f32 %v4807_v44 }
 0x48c   : > { %7170 = vrcp.f32 %v4810_v15 }
 0x48d   : > { %v7161_v31 = vpop.eup %7160 }
 0x48e   : > { %v4813_v6 = vpop.xlane.xlu0 %4812  ;;  %v4870_v46 = vmul.f32 %v7161_v31, %v9143_v35  ;;  %v7163_v28 = vpop.eup %7162 }
 0x48f   : > { %7172 = vrcp.f32 %v4813_v6  ;;  %v4874_v1 = vmul.f32 %v7163_v28, %v9147_v37  ;;  %v4828_v35 = vpop.xlane.xlu1 %4827 }
 0x490   : > { %4966 = vrot.lane.b32.xlu0 %v4870_v46, %s7220_s19  ;;  %7174 = vrcp.f32 %v4816_v4 }
 0x491   : > { %v7165_v13 = vpop.eup %7164 }
 0x492   : > { %v4819_v42 = vpop.xlane.xlu0 %4818  ;;  %v4876_v22 = vmul.f32 %v7165_v13, %v9104_v45  ;;  %v7167_v17 = vpop.eup %7166 }
 0x493   : > { %7176 = vrcp.f32 %v4819_v42  ;;  %v4878_v47 = vmul.f32 %v7167_v17, %v9155_v23 }
 0x494   : > { %4970 = vrot.lane.b32.xlu0 %v4874_v1, %s7220_s19  ;;  %4972 = vrot.lane.b32.xlu1 %v4876_v22, %s7220_s19  ;;  %7178 = vrcp.f32 %v4822_v33 }
 0x495   : > { %v7169_v61 = vpop.eup %7168 }
 0x496   : > { %v4825_v8 = vpop.xlane.xlu0 %4824  ;;  %v4880_v21 = vmul.f32 %v7169_v61, %v9113_v56  ;;  %v7171_v62 = vpop.eup %7170 }
 0x497   : > { %7180 = vrcp.f32 %v4825_v8  ;;  %v4882_v37 = vmul.f32 %v7171_v62, %v9159_v36 }
 0x498   : > { %4974 = vrot.lane.b32.xlu0 %v4878_v47, %s7220_s19  ;;  %4976 = vrot.lane.b32.xlu1 %v4880_v21, %s7220_s19  ;;  %7182 = vrcp.f32 %v4828_v35  ;;  %v4831_v48 = vpop.xlane.xlu1 %4830 }
 0x499   : > { %v7173_v45 = vpop.eup %7172  ;;  %7184 = vrcp.f32 %v4831_v48 }
 0x49a   : > { %v4884_v26 = vmul.f32 %v7173_v45, %v9149_v11  ;;  %v7175_v40 = vpop.eup %7174 }
 0x49b   : > { %v4886_v23 = vmul.f32 %v7175_v40, %v9163_v55 }
 0x49c   : > { %4978 = vrot.lane.b32.xlu0 %v4882_v37, %s7220_s19  ;;  %4980 = vrot.lane.b32.xlu1 %v4884_v26, %s7220_s19 }
 0x49d   : > { %v7177_v56 = vpop.eup %7176 }
 0x49e   : > { %v4888_v19 = vmul.f32 %v7177_v56, %v9171_v59  ;;  %v7179_v32 = vpop.eup %7178 }
 0x49f   : > { %v4890_v11 = vmul.f32 %v7179_v32, %v9169_v14 }
 0x4a0   : > { %4982 = vrot.lane.b32.xlu0 %v4886_v23, %s7220_s19  ;;  %4984 = vrot.lane.b32.xlu1 %v4888_v19, %s7220_s19  ;;  %v9338_v19 = vld [vmem:[%s9449_s3] sm:$0xff] }
 0x4a1   : > { %v7181_v36 = vpop.eup %7180 }
 0x4a2   : > { %v4892_v7 = vmul.f32 %v7181_v36, %v9181_v16  ;;  %v7183_v63 = vpop.eup %7182 }
 0x4a3   : > { %v7185_v54 = vpop.eup %7184  ;;  %v4894_v55 = vmul.f32 %v7183_v63, %v9179_v30 }
 0x4a4   : > { %4986 = vrot.lane.b32.xlu0 %v4890_v11, %s7220_s19  ;;  %4988 = vrot.lane.b32.xlu1 %v4892_v7, %s7220_s19  ;;  %v4896_v59 = vmul.f32 %v7185_v54, %v9188_v9 }
 0x4a8   : > { %4990 = vrot.lane.b32.xlu0 %v4894_v55, %s7220_s19  ;;  %4992 = vrot.lane.b32.xlu1 %v4896_v59, %s7220_s19  ;;  %v4935_v12 = vpop.permute.xlu1 %4934 }
 0x4ac   : > { %v4939_v0 = vpop.permute.xlu1 %4938 }
 0x4cc   : > { %v4941_v27 = vpop.permute.xlu1 %4940 }
 0x4d0   : > { %v4945_v14 = vpop.permute.xlu1 %4944 }
 0x4d4   : > { %v4949_v16 = vpop.permute.xlu1 %4948 }
 0x4d8   : > { %v4953_v30 = vpop.permute.xlu1 %4952 }
 0x4dc   : > { %v4957_v50 = vpop.permute.xlu1 %4956 }
 0x4e0   : > { %v4834_v24 = vpop.xlane.xlu0 %4833  ;;  %v4961_v31 = vpop.permute.xlu1 %4960 }
 0x4e1   : > { %7186 = vrcp.f32 %v4834_v24 }
 0x4e4   : > { %v4933_v41 = vpop.permute.xlu0 %4932 }
 0x4e5   : > { %6282 = vmatprep.mubr.msk.f32.mxu1 %vm289_vm6, %v4933_v41 }
 0x4e6   : > { %6283 = vmatmul.mubr.msk.f32.vlgmr.msra.gmra.mrb[0].mxu1 %vm289_vm6, %v4935_v12 }
 0x4e8   : > { %v4937_v34 = vpop.permute.xlu0 %4936 }
 0x4e9   : > { %6285 = vmatprep.mubr.msk.f32.mxu1 %vm289_vm6, %v4937_v34 }
 0x4ea   : > { %6286 = vmatmul.mubr.msk.f32.gmra.mrb[2].mxu1 %vm289_vm6, %v4939_v0 }
 0x4eb   : > { %v7187_v9 = vpop.eup %7186  ;;  %6288 = vmatprep.mubr.msk.f32.mxu1 %vm289_vm6, %v4941_v27 }
 0x4ec   : > { %v4943_v10 = vpop.permute.xlu0 %4942  ;;  %v4898_v15 = vmul.f32 %v7187_v9, %v9208_v29  ;;  %v4965_v29 = vpop.permute.xlu1 %4964 }
 0x4ee   : > { %4994 = vrot.lane.b32.xlu0 %v4898_v15, %s7220_s19  ;;  %6289 = vmatmul.mubr.msk.f32.gmra.mrb[4].mxu1 %vm289_vm6, %v4943_v10 }
 0x4ef   : > { %6291 = vmatprep.mubr.msk.f32.mxu1 %vm289_vm6, %v4945_v14 }
 0x4f0   : > { %v4947_v44 = vpop.permute.xlu0 %4946  ;;  %v4969_v13 = vpop.permute.xlu1 %4968 }
 0x4f2   : > { %6292 = vmatmul.mubr.msk.f32.gmra.mrb[6].mxu1 %vm289_vm6, %v4947_v44 }
 0x4f3   : > { %6294 = vmatprep.mubr.msk.f32.mxu1 %vm289_vm6, %v4949_v16 }
 0x4f4   : > { %v4951_v4 = vpop.permute.xlu0 %4950 }
 0x4f6   : > { %6295 = vmatmul.mubr.msk.f32.gmra.mrb[8].mxu1 %vm289_vm6, %v4951_v4 }
 0x4f7   : > { %6297 = vmatprep.mubr.msk.f32.mxu1 %vm289_vm6, %v4953_v30 }
 0x4f8   : > { %v4955_v6 = vpop.permute.xlu0 %4954 }
 0x4fa   : > { %6298 = vmatmul.mubr.msk.f32.gmra.mrb[10].mxu1 %vm289_vm6, %v4955_v6  ;;  %v9487_v6 = vld [vmem:[#allocation3_spill] sm:$0xff] }
 0x4fb   : > { %6300 = vmatprep.mubr.msk.f32.mxu1 %vm289_vm6, %v4957_v50 }
 0x4fc   : > { %v4959_v46 = vpop.permute.xlu0 %4958 }
 0x4fe   : > { %6301 = vmatmul.mubr.msk.f32.gmra.mrb[12].mxu1 %vm289_vm6, %v4959_v46 }
 0x4ff   : > { %6303 = vmatprep.mubr.msk.f32.mxu1 %vm289_vm6, %v4961_v31 }
 0x500   : > { %v4963_v28 = vpop.permute.xlu0 %4962 }
 0x502   : > { %6304 = vmatmul.mubr.msk.f32.gmra.mrb[14].mxu1 %vm289_vm6, %v4963_v28 }
 0x503   : > { %6306 = vmatprep.mubr.msk.f32.mxu1 %vm289_vm6, %v4965_v29 }
 0x504   : > { %v4967_v33 = vpop.permute.xlu0 %4966 }
 0x506   : > { %v4973_v42 = vpop.permute.xlu1 %4972  ;;  %6307 = vmatmul.mubr.msk.f32.gmra.mrb[16].mxu1 %vm289_vm6, %v4967_v33 }
 0x507   : > { %6309 = vmatprep.mubr.msk.f32.mxu1 %vm289_vm6, %v4969_v13 }
 0x508   : > { %v4971_v1 = vpop.permute.xlu0 %4970 }
 0x50a   : > { %v4977_v22 = vpop.permute.xlu1 %4976  ;;  %6310 = vmatmul.mubr.msk.f32.gmra.mrb[18].mxu1 %vm289_vm6, %v4971_v1 }
 0x50b   : > { %6312 = vmatprep.mubr.msk.f32.mxu1 %vm289_vm6, %v4973_v42 }
 0x50c   : > { %v4975_v17 = vpop.permute.xlu0 %4974 }
 0x50e   : > { %v4981_v61 = vpop.permute.xlu1 %4980  ;;  %6313 = vmatmul.mubr.msk.f32.gmra.mrb[20].mxu1 %vm289_vm6, %v4975_v17 }
 0x50f   : > { %6315 = vmatprep.mubr.msk.f32.mxu1 %vm289_vm6, %v4977_v22  ;;  %v9492_v22 = vld [vmem:[#allocation6_spill] sm:$0xff] }
 0x510   : > { %v4979_v35 = vpop.permute.xlu0 %4978 }
 0x512   : > { %v4985_v8 = vpop.permute.xlu1 %4984  ;;  %6316 = vmatmul.mubr.msk.f32.gmra.mrb[22].mxu1 %vm289_vm6, %v4979_v35 }
 0x513   : > { %6318 = vmatprep.mubr.msk.f32.mxu1 %vm289_vm6, %v4981_v61  ;;  %v9493_v61 = vld [vmem:[#allocation7_spill] sm:$0xff] }
 0x514   : > { %v4983_v47 = vpop.permute.xlu0 %4982 }
 0x516   : > { %6319 = vmatmul.mubr.msk.f32.gmra.mrb[24].mxu1 %vm289_vm6, %v4983_v47  ;;  %v4989_v21 = vpop.permute.xlu1 %4988 }
 0x517   : > { %6321 = vmatprep.mubr.msk.f32.mxu1 %vm289_vm6, %v4985_v8 }
 0x518   : > { %v4987_v62 = vpop.permute.xlu0 %4986 }
 0x51a   : > { %6322 = vmatmul.mubr.msk.f32.gmra.mrb[26].mxu1 %vm289_vm6, %v4987_v62  ;;  %v4993_v37 = vpop.permute.xlu1 %4992 }
 0x51b   : > { %6324 = vmatprep.mubr.msk.f32.mxu1 %vm289_vm6, %v4989_v21  ;;  %v9494_v21 = vld [vmem:[#allocation8_spill] sm:$0xff] }
 0x51c   : > { %v4991_v45 = vpop.permute.xlu0 %4990 }
 0x51e   : > { %6325 = vmatmul.mubr.msk.f32.gmra.mrb[28].mxu1 %vm289_vm6, %v4991_v45 }
 0x51f   : > { %6327 = vmatprep.mubr.msk.f32.mxu1 %vm289_vm6, %v4993_v37  ;;  %v9495_v37 = vld [vmem:[#allocation9_spill] sm:$0xff] }
 0x560   : > { %v4995_v26 = vpop.permute.xlu0 %4994 }
 0x561   : > { %6328 = vmatmul.mubr.msk.f32.gmra.mrb[30].mxu1 %vm289_vm6, %v4995_v26 }
 0x562   : > { %6220 = vmatprep.mubr.msk.f32.mxu1 %vm5321_vm1, %v9338_v19 }
 0x5b9   : > { %v6284_v40 = vpop.f32.mrb[0].mxu1 }
 0x5ba   : > { %v5289_v48 = vmul.f32 %v6284_v40, %v8831_v49  ;;  %v5129_v56 = vpop.f32.mrb[1].mxu1 }
 0x5bb   : > { %v5288_v23 = vmul.f32 %v5129_v56, %v8833_v60  ;;  %v9496_v56 = vld [vmem:[#allocation10_spill] sm:$0xff] }
 0x5bd   : > { %v6341_v32 = vpack.c.bf16 %v5289_v48, %v5288_v23  ;;  %v6287_v36 = vpop.f32.mrb[2].mxu1 }
 0x5be   : > { %v5291_v11 = vmul.f32 %v6287_v36, %v8845_v52  ;;  %v5139_v7 = vpop.f32.mrb[3].mxu1 }
 0x5bf   : > { %v5290_v63 = vmul.f32 %v5139_v7, %v8849_v18 }
 0x5c1   : > { %v6347_v49 = vpack.c.bf16 %v5291_v11, %v5290_v63  ;;  %v6290_v54 = vpop.f32.mrb[4].mxu1  ;;  %v9497_v11 = vld [vmem:[#allocation11_spill] sm:$0xff] }
 0x5c2   : > { %v9345_v60 = vmul.f32 %v6290_v54, %v8875_v51  ;;  %v5149_v55 = vpop.f32.mrb[5].mxu1  ;;  %v9498_v54 = vld [vmem:[#allocation12_spill] sm:$0xff] }
 0x5c3   : > { %v9348_v59 = vmul.f32 %v5149_v55, %v8877_v5 }
 0x5c5   : > { %v6353_v12 = vpack.c.bf16 %v9345_v60, %v9348_v59  ;;  %v6293_v0 = vpop.f32.mrb[6].mxu1  ;;  %v9499_v59 = vld [vmem:[#allocation13_spill] sm:$0xff] }
 0x5c6   : > { %v9353_v27 = vmul.f32 %v6293_v0, %v8899_v38  ;;  %v5159_v52 = vpop.f32.mrb[7].mxu1 }
 0x5c7   : > { %v9356_v14 = vmul.f32 %v5159_v52, %v8903_v43 }
 0x5c9   : > { %v6359_v18 = vpack.c.bf16 %v9353_v27, %v9356_v14  ;;  %v6296_v51 = vpop.f32.mrb[8].mxu1 }
 0x5ca   : > { %v9361_v24 = vmul.f32 %v6296_v51, %v8927_v57  ;;  %v5169_v5 = vpop.f32.mrb[9].mxu1 }
 0x5cb   : > { %v9364_v16 = vmul.f32 %v5169_v5, %v8929_v58 }
 0x5cd   : > { %v6365_v41 = vpack.c.bf16 %v9361_v24, %v9364_v16  ;;  %v6299_v38 = vpop.f32.mrb[10].mxu1  ;;  %v9500_v24 = vld [vmem:[#allocation14_spill] sm:$0xff] }
 0x5ce   : > { %v5299_v34 = vmul.f32 %v6299_v38, %v8937_v3  ;;  %v5179_v30 = vpop.f32.mrb[11].mxu1  ;;  %v9488_v3 = vld [vmem:[#allocation4_spill] sm:$0xff]  ;;  %v9501_v38 = vld [vmem:[#allocation15_spill] sm:$0xff] }
 0x5cf   : > { %v5298_v43 = vmul.f32 %v5179_v30, %v8939_v53  ;;  %v9489_v53 = vld [vmem:[#allocation5_spill] sm:$0xff] }
 0x5d1   : > { %v6371_v9 = vpack.c.bf16 %v5299_v34, %v5298_v43  ;;  %v6302_v10 = vpop.f32.mrb[12].mxu1  ;;  %v9502_v43 = vld [vmem:[#allocation16_spill] sm:$0xff] }
 0x5d2   : > { %v5301_v15 = vmul.f32 %v6302_v10, %v8945_v2  ;;  %v5189_v50 = vpop.f32.mrb[13].mxu1 }
 0x5d3   : > { %v5300_v57 = vmul.f32 %v5189_v50, %v8947_v20  ;;  %v9503_v50 = vld [vmem:[#allocation17_spill] sm:$0xff] }
 0x5d5   : > { %v6377_v44 = vpack.c.bf16 %v5301_v15, %v5300_v57  ;;  %v6305_v4 = vpop.f32.mrb[14].mxu1 }
 0x5d6   : > { %v5303_v58 = vmul.f32 %v6305_v4, %v8953_v25  ;;  %v5199_v31 = vpop.f32.mrb[15].mxu1 }
 0x5d7   : > { %v5302_v29 = vmul.f32 %v5199_v31, %v9487_v6 }
 0x5d9   : > { %v6383_v46 = vpack.c.bf16 %v5303_v58, %v5302_v29  ;;  %v6308_v28 = vpop.f32.mrb[16].mxu1 }
 0x5da   : > { %v5305_v13 = vmul.f32 %v6308_v28, %v9488_v3  ;;  %v5209_v33 = vpop.f32.mrb[17].mxu1 }
 0x5db   : > { %v5304_v42 = vmul.f32 %v5209_v33, %v9489_v53 }
 0x5dd   : > { %v6338_v20 = vpack.c.bf16 %v5305_v13, %v5304_v42  ;;  %v6311_v1 = vpop.f32.mrb[18].mxu1 }
 0x5de   : > { %v5307_v25 = vmul.f32 %v6311_v1, %v9492_v22  ;;  %v5219_v17 = vpop.f32.mrb[19].mxu1 }
 0x5df   : > { %v5306_v35 = vmul.f32 %v5219_v17, %v9493_v61  ;;  %6340 = vmatprep.subr.msk.bf16.mxu1 %vm9378_vm2, %v6338_v20 }
 0x5e0   : > { %6343 = vmatpush3.bf16.xpose.msk.msra.mxu1 %vm9378_vm2, %v6341_v32 }
 0x5e1   : > { %v6344_v8 = vpack.c.bf16 %v5307_v25, %v5306_v35  ;;  %v6314_v47 = vpop.f32.mrb[20].mxu1 }
 0x5e2   : > { %v5309_v62 = vmul.f32 %v6314_v47, %v9494_v21  ;;  %v5229_v45 = vpop.f32.mrb[21].mxu1 }
 0x5e3   : > { %v5308_v26 = vmul.f32 %v5229_v45, %v9495_v37  ;;  %6346 = vmatprep.subr.msk.bf16.mxu1 %vm9378_vm2, %v6344_v8 }
 0x5e5   : > { %v6350_v40 = vpack.c.bf16 %v5309_v62, %v5308_v26  ;;  %v6317_v48 = vpop.f32.mrb[22].mxu1 }
 0x5e6   : > { %v5311_v23 = vmul.f32 %v6317_v48, %v9496_v56  ;;  %v5239_v36 = vpop.f32.mrb[23].mxu1 }
 0x5e7   : > { %v5310_v7 = vmul.f32 %v5239_v36, %v9497_v11 }
 0x5e8   : > { %6349 = vmatpush3.bf16.xpose.msk.msra.mxu1 %vm9378_vm2, %v6347_v49 }
 0x5e9   : > { %v6356_v32 = vpack.c.bf16 %v5311_v23, %v5310_v7  ;;  %v6320_v63 = vpop.f32.mrb[24].mxu1  ;;  %6352 = vmatprep.subr.msk.bf16.mxu1 %vm9378_vm2, %v6350_v40 }
 0x5ea   : > { %v5313_v60 = vmul.f32 %v6320_v63, %v9498_v54  ;;  %v5249_v55 = vpop.f32.mrb[25].mxu1 }
 0x5eb   : > { %v5312_v0 = vmul.f32 %v5249_v55, %v9499_v59 }
 0x5ed   : > { %v6362_v52 = vpack.c.bf16 %v5313_v60, %v5312_v0  ;;  %v6323_v51 = vpop.f32.mrb[26].mxu1 }
 0x5ee   : > { %v5315_v5 = vmul.f32 %v6323_v51, %v9500_v24  ;;  %v5259_v16 = vpop.f32.mrb[27].mxu1 }
 0x5ef   : > { %v5314_v34 = vmul.f32 %v5259_v16, %v9501_v38 }
 0x5f0   : > { %6355 = vmatpush3.bf16.xpose.msk.msra.mxu1 %vm9378_vm2, %v6353_v12 }
 0x5f1   : > { %v6368_v49 = vpack.c.bf16 %v5315_v5, %v5314_v34  ;;  %v6326_v30 = vpop.f32.mrb[28].mxu1  ;;  %6358 = vmatprep.subr.msk.bf16.mxu1 %vm9378_vm2, %v6356_v32 }
 0x5f2   : > { %v5317_v10 = vmul.f32 %v6326_v30, %v9502_v43  ;;  %v5269_v15 = vpop.f32.mrb[29].mxu1 }
 0x5f3   : > { %v5316_v57 = vmul.f32 %v5269_v15, %v9503_v50 }
 0x5f5   : > { %v6374_v4 = vpack.c.bf16 %v5317_v10, %v5316_v57 }
 0x5f8   : > { %6361 = vmatpush3.bf16.xpose.msk.msra.mxu1 %vm9378_vm2, %v6359_v18  ;;  %v9504_v18 = vld [vmem:[#allocation18_spill] sm:$0xff] }
 0x5f9   : > { %6364 = vmatprep.subr.msk.bf16.mxu1 %vm9378_vm2, %v6362_v52 }
 0x600   : > { %6367 = vmatpush3.bf16.xpose.msk.msra.mxu1 %vm9378_vm2, %v6365_v41 }
 0x601   : > { %6370 = vmatprep.subr.msk.bf16.mxu1 %vm9378_vm2, %v6368_v49 }
 0x608   : > { %6373 = vmatpush3.bf16.xpose.msk.msra.mxu1 %vm9378_vm2, %v6371_v9 }
 0x609   : > { %6376 = vmatprep.subr.msk.bf16.mxu1 %vm9378_vm2, %v6374_v4 }
 0x610   : > { %6379 = vmatpush3.bf16.xpose.msk.msra.mxu1 %vm9378_vm2, %v6377_v44 }
 0x634   : > { %v6329_v12 = vpop.f32.mrb[30].mxu1 }
 0x635   : > { %v5319_v27 = vmul.f32 %v6329_v12, %v9026_v39  ;;  %v5279_v14 = vpop.f32.mrb[31].mxu1 }
 0x636   : > { %v5318_v58 = vmul.f32 %v5279_v14, %v9504_v18 }
 0x638   : > { %v6380_v31 = vpack.c.bf16 %v5319_v27, %v5318_v58 }
 0x63a   : > { %6382 = vmatprep.subr.msk.bf16.mxu1 %vm9378_vm2, %v6380_v31 }
 0x63b   : > { %6385 = vmatpush3.bf16.xpose.msk.msra.mxu1 %vm9378_vm2, %v6383_v46 }
 0x642   : > { %6221 = vmatmul.mubr.msk.f32.vlgmr.msra.gmra.mrb[32].mxu1 %vm5321_vm1, %v9338_v19 }
 0x715   : > { %v5487_v41 = vpop.f32.mrb[32].mxu1 }
 0x716   : > { %5492 = vst [vmem:[%s219_s27] sm:$0xff] %v5487_v41  ;;  %v5489_v39 = vpop.f32.mrb[33].mxu1 }
 0x717   : > { %5493 = vst [vmem:[%s219_s27 + $0x8] sm:$0xff] %v5489_v39 }
 0x718 PF: > { %s14_s17 = sadd.s32 1, %s7210_s17   ;;  %s9505_s15 = smov %s7206_s16 }
 0x719   : > { %p11_p5 = scmp.ge.s32.totalorder %s14_s17, 4   ;;  %s9506_s16 = smov %s9508_s18 }
 0x71b   :  { %13 = sbr.rel (!%p11_p5) target bundleno = 2 (0x2), region = 69 }

</bundles_post_ra>
